<compile_context>
chip_gen: v6e
topology: v6e:2x2x1
jax: 0.10.0
libtpu: 0.0.40
codegen_flags: <defaults>
</compile_context>

<pallas_src>
import functools

import jax
import jax.numpy as jnp
from jax import lax
from jax.experimental import pallas as pl
from jax.experimental.pallas import tpu as pltpu

LEAKY_SLOPE = 0.01   # nn.LeakyReLU default negative_slope
BN_EPS = 1e-5        # nn.BatchNorm2d default eps


# --------------------------------------------------------------------------
# Kernels
# --------------------------------------------------------------------------
def _conv_stage_kernel(x_ref, top_ref, bot_ref, aff_ref, w_ref,
                       y_ref, stats_ref, band_ref, band_l_ref, band_r_ref,
                       *, TH, W, Ci, Co, n_bands, apply_act):
    """(optional BN affine + LeakyReLU) -> 3x3 'same' conv -> partial BN stats.

    x_ref     : (1, TH, W, Ci)  bf16   current row band
    top_ref   : (1, 1,  W, Ci)  bf16   row above the band (clamped index)
    bot_ref   : (1, 1,  W, Ci)  bf16   row below the band (clamped index)
    aff_ref   : (2, Ci)         f32    row0 = scale, row1 = shift
    w_ref     : (9, Ci, Co)     bf16   conv weight, tap = kh*3 + kw
    y_ref     : (1, TH, W, Co)  bf16   conv output (pre-BN)
    stats_ref : (1, 1, 2, Co)   f32    per-tile [sum, sum of squares]
    band_ref  : (TH+2, W, Ci)   bf16   row band with 1-row halos (kw = 0 taps)
    band_l/r  : (TH+2, W, Ci)   bf16   column-shifted copies (kw = -1 / +1)
    """
    hb = pl.program_id(1)

    def prep(v):
        if not apply_act:
            return v
        z = v.astype(jnp.float32) * aff_ref[0:1, :] + aff_ref[1:2, :]
        z = jnp.where(z > 0, z, LEAKY_SLOPE * z)
        return z.astype(jnp.bfloat16)

    # ---- Assemble the (TH+2, W, Ci) halo'd band.  Every store starts at
    #      W / channel offset 0 -> unmasked, (8,128)-aligned writes.
    band_ref[1:TH + 1] = prep(x_ref[0])
    band_ref[0:1] = prep(top_ref[0])
    band_ref[TH + 1:TH + 2] = prep(bot_ref[0])

    @pl.when(hb == 0)
    def _():  # first band: the row above the image is zero padding
        band_ref[0:1] = jnp.zeros((1, W, Ci), jnp.bfloat16)

    @pl.when(hb == n_bands - 1)
    def _():  # last band: the row below the image is zero padding
        band_ref[TH + 1:TH + 2] = jnp.zeros((1, W, Ci), jnp.bfloat16)

    # ---- Column-shifted copies for the kw = 0 / kw = 2 taps, built once per
    #      step with the zero 'same'-padding column inserted.  Reads/writes of
    #      all three band buffers stay fully aligned; the 1-column shift goes
    #      through the sublane-shift path instead of misaligned stores.
    v = band_ref[...]
    zcol = jnp.zeros((TH + 2, 1, Ci), jnp.bfloat16)
    band_l_ref[...] = jnp.concatenate([zcol, v[:, :W - 1, :]], axis=1)  # x[w-1]
    band_r_ref[...] = jnp.concatenate([v[:, 1:, :], zcol], axis=1)      # x[w+1]

    # ---- 3x3 conv as 9 accumulated MXU dots (K = Ci each), f32 accumulator.
    srcs = (band_l_ref, band_ref, band_r_ref)           # kw = 0, 1, 2
    acc = jnp.zeros((TH * W, Co), jnp.float32)
    for kh in range(3):
        for kw in range(3):
            a = srcs[kw][kh:kh + TH].reshape(TH * W, Ci)
            acc = acc + jnp.dot(a, w_ref[kh * 3 + kw],
                                preferred_element_type=jnp.float32)

    # ---- Single-pass BN partial statistics from the f32 accumulator.
    stats_ref[0, 0, 0:1, :] = jnp.sum(acc, axis=0, keepdims=True)
    stats_ref[0, 0, 1:2, :] = jnp.sum(acc * acc, axis=0, keepdims=True)
    y_ref[0] = acc.astype(jnp.bfloat16).reshape(TH, W, Co)


def _bn_act_kernel(x_ref, aff_ref, o_ref):
    """Final BatchNorm affine + LeakyReLU (element-wise)."""
    z = x_ref[0].astype(jnp.float32) * aff_ref[0:1, :] + aff_ref[1:2, :]
    o_ref[0] = jnp.where(z > 0, z, LEAKY_SLOPE * z)


# --------------------------------------------------------------------------
# pallas_call wrappers
# --------------------------------------------------------------------------
def _conv_stage(x, aff, w, *, TH, apply_act, vmem_limit):
    N, H, W, Ci = x.shape
    Co = w.shape[-1]
    nH = H // TH
    kern = functools.partial(_conv_stage_kernel, TH=TH, W=W, Ci=Ci, Co=Co,
                             n_bands=nH, apply_act=apply_act)
    return pl.pallas_call(
        kern,
        out_shape=(jax.ShapeDtypeStruct((N, H, W, Co), jnp.bfloat16),
                   jax.ShapeDtypeStruct((N, nH, 2, Co), jnp.float32)),
        grid=(N, nH),
        in_specs=[
            # main row band
            pl.BlockSpec((1, TH, W, Ci), lambda n, h: (n, h, 0, 0)),
            # 1-row halo above / below (clamped; masked in-kernel at edges)
            pl.BlockSpec((1, 1, W, Ci),
                         lambda n, h: (n, jnp.maximum(h * TH - 1, 0), 0, 0)),
            pl.BlockSpec((1, 1, W, Ci),
                         lambda n, h: (n, jnp.minimum((h + 1) * TH, H - 1),
                                       0, 0)),
            # per-channel scale/shift and conv weights (resident)
            pl.BlockSpec((2, Ci), lambda n, h: (0, 0)),
            pl.BlockSpec((9, Ci, Co), lambda n, h: (0, 0, 0)),
        ],
        out_specs=(
            pl.BlockSpec((1, TH, W, Co), lambda n, h: (n, h, 0, 0)),
            pl.BlockSpec((1, 1, 2, Co), lambda n, h: (n, h, 0, 0)),
        ),
        scratch_shapes=[pltpu.VMEM((TH + 2, W, Ci), jnp.bfloat16)] * 3,
        compiler_params=pltpu.CompilerParams(
            dimension_semantics=("parallel", "parallel"),
            vmem_limit_bytes=vmem_limit),
    )(x, x, x, aff, w)


def _bn_act(y, aff, *, TH, vmem_limit):
    N, H, W, C = y.shape
    nH = H // TH
    return pl.pallas_call(
        _bn_act_kernel,
        out_shape=jax.ShapeDtypeStruct((N, H, W, C), jnp.float32),
        grid=(N, nH),
        in_specs=[pl.BlockSpec((1, TH, W, C), lambda n, h: (n, h, 0, 0)),
                  pl.BlockSpec((2, C), lambda n, h: (0, 0))],
        out_specs=pl.BlockSpec((1, TH, W, C), lambda n, h: (n, h, 0, 0)),
        compiler_params=pltpu.CompilerParams(
            dimension_semantics=("parallel", "parallel"),
            vmem_limit_bytes=vmem_limit),
    )(y, aff)


# --------------------------------------------------------------------------
# Host-side helpers
# --------------------------------------------------------------------------
def _affine_from_stats(stats, gamma, beta, count):
    # stats: (N, nH, 2, C) per-tile [sum, sumsq] partials (f32).
    tot = jnp.sum(stats, axis=(0, 1))                   # (2, C)
    mean = tot[0] / count
    var = jnp.maximum(tot[1] / count - mean * mean, 0.0)
    scale = gamma * lax.rsqrt(var + BN_EPS)
    shift = beta - mean * scale
    return jnp.stack([scale, shift], axis=0)            # (2, C)


def _stage_footprint_bytes(th, w, ci, co):
    """Real per-step VMEM footprint of one conv stage (not just the matmul)."""
    band = (th + 2) * w * ci * 2                        # one bf16 band buffer
    scratch = 3 * band                                  # band + 2 shifted copies
    blocks = 2 * (th * w * ci * 2                       # x block (double buffered)
                  + th * w * co * 2                     # y block (double buffered)
                  + 2 * w * ci * 2                      # halo rows
                  + 9 * ci * co * 2                     # conv weights
                  + 2 * co * 4 + 2 * ci * 4)            # stats / affine
    temps = 2 * band + 2 * th * w * co * 4              # value temps + f32 acc
    return scratch + blocks + temps


def _vmem_budget():
    """(working-set budget, vmem_limit_bytes) for the current TPU generation."""
    cap = 64 * 1024 * 1024                              # conservative default
    try:
        cap = pltpu.get_tpu_info().vmem_capacity_bytes
    except Exception:
        pass
    if cap >= 96 * 1024 * 1024:                         # v5e / v6e: 128 MiB VMEM
        return 28 * 1024 * 1024, 96 * 1024 * 1024
    return 18 * 1024 * 1024, 48 * 1024 * 1024           # v7x: 64 MiB per core


def _pick_band(h, w, ci, co, budget):
    """Largest divisor of H whose real per-step footprint fits the budget."""
    best = 1
    for th in range(1, h + 1):
        if h % th == 0 and _stage_footprint_bytes(th, w, ci, co) <= budget:
            best = th
    if best == 1 and h > 1:
        # Relaxation for prime H / very wide rows: prefer a small multi-row
        # band over a degenerate 1-row band if it still (loosely) fits.
        cands = [d for d in range(2, h + 1) if h % d == 0]
        if cands and _stage_footprint_bytes(cands[0], w, ci, co) <= 2 * budget:
            best = cands[0]
    return best


@functools.partial(jax.jit, static_argnames=("band_rows",))
def conv_block(x_nchw, params, band_rows=None):
    """IRU-Net ConvBlock forward.  x: (N, Cin, H, W) f32 -> (N, Cout, H, W)."""
    N, Cin, H, W = x_nchw.shape
    Cout = params["w1"].shape[-1]

    # NHWC bf16 with the TRUE channel count (no lane padding): conv1 is
    # HBM-bound, so padded-channel reads would inflate its bytes ~128/Cin-x.
    x = jnp.transpose(x_nchw, (0, 2, 3, 1)).astype(jnp.bfloat16)

    w1 = params["w1"].astype(jnp.bfloat16).reshape(9, Cin, Cout)   # tap-major
    w2 = params["w2"].astype(jnp.bfloat16).reshape(9, Cout, Cout)
    g1 = jnp.asarray(params["gamma1"], jnp.float32)
    b1 = jnp.asarray(params["beta1"], jnp.float32)
    g2 = jnp.asarray(params["gamma2"], jnp.float32)
    b2 = jnp.asarray(params["beta2"], jnp.float32)
    # NOTE: conv biases (params['b1'], params['b2']) are exactly cancelled by
    # the training-mode BatchNorm mean subtraction, so they are dropped.

    budget, vmem_limit = _vmem_budget()
    if band_rows is None:
        TH = _pick_band(H, W, max(Cin, Cout), Cout, budget)
    else:
        TH = band_rows
    assert H % TH == 0, (H, TH)

    count = N * H * W
    dummy_aff = jnp.zeros((2, Cin), jnp.float32)

    # Pass 1: conv1 (+ per-tile BN1 partial stats).
    y1, st1 = _conv_stage(x, dummy_aff, w1, TH=TH, apply_act=False,
                          vmem_limit=vmem_limit)
    aff1 = _affine_from_stats(st1, g1, b1, count)
    # Pass 2: BN1 + LeakyReLU + conv2 (+ per-tile BN2 partial stats).
    y2, st2 = _conv_stage(y1, aff1, w2, TH=TH, apply_act=True,
                          vmem_limit=vmem_limit)
    aff2 = _affine_from_stats(st2, g2, b2, count)
    # Pass 3: BN2 + LeakyReLU (f32, only the real Cout channels).
    out = _bn_act(y2, aff2, TH=TH, vmem_limit=vmem_limit)   # (N, H, W, Cout)

    # NHWC -> NCHW handled by XLA (in-kernel transpose fusion left as future work).
    return jnp.transpose(out, (0, 3, 1, 2))


# --------------------------------------------------------------------------
# Pure-JAX reference (correctness check only)
# --------------------------------------------------------------------------
def conv_block_ref(x_nchw, params):
    x = jnp.transpose(x_nchw, (0, 2, 3, 1)).astype(jnp.float32)

    def conv(z, w, b):
        y = lax.conv_general_dilated(
            z, w.astype(jnp.float32), window_strides=(1, 1), padding="SAME",
            dimension_numbers=("NHWC", "HWIO", "NHWC"))
        return y + b.reshape(1, 1, 1, -1)

    def bn_lrelu(y, g, be):
        mean = jnp.mean(y, axis=(0, 1, 2), keepdims=True)
        var = jnp.mean((y - mean) ** 2, axis=(0, 1, 2), keepdims=True)
        yn = (y - mean) / jnp.sqrt(var + BN_EPS) * g.reshape(1, 1, 1, -1) \
            + be.reshape(1, 1, 1, -1)
        return jnp.where(yn > 0, yn, LEAKY_SLOPE * yn)

    y = bn_lrelu(conv(x, params["w1"], params["b1"]),
                 params["gamma1"], params["beta1"])
    y = bn_lrelu(conv(y, params["w2"], params["b2"]),
                 params["gamma2"], params["beta2"])
    return jnp.transpose(y, (0, 3, 1, 2))


# TODO(synk): BatchNorm2d running_mean/running_var (momentum) buffer updates
# are a training-time side effect of the PyTorch module and are not part of
# the returned forward value; they are not implemented here.

if __name__ == "__main__":
    key = jax.random.PRNGKey(0)
    N, Cin, Cout, H, W = 2, 4, 8, 16, 16
    ks = jax.random.split(key, 9)

    params = {
        "w1": 0.2 * jax.random.normal(ks[0], (3, 3, Cin, Cout), jnp.float32),
        "b1": 0.1 * jax.random.normal(ks[1], (Cout,), jnp.float32),
        "gamma1": 1.0 + 0.1 * jax.random.normal(ks[2], (Cout,), jnp.float32),
        "beta1": 0.1 * jax.random.normal(ks[3], (Cout,), jnp.float32),
        "w2": 0.2 * jax.random.normal(ks[4], (3, 3, Cout, Cout), jnp.float32),
        "b2": 0.1 * jax.random.normal(ks[5], (Cout,), jnp.float32),
        "gamma2": 1.0 + 0.1 * jax.random.normal(ks[6], (Cout,), jnp.float32),
        "beta2": 0.1 * jax.random.normal(ks[7], (Cout,), jnp.float32),
    }
    x = jax.random.normal(ks[8], (N, Cin, H, W), jnp.float32)

    ref = jax.block_until_ready(conv_block_ref(x, params))

    # band_rows=8 exercises the multi-band halo path; None picks the band
    # size automatically from the per-generation VMEM budget.
    for band in (8, None):
        out = jax.block_until_ready(conv_block(x, params, band_rows=band))
        assert out.shape == (N, Cout, H, W), out.shape
        max_err = float(jnp.max(jnp.abs(out - ref)))
        # bf16 MXU operands / bf16 intermediates -> relaxed tolerance.
        assert jnp.allclose(out, ref, atol=5e-2, rtol=5e-2), (band, max_err)

    print("KERNEL_OK")
</pallas_src>

<mosaic_0001>
module attributes {stable_mosaic.version = 11 : i64} {
  func.func @_conv_stage_kernel(%arg0: i32, %arg1: i32, %arg2: memref<1x8x16x4xbf16, #tpu.memory_space<vmem>>, %arg3: memref<1x1x16x4xbf16, #tpu.memory_space<vmem>>, %arg4: memref<1x1x16x4xbf16, #tpu.memory_space<vmem>>, %arg5: memref<2x4xf32, #tpu.memory_space<vmem>>, %arg6: memref<9x4x8xbf16, #tpu.memory_space<vmem>>, %arg7: memref<1x8x16x8xbf16, #tpu.memory_space<vmem>>, %arg8: memref<1x1x2x8xf32, #tpu.memory_space<vmem>>, %arg9: memref<10x16x4xbf16, #tpu.memory_space<vmem>>, %arg10: memref<10x16x4xbf16, #tpu.memory_space<vmem>>, %arg11: memref<10x16x4xbf16, #tpu.memory_space<vmem>>) attributes {dimension_semantics = [#tpu.dimension_semantics<parallel>, #tpu.dimension_semantics<parallel>], iteration_bounds = array<i64: 2, 2>, scalar_prefetch = 0 : i64, scratch_operands = 3 : i64, tpu.core_type = #tpu.core_type<tc>, window_params = [{transform_indices = @transform_0, window_bounds = array<i64: 1, 8, 16, 4>}, {transform_indices = @transform_1, window_bounds = array<i64: 1, 1, 16, 4>}, {transform_indices = @transform_2, window_bounds = array<i64: 1, 1, 16, 4>}, {pipeline_mode = #tpu.pipeline_mode<synchronous>, transform_indices = @transform_3, window_bounds = array<i64: 2, 4>}, {pipeline_mode = #tpu.pipeline_mode<synchronous>, transform_indices = @transform_4, window_bounds = array<i64: 9, 4, 8>}, {transform_indices = @transform_5, window_bounds = array<i64: 1, 8, 16, 8>}, {transform_indices = @transform_6, window_bounds = array<i64: 1, 1, 2, 8>}]} {
    %c0 = arith.constant 0 : index
    %c0_0 = arith.constant 0 : index
    %c0_1 = arith.constant 0 : index
    %c0_2 = arith.constant 0 : index
    %0 = vector.load %arg2[%c0, %c0_0, %c0_1, %c0_2] : memref<1x8x16x4xbf16, #tpu.memory_space<vmem>>, vector<1x8x16x4xbf16>
    %1 = vector.shape_cast %0 : vector<1x8x16x4xbf16> to vector<8x16x4xbf16>
    %c1 = arith.constant 1 : index
    %c0_3 = arith.constant 0 : index
    %c0_4 = arith.constant 0 : index
    %2 = vector.load %arg9[%c1, %c0_3, %c0_4] : memref<10x16x4xbf16, #tpu.memory_space<vmem>>, vector<8x16x4xbf16>
    tpu.vector_store %arg9[%c1, %c0_3, %c0_4], %1 {strides = array<i32>} : memref<10x16x4xbf16, #tpu.memory_space<vmem>>, vector<8x16x4xbf16>,
    %c0_5 = arith.constant 0 : index
    %c0_6 = arith.constant 0 : index
    %c0_7 = arith.constant 0 : index
    %c0_8 = arith.constant 0 : index
    %3 = vector.load %arg3[%c0_5, %c0_6, %c0_7, %c0_8] : memref<1x1x16x4xbf16, #tpu.memory_space<vmem>>, vector<1x1x16x4xbf16>
    %4 = vector.shape_cast %3 : vector<1x1x16x4xbf16> to vector<1x16x4xbf16>
    %c0_9 = arith.constant 0 : index
    %c0_10 = arith.constant 0 : index
    %c0_11 = arith.constant 0 : index
    %5 = vector.load %arg9[%c0_9, %c0_10, %c0_11] : memref<10x16x4xbf16, #tpu.memory_space<vmem>>, vector<1x16x4xbf16>
    tpu.vector_store %arg9[%c0_9, %c0_10, %c0_11], %4 {strides = array<i32>} : memref<10x16x4xbf16, #tpu.memory_space<vmem>>, vector<1x16x4xbf16>,
    %c0_12 = arith.constant 0 : index
    %c0_13 = arith.constant 0 : index
    %c0_14 = arith.constant 0 : index
    %c0_15 = arith.constant 0 : index
    %6 = vector.load %arg4[%c0_12, %c0_13, %c0_14, %c0_15] : memref<1x1x16x4xbf16, #tpu.memory_space<vmem>>, vector<1x1x16x4xbf16>
    %7 = vector.shape_cast %6 : vector<1x1x16x4xbf16> to vector<1x16x4xbf16>
    %c9 = arith.constant 9 : index
    %c0_16 = arith.constant 0 : index
    %c0_17 = arith.constant 0 : index
    %8 = vector.load %arg9[%c9, %c0_16, %c0_17] : memref<10x16x4xbf16, #tpu.memory_space<vmem>>, vector<1x16x4xbf16>
    tpu.vector_store %arg9[%c9, %c0_16, %c0_17], %7 {strides = array<i32>} : memref<10x16x4xbf16, #tpu.memory_space<vmem>>, vector<1x16x4xbf16>,
    %c0_i32 = arith.constant 0 : i32
    %9 = arith.cmpi eq, %arg1, %c0_i32 : i32
    %10 = arith.extui %9 : i1 to i32
    %c0_i32_18 = arith.constant 0 : i32
    %11 = arith.cmpi ne, %10, %c0_i32_18 : i32
    scf.if %11 {
      %cst_100 = arith.constant 0.000000e+00 : bf16
      %94 = vector.broadcast %cst_100 : bf16 to vector<1x16x4xbf16>
      %c0_101 = arith.constant 0 : index
      %c0_102 = arith.constant 0 : index
      %c0_103 = arith.constant 0 : index
      %95 = vector.load %arg9[%c0_101, %c0_102, %c0_103] : memref<10x16x4xbf16, #tpu.memory_space<vmem>>, vector<1x16x4xbf16>
      tpu.vector_store %arg9[%c0_101, %c0_102, %c0_103], %94 {strides = array<i32>} : memref<10x16x4xbf16, #tpu.memory_space<vmem>>, vector<1x16x4xbf16>,
    } else {
    }
    %c1_i32 = arith.constant 1 : i32
    %12 = arith.cmpi eq, %arg1, %c1_i32 : i32
    %13 = arith.extui %12 : i1 to i32
    %c0_i32_19 = arith.constant 0 : i32
    %14 = arith.cmpi ne, %13, %c0_i32_19 : i32
    scf.if %14 {
      %cst_100 = arith.constant 0.000000e+00 : bf16
      %94 = vector.broadcast %cst_100 : bf16 to vector<1x16x4xbf16>
      %c9_101 = arith.constant 9 : index
      %c0_102 = arith.constant 0 : index
      %c0_103 = arith.constant 0 : index
      %95 = vector.load %arg9[%c9_101, %c0_102, %c0_103] : memref<10x16x4xbf16, #tpu.memory_space<vmem>>, vector<1x16x4xbf16>
      tpu.vector_store %arg9[%c9_101, %c0_102, %c0_103], %94 {strides = array<i32>} : memref<10x16x4xbf16, #tpu.memory_space<vmem>>, vector<1x16x4xbf16>,
    } else {
    }
    %c0_20 = arith.constant 0 : index
    %c0_21 = arith.constant 0 : index
    %c0_22 = arith.constant 0 : index
    %15 = vector.load %arg9[%c0_20, %c0_21, %c0_22] : memref<10x16x4xbf16, #tpu.memory_space<vmem>>, vector<10x16x4xbf16>
    %cst = arith.constant 0.000000e+00 : bf16
    %16 = vector.broadcast %cst : bf16 to vector<10x1x4xbf16>
    %17 = vector.extract_strided_slice %15 {offsets = [0, 0, 0], sizes = [10, 15, 4], strides = [1, 1, 1]} : vector<10x16x4xbf16> to vector<10x15x4xbf16>
    %18 = tpu.concatenate %16, %17 in 1 : vector<10x1x4xbf16>, vector<10x15x4xbf16> -> vector<10x16x4xbf16>
    %c0_23 = arith.constant 0 : index
    %c0_24 = arith.constant 0 : index
    %c0_25 = arith.constant 0 : index
    %19 = vector.load %arg10[%c0_23, %c0_24, %c0_25] : memref<10x16x4xbf16, #tpu.memory_space<vmem>>, vector<10x16x4xbf16>
    tpu.vector_store %arg10[%c0_23, %c0_24, %c0_25], %18 {strides = array<i32>} : memref<10x16x4xbf16, #tpu.memory_space<vmem>>, vector<10x16x4xbf16>,
    %20 = vector.extract_strided_slice %15 {offsets = [0, 1, 0], sizes = [10, 15, 4], strides = [1, 1, 1]} : vector<10x16x4xbf16> to vector<10x15x4xbf16>
    %21 = tpu.concatenate %20, %16 in 1 : vector<10x15x4xbf16>, vector<10x1x4xbf16> -> vector<10x16x4xbf16>
    %c0_26 = arith.constant 0 : index
    %c0_27 = arith.constant 0 : index
    %c0_28 = arith.constant 0 : index
    %22 = vector.load %arg11[%c0_26, %c0_27, %c0_28] : memref<10x16x4xbf16, #tpu.memory_space<vmem>>, vector<10x16x4xbf16>
    tpu.vector_store %arg11[%c0_26, %c0_27, %c0_28], %21 {strides = array<i32>} : memref<10x16x4xbf16, #tpu.memory_space<vmem>>, vector<10x16x4xbf16>,
    %cst_29 = arith.constant 0.000000e+00 : f32
    %23 = vector.broadcast %cst_29 : f32 to vector<128x8xf32>
    %c0_30 = arith.constant 0 : index
    %c0_31 = arith.constant 0 : index
    %c0_32 = arith.constant 0 : index
    %24 = vector.load %arg10[%c0_30, %c0_31, %c0_32] : memref<10x16x4xbf16, #tpu.memory_space<vmem>>, vector<8x16x4xbf16>
    %25 = vector.shape_cast %24 : vector<8x16x4xbf16> to vector<128x4xbf16>
    %c0_33 = arith.constant 0 : index
    %c0_34 = arith.constant 0 : index
    %c0_35 = arith.constant 0 : index
    %26 = vector.load %arg6[%c0_33, %c0_34, %c0_35] : memref<9x4x8xbf16, #tpu.memory_space<vmem>>, vector<1x4x8xbf16>
    %27 = vector.shape_cast %26 : vector<1x4x8xbf16> to vector<4x8xbf16>
    %cst_36 = arith.constant dense<0.000000e+00> : vector<128x8xf32>
    %28 = tpu.matmul %25, %27, %cst_36 {dimension_numbers = #tpu.dot_dimension_numbers<[1], [0], [0], [1], [0, 0, 1, 1], [], []>} : vector<128x4xbf16>, vector<4x8xbf16>, vector<128x8xf32> -> vector<128x8xf32>
    %29 = arith.addf %23, %28 : vector<128x8xf32>
    %c0_37 = arith.constant 0 : index
    %c0_38 = arith.constant 0 : index
    %c0_39 = arith.constant 0 : index
    %30 = vector.load %arg9[%c0_37, %c0_38, %c0_39] : memref<10x16x4xbf16, #tpu.memory_space<vmem>>, vector<8x16x4xbf16>
    %31 = vector.shape_cast %30 : vector<8x16x4xbf16> to vector<128x4xbf16>
    %c1_40 = arith.constant 1 : index
    %c0_41 = arith.constant 0 : index
    %c0_42 = arith.constant 0 : index
    %32 = vector.load %arg6[%c1_40, %c0_41, %c0_42] : memref<9x4x8xbf16, #tpu.memory_space<vmem>>, vector<1x4x8xbf16>
    %33 = vector.shape_cast %32 : vector<1x4x8xbf16> to vector<4x8xbf16>
    %cst_43 = arith.constant dense<0.000000e+00> : vector<128x8xf32>
    %34 = tpu.matmul %31, %33, %cst_43 {dimension_numbers = #tpu.dot_dimension_numbers<[1], [0], [0], [1], [0, 0, 1, 1], [], []>} : vector<128x4xbf16>, vector<4x8xbf16>, vector<128x8xf32> -> vector<128x8xf32>
    %35 = arith.addf %29, %34 : vector<128x8xf32>
    %c0_44 = arith.constant 0 : index
    %c0_45 = arith.constant 0 : index
    %c0_46 = arith.constant 0 : index
    %36 = vector.load %arg11[%c0_44, %c0_45, %c0_46] : memref<10x16x4xbf16, #tpu.memory_space<vmem>>, vector<8x16x4xbf16>
    %37 = vector.shape_cast %36 : vector<8x16x4xbf16> to vector<128x4xbf16>
    %c2 = arith.constant 2 : index
    %c0_47 = arith.constant 0 : index
    %c0_48 = arith.constant 0 : index
    %38 = vector.load %arg6[%c2, %c0_47, %c0_48] : memref<9x4x8xbf16, #tpu.memory_space<vmem>>, vector<1x4x8xbf16>
    %39 = vector.shape_cast %38 : vector<1x4x8xbf16> to vector<4x8xbf16>
    %cst_49 = arith.constant dense<0.000000e+00> : vector<128x8xf32>
    %40 = tpu.matmul %37, %39, %cst_49 {dimension_numbers = #tpu.dot_dimension_numbers<[1], [0], [0], [1], [0, 0, 1, 1], [], []>} : vector<128x4xbf16>, vector<4x8xbf16>, vector<128x8xf32> -> vector<128x8xf32>
    %41 = arith.addf %35, %40 : vector<128x8xf32>
    %c1_50 = arith.constant 1 : index
    %c0_51 = arith.constant 0 : index
    %c0_52 = arith.constant 0 : index
    %42 = vector.load %arg10[%c1_50, %c0_51, %c0_52] : memref<10x16x4xbf16, #tpu.memory_space<vmem>>, vector<8x16x4xbf16>
    %43 = vector.shape_cast %42 : vector<8x16x4xbf16> to vector<128x4xbf16>
    %c3 = arith.constant 3 : index
    %c0_53 = arith.constant 0 : index
    %c0_54 = arith.constant 0 : index
    %44 = vector.load %arg6[%c3, %c0_53, %c0_54] : memref<9x4x8xbf16, #tpu.memory_space<vmem>>, vector<1x4x8xbf16>
    %45 = vector.shape_cast %44 : vector<1x4x8xbf16> to vector<4x8xbf16>
    %cst_55 = arith.constant dense<0.000000e+00> : vector<128x8xf32>
    %46 = tpu.matmul %43, %45, %cst_55 {dimension_numbers = #tpu.dot_dimension_numbers<[1], [0], [0], [1], [0, 0, 1, 1], [], []>} : vector<128x4xbf16>, vector<4x8xbf16>, vector<128x8xf32> -> vector<128x8xf32>
    %47 = arith.addf %41, %46 : vector<128x8xf32>
    %c1_56 = arith.constant 1 : index
    %c0_57 = arith.constant 0 : index
    %c0_58 = arith.constant 0 : index
    %48 = vector.load %arg9[%c1_56, %c0_57, %c0_58] : memref<10x16x4xbf16, #tpu.memory_space<vmem>>, vector<8x16x4xbf16>
    %49 = vector.shape_cast %48 : vector<8x16x4xbf16> to vector<128x4xbf16>
    %c4 = arith.constant 4 : index
    %c0_59 = arith.constant 0 : index
    %c0_60 = arith.constant 0 : index
    %50 = vector.load %arg6[%c4, %c0_59, %c0_60] : memref<9x4x8xbf16, #tpu.memory_space<vmem>>, vector<1x4x8xbf16>
    %51 = vector.shape_cast %50 : vector<1x4x8xbf16> to vector<4x8xbf16>
    %cst_61 = arith.constant dense<0.000000e+00> : vector<128x8xf32>
    %52 = tpu.matmul %49, %51, %cst_61 {dimension_numbers = #tpu.dot_dimension_numbers<[1], [0], [0], [1], [0, 0, 1, 1], [], []>} : vector<128x4xbf16>, vector<4x8xbf16>, vector<128x8xf32> -> vector<128x8xf32>
    %53 = arith.addf %47, %52 : vector<128x8xf32>
    %c1_62 = arith.constant 1 : index
    %c0_63 = arith.constant 0 : index
    %c0_64 = arith.constant 0 : index
    %54 = vector.load %arg11[%c1_62, %c0_63, %c0_64] : memref<10x16x4xbf16, #tpu.memory_space<vmem>>, vector<8x16x4xbf16>
    %55 = vector.shape_cast %54 : vector<8x16x4xbf16> to vector<128x4xbf16>
    %c5 = arith.constant 5 : index
    %c0_65 = arith.constant 0 : index
    %c0_66 = arith.constant 0 : index
    %56 = vector.load %arg6[%c5, %c0_65, %c0_66] : memref<9x4x8xbf16, #tpu.memory_space<vmem>>, vector<1x4x8xbf16>
    %57 = vector.shape_cast %56 : vector<1x4x8xbf16> to vector<4x8xbf16>
    %cst_67 = arith.constant dense<0.000000e+00> : vector<128x8xf32>
    %58 = tpu.matmul %55, %57, %cst_67 {dimension_numbers = #tpu.dot_dimension_numbers<[1], [0], [0], [1], [0, 0, 1, 1], [], []>} : vector<128x4xbf16>, vector<4x8xbf16>, vector<128x8xf32> -> vector<128x8xf32>
    %59 = arith.addf %53, %58 : vector<128x8xf32>
    %c2_68 = arith.constant 2 : index
    %c0_69 = arith.constant 0 : index
    %c0_70 = arith.constant 0 : index
    %60 = vector.load %arg10[%c2_68, %c0_69, %c0_70] : memref<10x16x4xbf16, #tpu.memory_space<vmem>>, vector<8x16x4xbf16>
    %61 = vector.shape_cast %60 : vector<8x16x4xbf16> to vector<128x4xbf16>
    %c6 = arith.constant 6 : index
    %c0_71 = arith.constant 0 : index
    %c0_72 = arith.constant 0 : index
    %62 = vector.load %arg6[%c6, %c0_71, %c0_72] : memref<9x4x8xbf16, #tpu.memory_space<vmem>>, vector<1x4x8xbf16>
    %63 = vector.shape_cast %62 : vector<1x4x8xbf16> to vector<4x8xbf16>
    %cst_73 = arith.constant dense<0.000000e+00> : vector<128x8xf32>
    %64 = tpu.matmul %61, %63, %cst_73 {dimension_numbers = #tpu.dot_dimension_numbers<[1], [0], [0], [1], [0, 0, 1, 1], [], []>} : vector<128x4xbf16>, vector<4x8xbf16>, vector<128x8xf32> -> vector<128x8xf32>
    %65 = arith.addf %59, %64 : vector<128x8xf32>
    %c2_74 = arith.constant 2 : index
    %c0_75 = arith.constant 0 : index
    %c0_76 = arith.constant 0 : index
    %66 = vector.load %arg9[%c2_74, %c0_75, %c0_76] : memref<10x16x4xbf16, #tpu.memory_space<vmem>>, vector<8x16x4xbf16>
    %67 = vector.shape_cast %66 : vector<8x16x4xbf16> to vector<128x4xbf16>
    %c7 = arith.constant 7 : index
    %c0_77 = arith.constant 0 : index
    %c0_78 = arith.constant 0 : index
    %68 = vector.load %arg6[%c7, %c0_77, %c0_78] : memref<9x4x8xbf16, #tpu.memory_space<vmem>>, vector<1x4x8xbf16>
    %69 = vector.shape_cast %68 : vector<1x4x8xbf16> to vector<4x8xbf16>
    %cst_79 = arith.constant dense<0.000000e+00> : vector<128x8xf32>
    %70 = tpu.matmul %67, %69, %cst_79 {dimension_numbers = #tpu.dot_dimension_numbers<[1], [0], [0], [1], [0, 0, 1, 1], [], []>} : vector<128x4xbf16>, vector<4x8xbf16>, vector<128x8xf32> -> vector<128x8xf32>
    %71 = arith.addf %65, %70 : vector<128x8xf32>
    %c2_80 = arith.constant 2 : index
    %c0_81 = arith.constant 0 : index
    %c0_82 = arith.constant 0 : index
    %72 = vector.load %arg11[%c2_80, %c0_81, %c0_82] : memref<10x16x4xbf16, #tpu.memory_space<vmem>>, vector<8x16x4xbf16>
    %73 = vector.shape_cast %72 : vector<8x16x4xbf16> to vector<128x4xbf16>
    %c8 = arith.constant 8 : index
    %c0_83 = arith.constant 0 : index
    %c0_84 = arith.constant 0 : index
    %74 = vector.load %arg6[%c8, %c0_83, %c0_84] : memref<9x4x8xbf16, #tpu.memory_space<vmem>>, vector<1x4x8xbf16>
    %75 = vector.shape_cast %74 : vector<1x4x8xbf16> to vector<4x8xbf16>
    %cst_85 = arith.constant dense<0.000000e+00> : vector<128x8xf32>
    %76 = tpu.matmul %73, %75, %cst_85 {dimension_numbers = #tpu.dot_dimension_numbers<[1], [0], [0], [1], [0, 0, 1, 1], [], []>} : vector<128x4xbf16>, vector<4x8xbf16>, vector<128x8xf32> -> vector<128x8xf32>
    %77 = arith.addf %71, %76 : vector<128x8xf32>
    %cst_86 = arith.constant dense<0.000000e+00> : vector<8xf32>
    %78 = vector.multi_reduction <add>, %77, %cst_86 [0] : vector<128x8xf32> to vector<8xf32>
    %79 = vector.shape_cast %78 : vector<8xf32> to vector<1x8xf32>
    %c0_87 = arith.constant 0 : index
    %c0_88 = arith.constant 0 : index
    %c0_89 = arith.constant 0 : index
    %c0_90 = arith.constant 0 : index
    %80 = vector.load %arg8[%c0_87, %c0_88, %c0_89, %c0_90] : memref<1x1x2x8xf32, #tpu.memory_space<vmem>>, vector<1x1x1x8xf32>
    %81 = vector.shape_cast %80 : vector<1x1x1x8xf32> to vector<1x8xf32>
    %82 = vector.shape_cast %79 : vector<1x8xf32> to vector<1x1x1x8xf32>
    tpu.vector_store %arg8[%c0_87, %c0_88, %c0_89, %c0_90], %82 {strides = array<i32>} : memref<1x1x2x8xf32, #tpu.memory_space<vmem>>, vector<1x1x1x8xf32>,
    %83 = arith.mulf %77, %77 : vector<128x8xf32>
    %cst_91 = arith.constant dense<0.000000e+00> : vector<8xf32>
    %84 = vector.multi_reduction <add>, %83, %cst_91 [0] : vector<128x8xf32> to vector<8xf32>
    %85 = vector.shape_cast %84 : vector<8xf32> to vector<1x8xf32>
    %c0_92 = arith.constant 0 : index
    %c0_93 = arith.constant 0 : index
    %c1_94 = arith.constant 1 : index
    %c0_95 = arith.constant 0 : index
    %86 = vector.load %arg8[%c0_92, %c0_93, %c1_94, %c0_95] : memref<1x1x2x8xf32, #tpu.memory_space<vmem>>, vector<1x1x1x8xf32>
    %87 = vector.shape_cast %86 : vector<1x1x1x8xf32> to vector<1x8xf32>
    %88 = vector.shape_cast %85 : vector<1x8xf32> to vector<1x1x1x8xf32>
    tpu.vector_store %arg8[%c0_92, %c0_93, %c1_94, %c0_95], %88 {strides = array<i32>} : memref<1x1x2x8xf32, #tpu.memory_space<vmem>>, vector<1x1x1x8xf32>,
    %89 = arith.truncf %77 : vector<128x8xf32> to vector<128x8xbf16>
    %90 = vector.shape_cast %89 : vector<128x8xbf16> to vector<8x16x8xbf16>
    %c0_96 = arith.constant 0 : index
    %c0_97 = arith.constant 0 : index
    %c0_98 = arith.constant 0 : index
    %c0_99 = arith.constant 0 : index
    %91 = vector.load %arg7[%c0_96, %c0_97, %c0_98, %c0_99] : memref<1x8x16x8xbf16, #tpu.memory_space<vmem>>, vector<1x8x16x8xbf16>
    %92 = vector.shape_cast %91 : vector<1x8x16x8xbf16> to vector<8x16x8xbf16>
    %93 = vector.shape_cast %90 : vector<8x16x8xbf16> to vector<1x8x16x8xbf16>
    tpu.vector_store %arg7[%c0_96, %c0_97, %c0_98, %c0_99], %93 {strides = array<i32>} : memref<1x8x16x8xbf16, #tpu.memory_space<vmem>>, vector<1x8x16x8xbf16>,
    return
  }
  func.func @transform_0(%arg0: i32, %arg1: i32) -> (i32, i32, i32, i32) {
    %c0_i32 = arith.constant 0 : i32
    %c0_i32_0 = arith.constant 0 : i32
    %c0_i32_1 = arith.constant 0 : i32
    return %arg0, %arg1, %c0_i32, %c0_i32_0 : i32, i32, i32, i32
  }
  func.func @transform_1(%arg0: i32, %arg1: i32) -> (i32, i32, i32, i32) {
    %c8_i32 = arith.constant 8 : i32
    %0 = arith.muli %arg1, %c8_i32 : i32
    %c1_i32 = arith.constant 1 : i32
    %1 = arith.subi %0, %c1_i32 : i32
    %c0_i32 = arith.constant 0 : i32
    %2 = arith.maxsi %1, %c0_i32 : i32
    %c0_i32_0 = arith.constant 0 : i32
    %c0_i32_1 = arith.constant 0 : i32
    %c0_i32_2 = arith.constant 0 : i32
    return %arg0, %2, %c0_i32_0, %c0_i32_1 : i32, i32, i32, i32
  }
  func.func @transform_2(%arg0: i32, %arg1: i32) -> (i32, i32, i32, i32) {
    %c1_i32 = arith.constant 1 : i32
    %0 = arith.addi %arg1, %c1_i32 : i32
    %c8_i32 = arith.constant 8 : i32
    %1 = arith.muli %0, %c8_i32 : i32
    %c15_i32 = arith.constant 15 : i32
    %2 = arith.minsi %1, %c15_i32 : i32
    %c0_i32 = arith.constant 0 : i32
    %c0_i32_0 = arith.constant 0 : i32
    %c0_i32_1 = arith.constant 0 : i32
    return %arg0, %2, %c0_i32, %c0_i32_0 : i32, i32, i32, i32
  }
  func.func @transform_3(%arg0: i32, %arg1: i32) -> (i32, i32) {
    %c0_i32 = arith.constant 0 : i32
    %c0_i32_0 = arith.constant 0 : i32
    %c0_i32_1 = arith.constant 0 : i32
    return %c0_i32, %c0_i32_0 : i32, i32
  }
  func.func @transform_4(%arg0: i32, %arg1: i32) -> (i32, i32, i32) {
    %c0_i32 = arith.constant 0 : i32
    %c0_i32_0 = arith.constant 0 : i32
    %c0_i32_1 = arith.constant 0 : i32
    %c0_i32_2 = arith.constant 0 : i32
    return %c0_i32, %c0_i32_0, %c0_i32_1 : i32, i32, i32
  }
  func.func @transform_5(%arg0: i32, %arg1: i32) -> (i32, i32, i32, i32) {
    %c0_i32 = arith.constant 0 : i32
    %c0_i32_0 = arith.constant 0 : i32
    %c0_i32_1 = arith.constant 0 : i32
    return %arg0, %arg1, %c0_i32, %c0_i32_0 : i32, i32, i32, i32
  }
  func.func @transform_6(%arg0: i32, %arg1: i32) -> (i32, i32, i32, i32) {
    %c0_i32 = arith.constant 0 : i32
    %c0_i32_0 = arith.constant 0 : i32
    %c0_i32_1 = arith.constant 0 : i32
    return %arg0, %arg1, %c0_i32, %c0_i32_0 : i32, i32, i32, i32
  }
}

module attributes {stable_mosaic.version = 11 : i64} {
  func.func @_bn_act_kernel(%arg0: i32, %arg1: i32, %arg2: memref<1x8x16x8xbf16, #tpu.memory_space<vmem>>, %arg3: memref<2x8xf32, #tpu.memory_space<vmem>>, %arg4: memref<1x8x16x8xf32, #tpu.memory_space<vmem>>) attributes {dimension_semantics = [#tpu.dimension_semantics<parallel>, #tpu.dimension_semantics<parallel>], iteration_bounds = array<i64: 2, 2>, scalar_prefetch = 0 : i64, scratch_operands = 0 : i64, tpu.core_type = #tpu.core_type<tc>, window_params = [{transform_indices = @transform_0, window_bounds = array<i64: 1, 8, 16, 8>}, {pipeline_mode = #tpu.pipeline_mode<synchronous>, transform_indices = @transform_1, window_bounds = array<i64: 2, 8>}, {transform_indices = @transform_2, window_bounds = array<i64: 1, 8, 16, 8>}]} {
    %c0 = arith.constant 0 : index
    %c0_0 = arith.constant 0 : index
    %c0_1 = arith.constant 0 : index
    %c0_2 = arith.constant 0 : index
    %0 = vector.load %arg2[%c0, %c0_0, %c0_1, %c0_2] : memref<1x8x16x8xbf16, #tpu.memory_space<vmem>>, vector<1x8x16x8xbf16>
    %1 = vector.shape_cast %0 : vector<1x8x16x8xbf16> to vector<8x16x8xbf16>
    %2 = arith.extf %1 : vector<8x16x8xbf16> to vector<8x16x8xf32>
    %c0_3 = arith.constant 0 : index
    %c0_4 = arith.constant 0 : index
    %3 = vector.load %arg3[%c0_3, %c0_4] : memref<2x8xf32, #tpu.memory_space<vmem>>, vector<1x8xf32>
    %4 = vector.shape_cast %3 : vector<1x8xf32> to vector<1x1x8xf32>
    %5 = vector.broadcast %4 : vector<1x1x8xf32> to vector<8x16x8xf32>
    %6 = arith.mulf %2, %5 : vector<8x16x8xf32>
    %c1 = arith.constant 1 : index
    %c0_5 = arith.constant 0 : index
    %7 = vector.load %arg3[%c1, %c0_5] : memref<2x8xf32, #tpu.memory_space<vmem>>, vector<1x8xf32>
    %8 = vector.shape_cast %7 : vector<1x8xf32> to vector<1x1x8xf32>
    %9 = vector.broadcast %8 : vector<1x1x8xf32> to vector<8x16x8xf32>
    %10 = arith.addf %6, %9 : vector<8x16x8xf32>
    %cst = arith.constant 0.000000e+00 : f32
    %11 = vector.broadcast %cst : f32 to vector<8x16x8xf32>
    %12 = arith.cmpf ogt, %10, %11 : vector<8x16x8xf32>
    %cst_6 = arith.constant 0.00999999977 : f32
    %13 = vector.broadcast %cst_6 : f32 to vector<8x16x8xf32>
    %14 = arith.mulf %13, %10 : vector<8x16x8xf32>
    %15 = arith.select %12, %10, %14 : vector<8x16x8xi1>, vector<8x16x8xf32>
    %c0_7 = arith.constant 0 : index
    %c0_8 = arith.constant 0 : index
    %c0_9 = arith.constant 0 : index
    %c0_10 = arith.constant 0 : index
    %16 = vector.load %arg4[%c0_7, %c0_8, %c0_9, %c0_10] : memref<1x8x16x8xf32, #tpu.memory_space<vmem>>, vector<1x8x16x8xf32>
    %17 = vector.shape_cast %16 : vector<1x8x16x8xf32> to vector<8x16x8xf32>
    %18 = vector.shape_cast %15 : vector<8x16x8xf32> to vector<1x8x16x8xf32>
    tpu.vector_store %arg4[%c0_7, %c0_8, %c0_9, %c0_10], %18 {strides = array<i32>} : memref<1x8x16x8xf32, #tpu.memory_space<vmem>>, vector<1x8x16x8xf32>,
    return
  }
  func.func @transform_0(%arg0: i32, %arg1: i32) -> (i32, i32, i32, i32) {
    %c0_i32 = arith.constant 0 : i32
    %c0_i32_0 = arith.constant 0 : i32
    %c0_i32_1 = arith.constant 0 : i32
    return %arg0, %arg1, %c0_i32, %c0_i32_0 : i32, i32, i32, i32
  }
  func.func @transform_1(%arg0: i32, %arg1: i32) -> (i32, i32) {
    %c0_i32 = arith.constant 0 : i32
    %c0_i32_0 = arith.constant 0 : i32
    %c0_i32_1 = arith.constant 0 : i32
    return %c0_i32, %c0_i32_0 : i32, i32
  }
  func.func @transform_2(%arg0: i32, %arg1: i32) -> (i32, i32, i32, i32) {
    %c0_i32 = arith.constant 0 : i32
    %c0_i32_0 = arith.constant 0 : i32
    %c0_i32_1 = arith.constant 0 : i32
    return %arg0, %arg1, %c0_i32, %c0_i32_0 : i32, i32, i32, i32
  }
}

module attributes {stable_mosaic.version = 11 : i64} {
  func.func @_conv_stage_kernel(%arg0: i32, %arg1: i32, %arg2: memref<1x8x16x8xbf16, #tpu.memory_space<vmem>>, %arg3: memref<1x1x16x8xbf16, #tpu.memory_space<vmem>>, %arg4: memref<1x1x16x8xbf16, #tpu.memory_space<vmem>>, %arg5: memref<2x8xf32, #tpu.memory_space<vmem>>, %arg6: memref<9x8x8xbf16, #tpu.memory_space<vmem>>, %arg7: memref<1x8x16x8xbf16, #tpu.memory_space<vmem>>, %arg8: memref<1x1x2x8xf32, #tpu.memory_space<vmem>>, %arg9: memref<10x16x8xbf16, #tpu.memory_space<vmem>>, %arg10: memref<10x16x8xbf16, #tpu.memory_space<vmem>>, %arg11: memref<10x16x8xbf16, #tpu.memory_space<vmem>>) attributes {dimension_semantics = [#tpu.dimension_semantics<parallel>, #tpu.dimension_semantics<parallel>], iteration_bounds = array<i64: 2, 2>, scalar_prefetch = 0 : i64, scratch_operands = 3 : i64, tpu.core_type = #tpu.core_type<tc>, window_params = [{transform_indices = @transform_0, window_bounds = array<i64: 1, 8, 16, 8>}, {transform_indices = @transform_1, window_bounds = array<i64: 1, 1, 16, 8>}, {transform_indices = @transform_2, window_bounds = array<i64: 1, 1, 16, 8>}, {pipeline_mode = #tpu.pipeline_mode<synchronous>, transform_indices = @transform_3, window_bounds = array<i64: 2, 8>}, {pipeline_mode = #tpu.pipeline_mode<synchronous>, transform_indices = @transform_4, window_bounds = array<i64: 9, 8, 8>}, {transform_indices = @transform_5, window_bounds = array<i64: 1, 8, 16, 8>}, {transform_indices = @transform_6, window_bounds = array<i64: 1, 1, 2, 8>}]} {
    %c0 = arith.constant 0 : index
    %c0_0 = arith.constant 0 : index
    %c0_1 = arith.constant 0 : index
    %c0_2 = arith.constant 0 : index
    %0 = vector.load %arg2[%c0, %c0_0, %c0_1, %c0_2] : memref<1x8x16x8xbf16, #tpu.memory_space<vmem>>, vector<1x8x16x8xbf16>
    %1 = vector.shape_cast %0 : vector<1x8x16x8xbf16> to vector<8x16x8xbf16>
    %2 = arith.extf %1 : vector<8x16x8xbf16> to vector<8x16x8xf32>
    %c0_3 = arith.constant 0 : index
    %c0_4 = arith.constant 0 : index
    %3 = vector.load %arg5[%c0_3, %c0_4] : memref<2x8xf32, #tpu.memory_space<vmem>>, vector<1x8xf32>
    %4 = vector.shape_cast %3 : vector<1x8xf32> to vector<1x1x8xf32>
    %5 = vector.broadcast %4 : vector<1x1x8xf32> to vector<8x16x8xf32>
    %6 = arith.mulf %2, %5 : vector<8x16x8xf32>
    %c1 = arith.constant 1 : index
    %c0_5 = arith.constant 0 : index
    %7 = vector.load %arg5[%c1, %c0_5] : memref<2x8xf32, #tpu.memory_space<vmem>>, vector<1x8xf32>
    %8 = vector.shape_cast %7 : vector<1x8xf32> to vector<1x1x8xf32>
    %9 = vector.broadcast %8 : vector<1x1x8xf32> to vector<8x16x8xf32>
    %10 = arith.addf %6, %9 : vector<8x16x8xf32>
    %cst = arith.constant 0.000000e+00 : f32
    %11 = vector.broadcast %cst : f32 to vector<8x16x8xf32>
    %12 = arith.cmpf ogt, %10, %11 : vector<8x16x8xf32>
    %cst_6 = arith.constant 0.00999999977 : f32
    %13 = vector.broadcast %cst_6 : f32 to vector<8x16x8xf32>
    %14 = arith.mulf %13, %10 : vector<8x16x8xf32>
    %15 = arith.select %12, %10, %14 : vector<8x16x8xi1>, vector<8x16x8xf32>
    %16 = arith.truncf %15 : vector<8x16x8xf32> to vector<8x16x8xbf16>
    %c1_7 = arith.constant 1 : index
    %c0_8 = arith.constant 0 : index
    %c0_9 = arith.constant 0 : index
    %17 = vector.load %arg9[%c1_7, %c0_8, %c0_9] : memref<10x16x8xbf16, #tpu.memory_space<vmem>>, vector<8x16x8xbf16>
    tpu.vector_store %arg9[%c1_7, %c0_8, %c0_9], %16 {strides = array<i32>} : memref<10x16x8xbf16, #tpu.memory_space<vmem>>, vector<8x16x8xbf16>,
    %c0_10 = arith.constant 0 : index
    %c0_11 = arith.constant 0 : index
    %c0_12 = arith.constant 0 : index
    %c0_13 = arith.constant 0 : index
    %18 = vector.load %arg3[%c0_10, %c0_11, %c0_12, %c0_13] : memref<1x1x16x8xbf16, #tpu.memory_space<vmem>>, vector<1x1x16x8xbf16>
    %19 = vector.shape_cast %18 : vector<1x1x16x8xbf16> to vector<1x16x8xbf16>
    %20 = arith.extf %19 : vector<1x16x8xbf16> to vector<1x16x8xf32>
    %c0_14 = arith.constant 0 : index
    %c0_15 = arith.constant 0 : index
    %21 = vector.load %arg5[%c0_14, %c0_15] : memref<2x8xf32, #tpu.memory_space<vmem>>, vector<1x8xf32>
    %22 = vector.shape_cast %21 : vector<1x8xf32> to vector<1x1x8xf32>
    %23 = vector.broadcast %22 : vector<1x1x8xf32> to vector<1x16x8xf32>
    %24 = arith.mulf %20, %23 : vector<1x16x8xf32>
    %c1_16 = arith.constant 1 : index
    %c0_17 = arith.constant 0 : index
    %25 = vector.load %arg5[%c1_16, %c0_17] : memref<2x8xf32, #tpu.memory_space<vmem>>, vector<1x8xf32>
    %26 = vector.shape_cast %25 : vector<1x8xf32> to vector<1x1x8xf32>
    %27 = vector.broadcast %26 : vector<1x1x8xf32> to vector<1x16x8xf32>
    %28 = arith.addf %24, %27 : vector<1x16x8xf32>
    %cst_18 = arith.constant 0.000000e+00 : f32
    %29 = vector.broadcast %cst_18 : f32 to vector<1x16x8xf32>
    %30 = arith.cmpf ogt, %28, %29 : vector<1x16x8xf32>
    %cst_19 = arith.constant 0.00999999977 : f32
    %31 = vector.broadcast %cst_19 : f32 to vector<1x16x8xf32>
    %32 = arith.mulf %31, %28 : vector<1x16x8xf32>
    %33 = arith.select %30, %28, %32 : vector<1x16x8xi1>, vector<1x16x8xf32>
    %34 = arith.truncf %33 : vector<1x16x8xf32> to vector<1x16x8xbf16>
    %c0_20 = arith.constant 0 : index
    %c0_21 = arith.constant 0 : index
    %c0_22 = arith.constant 0 : index
    %35 = vector.load %arg9[%c0_20, %c0_21, %c0_22] : memref<10x16x8xbf16, #tpu.memory_space<vmem>>, vector<1x16x8xbf16>
    tpu.vector_store %arg9[%c0_20, %c0_21, %c0_22], %34 {strides = array<i32>} : memref<10x16x8xbf16, #tpu.memory_space<vmem>>, vector<1x16x8xbf16>,
    %c0_23 = arith.constant 0 : index
    %c0_24 = arith.constant 0 : index
    %c0_25 = arith.constant 0 : index
    %c0_26 = arith.constant 0 : index
    %36 = vector.load %arg4[%c0_23, %c0_24, %c0_25, %c0_26] : memref<1x1x16x8xbf16, #tpu.memory_space<vmem>>, vector<1x1x16x8xbf16>
    %37 = vector.shape_cast %36 : vector<1x1x16x8xbf16> to vector<1x16x8xbf16>
    %38 = arith.extf %37 : vector<1x16x8xbf16> to vector<1x16x8xf32>
    %c0_27 = arith.constant 0 : index
    %c0_28 = arith.constant 0 : index
    %39 = vector.load %arg5[%c0_27, %c0_28] : memref<2x8xf32, #tpu.memory_space<vmem>>, vector<1x8xf32>
    %40 = vector.shape_cast %39 : vector<1x8xf32> to vector<1x1x8xf32>
    %41 = vector.broadcast %40 : vector<1x1x8xf32> to vector<1x16x8xf32>
    %42 = arith.mulf %38, %41 : vector<1x16x8xf32>
    %c1_29 = arith.constant 1 : index
    %c0_30 = arith.constant 0 : index
    %43 = vector.load %arg5[%c1_29, %c0_30] : memref<2x8xf32, #tpu.memory_space<vmem>>, vector<1x8xf32>
    %44 = vector.shape_cast %43 : vector<1x8xf32> to vector<1x1x8xf32>
    %45 = vector.broadcast %44 : vector<1x1x8xf32> to vector<1x16x8xf32>
    %46 = arith.addf %42, %45 : vector<1x16x8xf32>
    %cst_31 = arith.constant 0.000000e+00 : f32
    %47 = vector.broadcast %cst_31 : f32 to vector<1x16x8xf32>
    %48 = arith.cmpf ogt, %46, %47 : vector<1x16x8xf32>
    %cst_32 = arith.constant 0.00999999977 : f32
    %49 = vector.broadcast %cst_32 : f32 to vector<1x16x8xf32>
    %50 = arith.mulf %49, %46 : vector<1x16x8xf32>
    %51 = arith.select %48, %46, %50 : vector<1x16x8xi1>, vector<1x16x8xf32>
    %52 = arith.truncf %51 : vector<1x16x8xf32> to vector<1x16x8xbf16>
    %c9 = arith.constant 9 : index
    %c0_33 = arith.constant 0 : index
    %c0_34 = arith.constant 0 : index
    %53 = vector.load %arg9[%c9, %c0_33, %c0_34] : memref<10x16x8xbf16, #tpu.memory_space<vmem>>, vector<1x16x8xbf16>
    tpu.vector_store %arg9[%c9, %c0_33, %c0_34], %52 {strides = array<i32>} : memref<10x16x8xbf16, #tpu.memory_space<vmem>>, vector<1x16x8xbf16>,
    %c0_i32 = arith.constant 0 : i32
    %54 = arith.cmpi eq, %arg1, %c0_i32 : i32
    %55 = arith.extui %54 : i1 to i32
    %c0_i32_35 = arith.constant 0 : i32
    %56 = arith.cmpi ne, %55, %c0_i32_35 : i32
    scf.if %56 {
      %cst_118 = arith.constant 0.000000e+00 : bf16
      %139 = vector.broadcast %cst_118 : bf16 to vector<1x16x8xbf16>
      %c0_119 = arith.constant 0 : index
      %c0_120 = arith.constant 0 : index
      %c0_121 = arith.constant 0 : index
      %140 = vector.load %arg9[%c0_119, %c0_120, %c0_121] : memref<10x16x8xbf16, #tpu.memory_space<vmem>>, vector<1x16x8xbf16>
      tpu.vector_store %arg9[%c0_119, %c0_120, %c0_121], %139 {strides = array<i32>} : memref<10x16x8xbf16, #tpu.memory_space<vmem>>, vector<1x16x8xbf16>,
    } else {
    }
    %c1_i32 = arith.constant 1 : i32
    %57 = arith.cmpi eq, %arg1, %c1_i32 : i32
    %58 = arith.extui %57 : i1 to i32
    %c0_i32_36 = arith.constant 0 : i32
    %59 = arith.cmpi ne, %58, %c0_i32_36 : i32
    scf.if %59 {
      %cst_118 = arith.constant 0.000000e+00 : bf16
      %139 = vector.broadcast %cst_118 : bf16 to vector<1x16x8xbf16>
      %c9_119 = arith.constant 9 : index
      %c0_120 = arith.constant 0 : index
      %c0_121 = arith.constant 0 : index
      %140 = vector.load %arg9[%c9_119, %c0_120, %c0_121] : memref<10x16x8xbf16, #tpu.memory_space<vmem>>, vector<1x16x8xbf16>
      tpu.vector_store %arg9[%c9_119, %c0_120, %c0_121], %139 {strides = array<i32>} : memref<10x16x8xbf16, #tpu.memory_space<vmem>>, vector<1x16x8xbf16>,
    } else {
    }
    %c0_37 = arith.constant 0 : index
    %c0_38 = arith.constant 0 : index
    %c0_39 = arith.constant 0 : index
    %60 = vector.load %arg9[%c0_37, %c0_38, %c0_39] : memref<10x16x8xbf16, #tpu.memory_space<vmem>>, vector<10x16x8xbf16>
    %cst_40 = arith.constant 0.000000e+00 : bf16
    %61 = vector.broadcast %cst_40 : bf16 to vector<10x1x8xbf16>
    %62 = vector.extract_strided_slice %60 {offsets = [0, 0, 0], sizes = [10, 15, 8], strides = [1, 1, 1]} : vector<10x16x8xbf16> to vector<10x15x8xbf16>
    %63 = tpu.concatenate %61, %62 in 1 : vector<10x1x8xbf16>, vector<10x15x8xbf16> -> vector<10x16x8xbf16>
    %c0_41 = arith.constant 0 : index
    %c0_42 = arith.constant 0 : index
    %c0_43 = arith.constant 0 : index
    %64 = vector.load %arg10[%c0_41, %c0_42, %c0_43] : memref<10x16x8xbf16, #tpu.memory_space<vmem>>, vector<10x16x8xbf16>
    tpu.vector_store %arg10[%c0_41, %c0_42, %c0_43], %63 {strides = array<i32>} : memref<10x16x8xbf16, #tpu.memory_space<vmem>>, vector<10x16x8xbf16>,
    %65 = vector.extract_strided_slice %60 {offsets = [0, 1, 0], sizes = [10, 15, 8], strides = [1, 1, 1]} : vector<10x16x8xbf16> to vector<10x15x8xbf16>
    %66 = tpu.concatenate %65, %61 in 1 : vector<10x15x8xbf16>, vector<10x1x8xbf16> -> vector<10x16x8xbf16>
    %c0_44 = arith.constant 0 : index
    %c0_45 = arith.constant 0 : index
    %c0_46 = arith.constant 0 : index
    %67 = vector.load %arg11[%c0_44, %c0_45, %c0_46] : memref<10x16x8xbf16, #tpu.memory_space<vmem>>, vector<10x16x8xbf16>
    tpu.vector_store %arg11[%c0_44, %c0_45, %c0_46], %66 {strides = array<i32>} : memref<10x16x8xbf16, #tpu.memory_space<vmem>>, vector<10x16x8xbf16>,
    %cst_47 = arith.constant 0.000000e+00 : f32
    %68 = vector.broadcast %cst_47 : f32 to vector<128x8xf32>
    %c0_48 = arith.constant 0 : index
    %c0_49 = arith.constant 0 : index
    %c0_50 = arith.constant 0 : index
    %69 = vector.load %arg10[%c0_48, %c0_49, %c0_50] : memref<10x16x8xbf16, #tpu.memory_space<vmem>>, vector<8x16x8xbf16>
    %70 = vector.shape_cast %69 : vector<8x16x8xbf16> to vector<128x8xbf16>
    %c0_51 = arith.constant 0 : index
    %c0_52 = arith.constant 0 : index
    %c0_53 = arith.constant 0 : index
    %71 = vector.load %arg6[%c0_51, %c0_52, %c0_53] : memref<9x8x8xbf16, #tpu.memory_space<vmem>>, vector<1x8x8xbf16>
    %72 = vector.shape_cast %71 : vector<1x8x8xbf16> to vector<8x8xbf16>
    %cst_54 = arith.constant dense<0.000000e+00> : vector<128x8xf32>
    %73 = tpu.matmul %70, %72, %cst_54 {dimension_numbers = #tpu.dot_dimension_numbers<[1], [0], [0], [1], [0, 0, 1, 1], [], []>} : vector<128x8xbf16>, vector<8x8xbf16>, vector<128x8xf32> -> vector<128x8xf32>
    %74 = arith.addf %68, %73 : vector<128x8xf32>
    %c0_55 = arith.constant 0 : index
    %c0_56 = arith.constant 0 : index
    %c0_57 = arith.constant 0 : index
    %75 = vector.load %arg9[%c0_55, %c0_56, %c0_57] : memref<10x16x8xbf16, #tpu.memory_space<vmem>>, vector<8x16x8xbf16>
    %76 = vector.shape_cast %75 : vector<8x16x8xbf16> to vector<128x8xbf16>
    %c1_58 = arith.constant 1 : index
    %c0_59 = arith.constant 0 : index
    %c0_60 = arith.constant 0 : index
    %77 = vector.load %arg6[%c1_58, %c0_59, %c0_60] : memref<9x8x8xbf16, #tpu.memory_space<vmem>>, vector<1x8x8xbf16>
    %78 = vector.shape_cast %77 : vector<1x8x8xbf16> to vector<8x8xbf16>
    %cst_61 = arith.constant dense<0.000000e+00> : vector<128x8xf32>
    %79 = tpu.matmul %76, %78, %cst_61 {dimension_numbers = #tpu.dot_dimension_numbers<[1], [0], [0], [1], [0, 0, 1, 1], [], []>} : vector<128x8xbf16>, vector<8x8xbf16>, vector<128x8xf32> -> vector<128x8xf32>
    %80 = arith.addf %74, %79 : vector<128x8xf32>
    %c0_62 = arith.constant 0 : index
    %c0_63 = arith.constant 0 : index
    %c0_64 = arith.constant 0 : index
    %81 = vector.load %arg11[%c0_62, %c0_63, %c0_64] : memref<10x16x8xbf16, #tpu.memory_space<vmem>>, vector<8x16x8xbf16>
    %82 = vector.shape_cast %81 : vector<8x16x8xbf16> to vector<128x8xbf16>
    %c2 = arith.constant 2 : index
    %c0_65 = arith.constant 0 : index
    %c0_66 = arith.constant 0 : index
    %83 = vector.load %arg6[%c2, %c0_65, %c0_66] : memref<9x8x8xbf16, #tpu.memory_space<vmem>>, vector<1x8x8xbf16>
    %84 = vector.shape_cast %83 : vector<1x8x8xbf16> to vector<8x8xbf16>
    %cst_67 = arith.constant dense<0.000000e+00> : vector<128x8xf32>
    %85 = tpu.matmul %82, %84, %cst_67 {dimension_numbers = #tpu.dot_dimension_numbers<[1], [0], [0], [1], [0, 0, 1, 1], [], []>} : vector<128x8xbf16>, vector<8x8xbf16>, vector<128x8xf32> -> vector<128x8xf32>
    %86 = arith.addf %80, %85 : vector<128x8xf32>
    %c1_68 = arith.constant 1 : index
    %c0_69 = arith.constant 0 : index
    %c0_70 = arith.constant 0 : index
    %87 = vector.load %arg10[%c1_68, %c0_69, %c0_70] : memref<10x16x8xbf16, #tpu.memory_space<vmem>>, vector<8x16x8xbf16>
    %88 = vector.shape_cast %87 : vector<8x16x8xbf16> to vector<128x8xbf16>
    %c3 = arith.constant 3 : index
    %c0_71 = arith.constant 0 : index
    %c0_72 = arith.constant 0 : index
    %89 = vector.load %arg6[%c3, %c0_71, %c0_72] : memref<9x8x8xbf16, #tpu.memory_space<vmem>>, vector<1x8x8xbf16>
    %90 = vector.shape_cast %89 : vector<1x8x8xbf16> to vector<8x8xbf16>
    %cst_73 = arith.constant dense<0.000000e+00> : vector<128x8xf32>
    %91 = tpu.matmul %88, %90, %cst_73 {dimension_numbers = #tpu.dot_dimension_numbers<[1], [0], [0], [1], [0, 0, 1, 1], [], []>} : vector<128x8xbf16>, vector<8x8xbf16>, vector<128x8xf32> -> vector<128x8xf32>
    %92 = arith.addf %86, %91 : vector<128x8xf32>
    %c1_74 = arith.constant 1 : index
    %c0_75 = arith.constant 0 : index
    %c0_76 = arith.constant 0 : index
    %93 = vector.load %arg9[%c1_74, %c0_75, %c0_76] : memref<10x16x8xbf16, #tpu.memory_space<vmem>>, vector<8x16x8xbf16>
    %94 = vector.shape_cast %93 : vector<8x16x8xbf16> to vector<128x8xbf16>
    %c4 = arith.constant 4 : index
    %c0_77 = arith.constant 0 : index
    %c0_78 = arith.constant 0 : index
    %95 = vector.load %arg6[%c4, %c0_77, %c0_78] : memref<9x8x8xbf16, #tpu.memory_space<vmem>>, vector<1x8x8xbf16>
    %96 = vector.shape_cast %95 : vector<1x8x8xbf16> to vector<8x8xbf16>
    %cst_79 = arith.constant dense<0.000000e+00> : vector<128x8xf32>
    %97 = tpu.matmul %94, %96, %cst_79 {dimension_numbers = #tpu.dot_dimension_numbers<[1], [0], [0], [1], [0, 0, 1, 1], [], []>} : vector<128x8xbf16>, vector<8x8xbf16>, vector<128x8xf32> -> vector<128x8xf32>
    %98 = arith.addf %92, %97 : vector<128x8xf32>
    %c1_80 = arith.constant 1 : index
    %c0_81 = arith.constant 0 : index
    %c0_82 = arith.constant 0 : index
    %99 = vector.load %arg11[%c1_80, %c0_81, %c0_82] : memref<10x16x8xbf16, #tpu.memory_space<vmem>>, vector<8x16x8xbf16>
    %100 = vector.shape_cast %99 : vector<8x16x8xbf16> to vector<128x8xbf16>
    %c5 = arith.constant 5 : index
    %c0_83 = arith.constant 0 : index
    %c0_84 = arith.constant 0 : index
    %101 = vector.load %arg6[%c5, %c0_83, %c0_84] : memref<9x8x8xbf16, #tpu.memory_space<vmem>>, vector<1x8x8xbf16>
    %102 = vector.shape_cast %101 : vector<1x8x8xbf16> to vector<8x8xbf16>
    %cst_85 = arith.constant dense<0.000000e+00> : vector<128x8xf32>
    %103 = tpu.matmul %100, %102, %cst_85 {dimension_numbers = #tpu.dot_dimension_numbers<[1], [0], [0], [1], [0, 0, 1, 1], [], []>} : vector<128x8xbf16>, vector<8x8xbf16>, vector<128x8xf32> -> vector<128x8xf32>
    %104 = arith.addf %98, %103 : vector<128x8xf32>
    %c2_86 = arith.constant 2 : index
    %c0_87 = arith.constant 0 : index
    %c0_88 = arith.constant 0 : index
    %105 = vector.load %arg10[%c2_86, %c0_87, %c0_88] : memref<10x16x8xbf16, #tpu.memory_space<vmem>>, vector<8x16x8xbf16>
    %106 = vector.shape_cast %105 : vector<8x16x8xbf16> to vector<128x8xbf16>
    %c6 = arith.constant 6 : index
    %c0_89 = arith.constant 0 : index
    %c0_90 = arith.constant 0 : index
    %107 = vector.load %arg6[%c6, %c0_89, %c0_90] : memref<9x8x8xbf16, #tpu.memory_space<vmem>>, vector<1x8x8xbf16>
    %108 = vector.shape_cast %107 : vector<1x8x8xbf16> to vector<8x8xbf16>
    %cst_91 = arith.constant dense<0.000000e+00> : vector<128x8xf32>
    %109 = tpu.matmul %106, %108, %cst_91 {dimension_numbers = #tpu.dot_dimension_numbers<[1], [0], [0], [1], [0, 0, 1, 1], [], []>} : vector<128x8xbf16>, vector<8x8xbf16>, vector<128x8xf32> -> vector<128x8xf32>
    %110 = arith.addf %104, %109 : vector<128x8xf32>
    %c2_92 = arith.constant 2 : index
    %c0_93 = arith.constant 0 : index
    %c0_94 = arith.constant 0 : index
    %111 = vector.load %arg9[%c2_92, %c0_93, %c0_94] : memref<10x16x8xbf16, #tpu.memory_space<vmem>>, vector<8x16x8xbf16>
    %112 = vector.shape_cast %111 : vector<8x16x8xbf16> to vector<128x8xbf16>
    %c7 = arith.constant 7 : index
    %c0_95 = arith.constant 0 : index
    %c0_96 = arith.constant 0 : index
    %113 = vector.load %arg6[%c7, %c0_95, %c0_96] : memref<9x8x8xbf16, #tpu.memory_space<vmem>>, vector<1x8x8xbf16>
    %114 = vector.shape_cast %113 : vector<1x8x8xbf16> to vector<8x8xbf16>
    %cst_97 = arith.constant dense<0.000000e+00> : vector<128x8xf32>
    %115 = tpu.matmul %112, %114, %cst_97 {dimension_numbers = #tpu.dot_dimension_numbers<[1], [0], [0], [1], [0, 0, 1, 1], [], []>} : vector<128x8xbf16>, vector<8x8xbf16>, vector<128x8xf32> -> vector<128x8xf32>
    %116 = arith.addf %110, %115 : vector<128x8xf32>
    %c2_98 = arith.constant 2 : index
    %c0_99 = arith.constant 0 : index
    %c0_100 = arith.constant 0 : index
    %117 = vector.load %arg11[%c2_98, %c0_99, %c0_100] : memref<10x16x8xbf16, #tpu.memory_space<vmem>>, vector<8x16x8xbf16>
    %118 = vector.shape_cast %117 : vector<8x16x8xbf16> to vector<128x8xbf16>
    %c8 = arith.constant 8 : index
    %c0_101 = arith.constant 0 : index
    %c0_102 = arith.constant 0 : index
    %119 = vector.load %arg6[%c8, %c0_101, %c0_102] : memref<9x8x8xbf16, #tpu.memory_space<vmem>>, vector<1x8x8xbf16>
    %120 = vector.shape_cast %119 : vector<1x8x8xbf16> to vector<8x8xbf16>
    %cst_103 = arith.constant dense<0.000000e+00> : vector<128x8xf32>
    %121 = tpu.matmul %118, %120, %cst_103 {dimension_numbers = #tpu.dot_dimension_numbers<[1], [0], [0], [1], [0, 0, 1, 1], [], []>} : vector<128x8xbf16>, vector<8x8xbf16>, vector<128x8xf32> -> vector<128x8xf32>
    %122 = arith.addf %116, %121 : vector<128x8xf32>
    %cst_104 = arith.constant dense<0.000000e+00> : vector<8xf32>
    %123 = vector.multi_reduction <add>, %122, %cst_104 [0] : vector<128x8xf32> to vector<8xf32>
    %124 = vector.shape_cast %123 : vector<8xf32> to vector<1x8xf32>
    %c0_105 = arith.constant 0 : index
    %c0_106 = arith.constant 0 : index
    %c0_107 = arith.constant 0 : index
    %c0_108 = arith.constant 0 : index
    %125 = vector.load %arg8[%c0_105, %c0_106, %c0_107, %c0_108] : memref<1x1x2x8xf32, #tpu.memory_space<vmem>>, vector<1x1x1x8xf32>
    %126 = vector.shape_cast %125 : vector<1x1x1x8xf32> to vector<1x8xf32>
    %127 = vector.shape_cast %124 : vector<1x8xf32> to vector<1x1x1x8xf32>
    tpu.vector_store %arg8[%c0_105, %c0_106, %c0_107, %c0_108], %127 {strides = array<i32>} : memref<1x1x2x8xf32, #tpu.memory_space<vmem>>, vector<1x1x1x8xf32>,
    %128 = arith.mulf %122, %122 : vector<128x8xf32>
    %cst_109 = arith.constant dense<0.000000e+00> : vector<8xf32>
    %129 = vector.multi_reduction <add>, %128, %cst_109 [0] : vector<128x8xf32> to vector<8xf32>
    %130 = vector.shape_cast %129 : vector<8xf32> to vector<1x8xf32>
    %c0_110 = arith.constant 0 : index
    %c0_111 = arith.constant 0 : index
    %c1_112 = arith.constant 1 : index
    %c0_113 = arith.constant 0 : index
    %131 = vector.load %arg8[%c0_110, %c0_111, %c1_112, %c0_113] : memref<1x1x2x8xf32, #tpu.memory_space<vmem>>, vector<1x1x1x8xf32>
    %132 = vector.shape_cast %131 : vector<1x1x1x8xf32> to vector<1x8xf32>
    %133 = vector.shape_cast %130 : vector<1x8xf32> to vector<1x1x1x8xf32>
    tpu.vector_store %arg8[%c0_110, %c0_111, %c1_112, %c0_113], %133 {strides = array<i32>} : memref<1x1x2x8xf32, #tpu.memory_space<vmem>>, vector<1x1x1x8xf32>,
    %134 = arith.truncf %122 : vector<128x8xf32> to vector<128x8xbf16>
    %135 = vector.shape_cast %134 : vector<128x8xbf16> to vector<8x16x8xbf16>
    %c0_114 = arith.constant 0 : index
    %c0_115 = arith.constant 0 : index
    %c0_116 = arith.constant 0 : index
    %c0_117 = arith.constant 0 : index
    %136 = vector.load %arg7[%c0_114, %c0_115, %c0_116, %c0_117] : memref<1x8x16x8xbf16, #tpu.memory_space<vmem>>, vector<1x8x16x8xbf16>
    %137 = vector.shape_cast %136 : vector<1x8x16x8xbf16> to vector<8x16x8xbf16>
    %138 = vector.shape_cast %135 : vector<8x16x8xbf16> to vector<1x8x16x8xbf16>
    tpu.vector_store %arg7[%c0_114, %c0_115, %c0_116, %c0_117], %138 {strides = array<i32>} : memref<1x8x16x8xbf16, #tpu.memory_space<vmem>>, vector<1x8x16x8xbf16>,
    return
  }
  func.func @transform_0(%arg0: i32, %arg1: i32) -> (i32, i32, i32, i32) {
    %c0_i32 = arith.constant 0 : i32
    %c0_i32_0 = arith.constant 0 : i32
    %c0_i32_1 = arith.constant 0 : i32
    return %arg0, %arg1, %c0_i32, %c0_i32_0 : i32, i32, i32, i32
  }
  func.func @transform_1(%arg0: i32, %arg1: i32) -> (i32, i32, i32, i32) {
    %c8_i32 = arith.constant 8 : i32
    %0 = arith.muli %arg1, %c8_i32 : i32
    %c1_i32 = arith.constant 1 : i32
    %1 = arith.subi %0, %c1_i32 : i32
    %c0_i32 = arith.constant 0 : i32
    %2 = arith.maxsi %1, %c0_i32 : i32
    %c0_i32_0 = arith.constant 0 : i32
    %c0_i32_1 = arith.constant 0 : i32
    %c0_i32_2 = arith.constant 0 : i32
    return %arg0, %2, %c0_i32_0, %c0_i32_1 : i32, i32, i32, i32
  }
  func.func @transform_2(%arg0: i32, %arg1: i32) -> (i32, i32, i32, i32) {
    %c1_i32 = arith.constant 1 : i32
    %0 = arith.addi %arg1, %c1_i32 : i32
    %c8_i32 = arith.constant 8 : i32
    %1 = arith.muli %0, %c8_i32 : i32
    %c15_i32 = arith.constant 15 : i32
    %2 = arith.minsi %1, %c15_i32 : i32
    %c0_i32 = arith.constant 0 : i32
    %c0_i32_0 = arith.constant 0 : i32
    %c0_i32_1 = arith.constant 0 : i32
    return %arg0, %2, %c0_i32, %c0_i32_0 : i32, i32, i32, i32
  }
  func.func @transform_3(%arg0: i32, %arg1: i32) -> (i32, i32) {
    %c0_i32 = arith.constant 0 : i32
    %c0_i32_0 = arith.constant 0 : i32
    %c0_i32_1 = arith.constant 0 : i32
    return %c0_i32, %c0_i32_0 : i32, i32
  }
  func.func @transform_4(%arg0: i32, %arg1: i32) -> (i32, i32, i32) {
    %c0_i32 = arith.constant 0 : i32
    %c0_i32_0 = arith.constant 0 : i32
    %c0_i32_1 = arith.constant 0 : i32
    %c0_i32_2 = arith.constant 0 : i32
    return %c0_i32, %c0_i32_0, %c0_i32_1 : i32, i32, i32
  }
  func.func @transform_5(%arg0: i32, %arg1: i32) -> (i32, i32, i32, i32) {
    %c0_i32 = arith.constant 0 : i32
    %c0_i32_0 = arith.constant 0 : i32
    %c0_i32_1 = arith.constant 0 : i32
    return %arg0, %arg1, %c0_i32, %c0_i32_0 : i32, i32, i32, i32
  }
  func.func @transform_6(%arg0: i32, %arg1: i32) -> (i32, i32, i32, i32) {
    %c0_i32 = arith.constant 0 : i32
    %c0_i32_0 = arith.constant 0 : i32
    %c0_i32_1 = arith.constant 0 : i32
    return %arg0, %arg1, %c0_i32, %c0_i32_0 : i32, i32, i32, i32
  }
}

</mosaic_0001>

<bundles_post_ra>
// kernel: conv_block.5
= control target key start
LH: loop header
LB: loop body
LE: loop exit
PB: predicated region body
PF: predicated region fallthrough
CT: control target
= control target key end

     0   :  { %s577_s9 = smov 0   ;;  %s579_s10 = smov 0   ;;  %s718_s0 = inlined_call_operand.vmem [shape: bf16[2,16,16,8], index: 0, kind: input, shape index: {}]   ;;  %s719_s1 = inlined_call_operand.vmem [shape: f32[2,8], index: 1, kind: input, shape index: {}]   ;;  %s720_s2 = inlined_call_operand.vmem [shape: f32[2,16,16,8], index: 2, kind: output, shape index: {}]  }
   0x1   :  { %s581_s11 = smov 0   ;;  %s583_s12 = smov 0  }
   0x2   :  { %s585_s13 = smov 0  }
   0x3 LB: > { %s21_s14 = sadd.s32 1, %s552_s11  ;;  %s24_s15 = sadd.s32 1, %s556_s12  ;;  %s560_s13 = sphi %s585_s13, %s12_s13   ;;  %s556_s12 = sphi %s583_s12, %s724_s12   ;;  %s552_s11 = sphi %s581_s11, %s723_s11   ;;  %s548_s10 = sphi %s579_s10, %s722_s10   ;;  %s544_s9 = sphi %s577_s9, %s721_s9  }
   0x4   : > { %p22_p0 = scmp.ge.s32.totalorder %s21_s14, 2  ;;  %p430_p1 = scmp.ge.s32.totalorder %s560_s13, 1 }
   0x5   : > { %p134_p2 = scmp.lt.s32.totalorder %s560_s13, 5 }
   0x6   : > { %s726_s14 = smov (%p22_p0, %s21_s14), 0  ;;  %s728_s15 = smov (!%p22_p0, %s24_s15), %s556_s12 }
   0x7   : > { %p135_p3 = pnand %p430_p1, %p134_p2  ;;  %p26_p4 = scmp.ge.s32.totalorder %s728_s15, 2 }
   0x8   : > { %s431_s16 = sshll.u32 (!%p135_p3), %s544_s9, 3  ;;  %p167_p5 = scmp.lt.s32.totalorder (!%p135_p3), %s548_s10, 1 }
   0x9   : > { %s730_s15 = smov (%p26_p4, %s728_s15), 0  ;;  %138 = sbr.rel (%p135_p3) target bundleno = 49 (0x31), region = 28 }
   0xa   : > { %p169_p6 = scmp.lt.s32.totalorder (!%p135_p3), %s431_s16, 15 }
   0xe   : > { %s732_s10 = smov (!%p167_p5, %s548_s10), 1  ;;  %s734_s16 = smov (!%p169_p6, %s431_s16), 15  ;;  %v618_v0 = vld [vmem:[%s719_s1] ss:$0 sm:$0xff]  ;;  %vm310_vm0 = vcmask 64512  }
   0xf   : > { %s433_s17 = sshll.u32 %s732_s10, 5  ;;  %s432_s18 = sshll.u32 %s734_s16, 1  ;;  %v627_v9 = vld [vmem:[%s719_s1 + $0x1] ss:$0 sm:$0xff] }
  0x10   : > { %s607_s19 = sadd.s32 %s433_s17, %s432_s18 }
  0x11   : > { %s434_s20 = sshll.u32 %s607_s19, 2  ;;  %s438_s28 = sshll.u32 %s607_s19, 3 }
  0x12   : > { %s613_s23 = scalar_lea.vmem %s718_s0, %s434_s20  ;;  %s649_s3 = scalar_lea.vmem %s720_s2, %s438_s28 }
  0x13   : > { %v444_v1 = vld [vmem:[%s613_s23] sm:$0xff]   ;;  %v475_v2 = vld [vmem:[%s613_s23 + $0x8] sm:$0xff]   ;;  %v476_v3 = vld [vmem:[%s613_s23 + $0x10] sm:$0xff]  }
  0x14   : > { %v445_v4 = vunpack.c.l.bf16 %v444_v1  ;;  %v446_v5 = vunpack.c.h.bf16 %v444_v1  ;;  %v449_v6 = vunpack.c.l.bf16 %v475_v2  ;;  %v450_v7 = vunpack.c.h.bf16 %v475_v2  ;;  %v477_v8 = vld [vmem:[%s613_s23 + $0x18] sm:$0xff]   ;;  %v478_v37 = vld [vmem:[%s613_s23 + $0x20] sm:$0xff]   ;;  %v479_v41 = vld [vmem:[%s613_s23 + $0x28] sm:$0xff]  }
  0x15   : > { %v453_v10 = vunpack.c.l.bf16 %v476_v3  ;;  %v454_v11 = vunpack.c.h.bf16 %v476_v3  ;;  %v457_v12 = vunpack.c.l.bf16 %v477_v8  ;;  %v458_v13 = vunpack.c.h.bf16 %v477_v8  ;;  %v480_v42 = vld [vmem:[%s613_s23 + $0x30] sm:$0xff]   ;;  %v481_v49 = vld [vmem:[%s613_s23 + $0x38] sm:$0xff]  }
  0x16   : > { %v225_v14 = vmul.f32 %v445_v4, %v618_v0  ;;  %v226_v15 = vmul.f32 %v446_v5, %v618_v0  ;;  %v227_v16 = vmul.f32 %v449_v6, %v618_v0  ;;  %v228_v17 = vmul.f32 %v450_v7, %v618_v0 }
  0x17   : > { %v229_v18 = vmul.f32 %v453_v10, %v618_v0  ;;  %v230_v19 = vmul.f32 %v454_v11, %v618_v0  ;;  %v231_v20 = vmul.f32 %v457_v12, %v618_v0  ;;  %v232_v21 = vmul.f32 %v458_v13, %v618_v0 }
  0x18   : > { %v246_v22 = vadd.f32 %v627_v9, %v225_v14  ;;  %v247_v23 = vadd.f32 %v627_v9, %v226_v15  ;;  %v248_v24 = vadd.f32 %v627_v9, %v227_v16  ;;  %v249_v25 = vadd.f32 %v627_v9, %v228_v17 }
  0x19   : > { %v250_v26 = vadd.f32 %v627_v9, %v229_v18  ;;  %v251_v27 = vadd.f32 %v627_v9, %v230_v19  ;;  %v252_v28 = vadd.f32 %v627_v9, %v231_v20  ;;  %v253_v29 = vadd.f32 %v627_v9, %v232_v21 }
  0x1a   : > { %vm262_vm1 = vcmp.gt.f32.partialorder %v246_v22, 0.0  ;;  %v278_v30 = vmul.f32 0.01, %v246_v22  ;;  %vm263_vm2 = vcmp.gt.f32.partialorder %v247_v23, 0.0  ;;  %v279_v31 = vmul.f32 0.01, %v247_v23 }
  0x1b   : > { %vm264_vm3 = vcmp.gt.f32.partialorder %v248_v24, 0.0  ;;  %v280_v32 = vmul.f32 0.01, %v248_v24  ;;  %vm265_vm4 = vcmp.gt.f32.partialorder %v249_v25, 0.0  ;;  %v281_v33 = vmul.f32 0.01, %v249_v25 }
  0x1c   : > { %v294_v34 = vsel %vm262_vm1, %v246_v22, %v278_v30  ;;  %v295_v35 = vsel %vm263_vm2, %v247_v23, %v279_v31  ;;  %vm266_vm5 = vcmp.gt.f32.partialorder %v250_v26, 0.0  ;;  %v282_v36 = vmul.f32 0.01, %v250_v26 }
  0x1d   : > { %311 = vst.msk [vmem:[%s649_s3] sm:$0xff] %vm310_vm0, %v294_v34  ;;  %312 = vst.msk [vmem:[%s649_s3 + $0x8] sm:$0xff] %vm310_vm0, %v295_v35  ;;  %v296_v38 = vsel %vm264_vm3, %v248_v24, %v280_v32  ;;  %v297_v39 = vsel %vm265_vm4, %v249_v25, %v281_v33  ;;  %vm267_vm6 = vcmp.gt.f32.partialorder %v251_v27, 0.0  ;;  %v283_v40 = vmul.f32 0.01, %v251_v27 }
  0x1e   : > { %313 = vst.msk [vmem:[%s649_s3 + $0x10] sm:$0xff] %vm310_vm0, %v296_v38  ;;  %314 = vst.msk [vmem:[%s649_s3 + $0x18] sm:$0xff] %vm310_vm0, %v297_v39  ;;  %v298_v43 = vsel %vm266_vm5, %v250_v26, %v282_v36  ;;  %vm268_vm7 = vcmp.gt.f32.partialorder %v252_v28, 0.0  ;;  %v284_v44 = vmul.f32 0.01, %v252_v28  ;;  %vm269_vm8 = vcmp.gt.f32.partialorder %v253_v29, 0.0 }
  0x1f   : > { %315 = vst.msk [vmem:[%s649_s3 + $0x20] sm:$0xff] %vm310_vm0, %v298_v43  ;;  %v299_v45 = vsel %vm267_vm6, %v251_v27, %v283_v40  ;;  %v285_v46 = vmul.f32 0.01, %v253_v29  ;;  %v461_v47 = vunpack.c.l.bf16 %v478_v37  ;;  %v462_v48 = vunpack.c.h.bf16 %v478_v37 }
  0x20   : > { %316 = vst.msk [vmem:[%s649_s3 + $0x28] sm:$0xff] %vm310_vm0, %v299_v45  ;;  %v300_v50 = vsel %vm268_vm7, %v252_v28, %v284_v44  ;;  %v465_v51 = vunpack.c.l.bf16 %v479_v41  ;;  %v466_v52 = vunpack.c.h.bf16 %v479_v41  ;;  %v469_v53 = vunpack.c.l.bf16 %v480_v42 }
  0x21   : > { %317 = vst.msk [vmem:[%s649_s3 + $0x30] sm:$0xff] %vm310_vm0, %v300_v50  ;;  %v301_v54 = vsel %vm269_vm8, %v253_v29, %v285_v46  ;;  %v233_v55 = vmul.f32 %v461_v47, %v618_v0  ;;  %v234_v56 = vmul.f32 %v462_v48, %v618_v0  ;;  %v470_v57 = vunpack.c.h.bf16 %v480_v42 }
  0x22   : > { %318 = vst.msk [vmem:[%s649_s3 + $0x38] sm:$0xff] %vm310_vm0, %v301_v54  ;;  %v235_v58 = vmul.f32 %v465_v51, %v618_v0  ;;  %v236_v59 = vmul.f32 %v466_v52, %v618_v0  ;;  %v237_v60 = vmul.f32 %v469_v53, %v618_v0  ;;  %v473_v61 = vunpack.c.l.bf16 %v481_v49 }
  0x23   : > { %v254_v62 = vadd.f32 %v627_v9, %v233_v55  ;;  %v255_v63 = vadd.f32 %v627_v9, %v234_v56  ;;  %v238_v1 = vmul.f32 %v470_v57, %v618_v0  ;;  %v474_v2 = vunpack.c.h.bf16 %v481_v49 }
  0x24   : > { %v256_v3 = vadd.f32 %v627_v9, %v235_v58  ;;  %v257_v4 = vadd.f32 %v627_v9, %v236_v59  ;;  %v258_v5 = vadd.f32 %v627_v9, %v237_v60  ;;  %v239_v6 = vmul.f32 %v473_v61, %v618_v0 }
  0x25   : > { %vm270_vm9 = vcmp.gt.f32.partialorder %v254_v62, 0.0  ;;  %v286_v7 = vmul.f32 0.01, %v254_v62  ;;  %vm271_vm10 = vcmp.gt.f32.partialorder %v255_v63, 0.0  ;;  %v287_v8 = vmul.f32 0.01, %v255_v63 }
  0x26   : > { %vm272_vm11 = vcmp.gt.f32.partialorder %v256_v3, 0.0  ;;  %v288_v10 = vmul.f32 0.01, %v256_v3  ;;  %vm273_vm12 = vcmp.gt.f32.partialorder %v257_v4, 0.0  ;;  %v289_v11 = vmul.f32 0.01, %v257_v4 }
  0x27   : > { %v302_v12 = vsel %vm270_vm9, %v254_v62, %v286_v7  ;;  %v303_v13 = vsel %vm271_vm10, %v255_v63, %v287_v8  ;;  %vm274_vm13 = vcmp.gt.f32.partialorder %v258_v5, 0.0  ;;  %v290_v14 = vmul.f32 0.01, %v258_v5 }
  0x28   : > { %319 = vst.msk [vmem:[%s649_s3 + $0x40] sm:$0xff] %vm310_vm0, %v302_v12  ;;  %320 = vst.msk [vmem:[%s649_s3 + $0x48] sm:$0xff] %vm310_vm0, %v303_v13  ;;  %v304_v15 = vsel %vm272_vm11, %v256_v3, %v288_v10  ;;  %v305_v16 = vsel %vm273_vm12, %v257_v4, %v289_v11  ;;  %v259_v17 = vadd.f32 %v627_v9, %v238_v1 }
  0x29   : > { %v260_v18 = vadd.f32 %v627_v9, %v239_v6  ;;  %321 = vst.msk [vmem:[%s649_s3 + $0x50] sm:$0xff] %vm310_vm0, %v304_v15  ;;  %322 = vst.msk [vmem:[%s649_s3 + $0x58] sm:$0xff] %vm310_vm0, %v305_v16  ;;  %v306_v19 = vsel %vm274_vm13, %v258_v5, %v290_v14  ;;  %v240_v20 = vmul.f32 %v474_v2, %v618_v0 }
  0x2a   : > { %323 = vst.msk [vmem:[%s649_s3 + $0x60] sm:$0xff] %vm310_vm0, %v306_v19  ;;  %vm275_vm14 = vcmp.gt.f32.partialorder %v259_v17, 0.0  ;;  %v291_v21 = vmul.f32 0.01, %v259_v17 }
  0x2b   : > { %vm276_vm15 = vcmp.gt.f32.partialorder %v260_v18, 0.0  ;;  %v292_v22 = vmul.f32 0.01, %v260_v18  ;;  %v261_v23 = vadd.f32 %v627_v9, %v240_v20 }
  0x2c   : > { %v307_v24 = vsel %vm275_vm14, %v259_v17, %v291_v21 }
  0x2d   : > { %v308_v25 = vsel %vm276_vm15, %v260_v18, %v292_v22  ;;  %324 = vst.msk [vmem:[%s649_s3 + $0x68] sm:$0xff] %vm310_vm0, %v307_v24  ;;  %vm277_vm1 = vcmp.gt.f32.partialorder %v261_v23, 0.0  ;;  %v293_v26 = vmul.f32 0.01, %v261_v23 }
  0x2e   : > { %325 = vst.msk [vmem:[%s649_s3 + $0x70] sm:$0xff] %vm310_vm0, %v308_v25 }
  0x2f   : > { %v309_v27 = vsel %vm277_vm1, %v261_v23, %v293_v26 }
  0x30   : > { %326 = vst.msk [vmem:[%s649_s3 + $0x78] sm:$0xff] %vm310_vm0, %v309_v27 }
  0x31 PF: > { %s12_s13 = sadd.s32 1, %s560_s13   ;;  %s721_s9 = smov %s552_s11 }
  0x32   : > { %p9_p7 = scmp.ge.s32.totalorder %s12_s13, 6   ;;  %s722_s10 = smov %s556_s12 }
  0x33   : > { %s723_s11 = smov %s726_s14  ;;  %s724_s12 = smov %s730_s15 }
  0x34   :  { %11 = sbr.rel (!%p9_p7) target bundleno = 3 (0x3), region = 58 }

// kernel: conv_block.3
= control target key start
LH: loop header
LB: loop body
LE: loop exit
PB: predicated region body
PF: predicated region fallthrough
CT: control target
= control target key end

     0   :  { %s3742_s21 = smov 0   ;;  %s3744_s22 = smov 0   ;;  %s4356_s0 = inlined_call_operand.vmem [shape: bf16[2,16,16,4], index: 0, kind: input, shape index: {}, may-alias: {0,1,2}]   ;;  %s4357_s1 = inlined_call_operand.vmem [shape: bf16[2,16,16,4], index: 1, kind: input, shape index: {}, may-alias: {0,1,2}]   ;;  %s4358_s2 = inlined_call_operand.vmem [shape: bf16[2,16,16,4], index: 2, kind: input, shape index: {}, may-alias: {0,1,2}]   ;;  %s4359_s3 = inlined_call_operand.vmem [shape: f32[2,4], index: 3, kind: input, shape index: {}]   ;;  %s4360_s4 = inlined_call_operand.vmem [shape: bf16[9,4,8], index: 4, kind: input, shape index: {}]   ;;  %s4361_s5 = inlined_call_operand.vmem [shape: bf16[2,16,16,8], index: 5, kind: output, shape index: {0}]   ;;  %s4362_s6 = inlined_call_operand.vmem [shape: f32[2,2,2,8], index: 6, kind: output, shape index: {1}]  }
   0x1   :  { %s3746_s23 = smov 0   ;;  %s3748_s24 = smov 0  }
   0x2   :  { %s3750_s25 = smov 0  }
   0x3 LB: > { %s26_s3 = sadd.s32 1, %s3695_s23  ;;  %s29_s26 = sadd.s32 1, %s3699_s24  ;;  %s3703_s25 = sphi %s3750_s25, %s17_s25   ;;  %s3699_s24 = sphi %s3748_s24, %s4406_s24   ;;  %s3695_s23 = sphi %s3746_s23, %s4405_s23   ;;  %s3691_s22 = sphi %s3744_s22, %s4404_s22   ;;  %s3687_s21 = sphi %s3742_s21, %s4403_s21  }
   0x4   : > { %p27_p0 = scmp.ge.s32.totalorder %s26_s3, 2  ;;  %p3012_p1 = scmp.ge.s32.totalorder %s3703_s25, 1 }
   0x5   : > { %p303_p2 = scmp.lt.s32.totalorder %s3703_s25, 5 }
   0x6   : > { %s4408_s3 = smov (%p27_p0, %s26_s3), 0  ;;  %s4410_s26 = smov (!%p27_p0, %s29_s26), %s3699_s24 }
   0x7   : > { %p304_p3 = pnand %p3012_p1, %p303_p2  ;;  %p31_p4 = scmp.ge.s32.totalorder %s4410_s26, 2 }
   0x9   : > { %s4412_s26 = smov (%p31_p4, %s4410_s26), 0  ;;  %307 = sbr.rel (%p304_p3) target bundleno = 426 (0x1aa), region = 40 }
   0xe   : > { %s3775_s27 = sshll.u32 %s3687_s21, 3  ;;  %p378_p5 = scmp.lt.s32.totalorder %s3691_s22, 1  ;;  %vm459_vm0 = vcmask 27648  }
   0xf   : > { %p380_p6 = scmp.lt.s32.totalorder %s3775_s27, 15  ;;  %p435_p7 = scmp.lt.s32.totalorder %s3687_s21, 1 }
  0x10   : > { %s4414_s22 = smov (!%p378_p5, %s3691_s22), 1  ;;  %s3783_s8 = sadd.s32 4294967295, %s3775_s27 }
  0x11   : > { %s381_s28 = scalar_select %p380_p6, %s3775_s27, 15 }
  0x12   : > { %s3780_s29 = sshll.u32 %s4414_s22, 5  ;;  %s3038_s30 = sshll.u32 %s4414_s22, 1 }
  0x13   : > { %s3014_s7 = sshll.u32 %s381_s28, 1  ;;  %p390_p8 = scmp.gt.s32.totalorder %s3783_s8, 0 }
  0x14   : > { %s384_s9 = sadd.s32 %s3780_s29, %s3014_s7  ;;  %p3019_p9 = scmp.lt.s32.totalorder %s3783_s8, 15 }
  0x15   : > { %s3016_s10 = sshll.u32 %s384_s9, 2  ;;  %s3269_s20 = sadd.s32 8, %s3775_s27 }
  0x16   : > { %s3791_s13 = scalar_lea.vmem %s4356_s0, %s3016_s10  ;;  %s3796_s16 = scalar_lea.vmem %s4361_s5, %s3016_s10 }
  0x17   : > { %s436_s17 = scalar_select %p435_p7, %s3687_s21, 1  ;;  %v442_v0 = vld [vmem:[%s3791_s13] sm:$0xf]  ;;  %v443_v1 = vld [vmem:[%s3791_s13 + $0x4] sm:$0xf] }
  0x18   : > { %460 = vst.msk [vmem:[#allocation2 + $0x8] sm:$0xf] %vm459_vm0, %v442_v0  ;;  %461 = vst.msk [vmem:[#allocation2 + $0xc] sm:$0xf] %vm459_vm0, %v443_v1  ;;  %v444_v2 = vld [vmem:[%s3791_s13 + $0x8] sm:$0xf] }
  0x19   : > { %v445_v3 = vld [vmem:[%s3791_s13 + $0xc] sm:$0xf]  ;;  %v446_v4 = vld [vmem:[%s3791_s13 + $0x10] sm:$0xf]  ;;  %s438_s18 = sadd.s32 %s3038_s30, %s436_s17  ;;  %462 = vst.msk [vmem:[#allocation2 + $0x10] sm:$0xf] %vm459_vm0, %v444_v2 }
  0x1a   : > { %463 = vst.msk [vmem:[#allocation2 + $0x14] sm:$0xf] %vm459_vm0, %v445_v3  ;;  %464 = vst.msk [vmem:[#allocation2 + $0x18] sm:$0xf] %vm459_vm0, %v446_v4  ;;  %v447_v5 = vld [vmem:[%s3791_s13 + $0x14] sm:$0xf] }
  0x1b   : > { %v448_v6 = vld [vmem:[%s3791_s13 + $0x18] sm:$0xf]  ;;  %v449_v7 = vld [vmem:[%s3791_s13 + $0x1c] sm:$0xf]  ;;  %s3039_s19 = sshll.u32 %s438_s18, 1  ;;  %p407_p10 = scmp.lt.s32.totalorder %s3269_s20, 15 }
  0x1c   : > { %465 = vst.msk [vmem:[#allocation2 + $0x1c] sm:$0xf] %vm459_vm0, %v447_v5  ;;  %466 = vst.msk [vmem:[#allocation2 + $0x20] sm:$0xf] %vm459_vm0, %v448_v6  ;;  %v450_v8 = vld [vmem:[%s3791_s13 + $0x20] sm:$0xf]  ;;  %s3823_s30 = scalar_lea.vmem %s4362_s6, %s3039_s19 }
  0x1d   : > { %467 = vst.msk [vmem:[#allocation2 + $0x24] sm:$0xf] %vm459_vm0, %v449_v7  ;;  %v451_v9 = vld [vmem:[%s3791_s13 + $0x24] sm:$0xf]  ;;  %468 = vst.msk [vmem:[#allocation2 + $0x28] sm:$0xf] %vm459_vm0, %v450_v8 }
  0x1e   : > { %469 = vst.msk [vmem:[#allocation2 + $0x2c] sm:$0xf] %vm459_vm0, %v451_v9  ;;  %v452_v10 = vld [vmem:[%s3791_s13 + $0x28] sm:$0xf]  ;;  %v453_v11 = vld [vmem:[%s3791_s13 + $0x2c] sm:$0xf] }
  0x1f   : > { %v454_v12 = vld [vmem:[%s3791_s13 + $0x30] sm:$0xf]  ;;  %470 = vst.msk [vmem:[#allocation2 + $0x30] sm:$0xf] %vm459_vm0, %v452_v10  ;;  %471 = vst.msk [vmem:[#allocation2 + $0x34] sm:$0xf] %vm459_vm0, %v453_v11 }
  0x20   : > { %472 = vst.msk [vmem:[#allocation2 + $0x38] sm:$0xf] %vm459_vm0, %v454_v12  ;;  %v455_v13 = vld [vmem:[%s3791_s13 + $0x34] sm:$0xf]  ;;  %v456_v14 = vld [vmem:[%s3791_s13 + $0x38] sm:$0xf] }
  0x21   : > { %v457_v15 = vld [vmem:[%s3791_s13 + $0x3c] sm:$0xf]  ;;  %473 = vst.msk [vmem:[#allocation2 + $0x3c] sm:$0xf] %vm459_vm0, %v455_v13  ;;  %474 = vst.msk [vmem:[#allocation2 + $0x40] sm:$0xf] %vm459_vm0, %v456_v14 }
  0x22   : > { %475 = vst.msk [vmem:[#allocation2 + $0x44] sm:$0xf] %vm459_vm0, %v457_v15  ;;  %s391_s27 = scalar_select %p390_p8, %s3783_s8, 0 }
  0x23   : > { %s4418_s20 = smov (!%p407_p10, %s3269_s20), 15  ;;  %p3040_p11 = scmp.ne.s32.totalorder %s3687_s21, 0 }
  0x24   : > { %s4416_s27 = smov (!%p3019_p9, %s391_s27), 15  ;;  %s4420_s20 = smov (!%p407_p10, %s4418_s20), 15 }
  0x25   : > { %s3024_s7 = sshll.u32 %s4416_s27, 1  ;;  %s3031_s14 = sshll.u32 %s4420_s20, 1 }
  0x26   : > { %s398_s9 = sadd.s32 %s3024_s7, %s3780_s29  ;;  %s415_s15 = sadd.s32 %s3031_s14, %s3780_s29 }
  0x27   : > { %s3026_s10 = sshll.u32 %s398_s9, 2  ;;  %s3033_s17 = sshll.u32 %s415_s15, 2 }
  0x28   : > { %s400_s13 = scalar_lea.vmem %s4357_s1, %s3026_s10  ;;  %s417_s19 = scalar_lea.vmem %s4358_s2, %s3033_s17 }
  0x29   : > { %v476_v16 = vld [vmem:[%s400_s13] sm:$0xf]  ;;  %v477_v17 = vld [vmem:[%s400_s13 + $0x4] sm:$0xf]  ;;  %488 = sbr.rel (%p3040_p11) target bundleno = 48 (0x30), region = 44 }
  0x2a   : > { %478 = vst.msk [vmem:[#allocation2] sm:$0xf] %vm459_vm0, %v476_v16  ;;  %479 = vst.msk [vmem:[#allocation2 + $0x4] sm:$0xf] %vm459_vm0, %v477_v17  ;;  %v480_v18 = vld [vmem:[%s417_s19] sm:$0xf] }
  0x2b   : > { %v481_v19 = vld [vmem:[%s417_s19 + $0x4] sm:$0xf]  ;;  %483 = vst.msk [vmem:[#allocation2 + $0x48] sm:$0xf] %vm459_vm0, %v480_v18 }
  0x2c   : > { %484 = vst.msk [vmem:[#allocation2 + $0x4c] sm:$0xf] %vm459_vm0, %v481_v19 }
  0x2e   : > { %v3705_v20 = vmov 0  }
  0x2f   : > { %489 = vst.msk [vmem:[#allocation2] sm:$0xf] %vm459_vm0, %v3705_v20  ;;  %490 = vst.msk [vmem:[#allocation2 + $0x4] sm:$0xf] %vm459_vm0, %v3705_v20 }
  0x30 PF: > { %p3041_p12 = scmp.ne.s32.totalorder %s3687_s21, 1 }
  0x32   : > { %494 = sbr.rel (%p3041_p12) target bundleno = 57 (0x39), region = 48 }
  0x37   : > { %v3706_v21 = vmov 0  }
  0x38   : > { %495 = vst.msk [vmem:[#allocation2 + $0x48] sm:$0xf] %vm459_vm0, %v3706_v21  ;;  %496 = vst.msk [vmem:[#allocation2 + $0x4c] sm:$0xf] %vm459_vm0, %v3706_v21 }
  0x39 PF: > { %v3092_v22 = vld [vmem:[%s4360_s4 + $0x2] sm:$0x3]  ;;  %vm983_vm1 = vcmask 1041408   ;;  %vm958_vm2 = vcmask 31744   ;;  %v3585_v26 = vld [vmem:[#allocation2 + $0x8] sm:$0xff]   ;;  %v3587_v31 = vld [vmem:[#allocation2 + $0x10] sm:$0xff]  }
  0x3a   : > { %v3583_v23 = vld [vmem:[#allocation2] sm:$0xff]   ;;  %3531 = vmatprep.subr.msk.bf16.mxu0 %vm983_vm1, %v3092_v22  ;;  %3532 = vmatprep.subr.msk.bf16.mxu1 %vm983_vm1, %v3092_v22  ;;  %v985_v24 = vsel %vm983_vm1, %v3092_v22, 0  ;;  %v3586_v27 = vld [vmem:[#allocation2 + $0x28] sm:$0xff]   ;;  %v3588_v33 = vld [vmem:[#allocation2 + $0x30] sm:$0xff]   ;;  %vm647_vm3 = vcmask 1040384   ;;  %vm780_vm5 = vcmask 1047552  }
  0x3b   : > { %3368 = vmatpush3.bf16.msra.mxu0 %v985_v24  ;;  %3530 = vmatpush3.bf16.msra.mxu1 %v985_v24  ;;  %v3584_v25 = vld [vmem:[#allocation2 + $0x20] sm:$0xff]   ;;  %v3589_v34 = vld [vmem:[#allocation2 + $0x18] sm:$0xff]   ;;  %vm648_vm4 = vsmask.f32 256  ;;  %v3594_v37 = vld [vmem:[#allocation2 + $0x8] sm:$0xff]   ;;  %vm2797_vm9 = vcmask 60416  }
  0x3c   : > { %3369 = vmatprep.mubr.msk.bf16.mxu0 %vm958_vm2, %v3583_v23  ;;  %3377 = vmatprep.mubr.msk.bf16.mxu1 %vm958_vm2, %v3584_v25  ;;  %v899_v28 = vld [vmem:[%s4360_s4] sm:$0x3]  ;;  %v3125_v30 = vld [vmem:[%s4360_s4 + $0x4] sm:$0x3]  ;;  %v3590_v35 = vld [vmem:[#allocation2 + $0x38] sm:$0xff]   ;;  %v575_v41 = vshrl.u32 %v3594_v37, 16 }
  0x3d   : > { %3533 = vmatprep.subr.msk.bf16.mxu1 %vm983_vm1, %v899_v28  ;;  %v1149_v29 = vsel %vm983_vm1, %v899_v28, 0  ;;  %3534 = vmatprep.subr.msk.bf16.mxu0 %vm983_vm1, %v3125_v30  ;;  %v1331_v32 = vsel %vm983_vm1, %v3125_v30, 0  ;;  %v3591_v36 = vld [vmem:[#allocation2] sm:$0xff]   ;;  %vm781_vm6 = vsmask.f32 7424  ;;  %v578_v42 = vshll.u32 %v3594_v37, 16  ;;  %vm3898_vm7 = vmand %vm647_vm3, %vm648_vm4 }
  0x3e   : > { %3370 = vmatmul.mubr.msk.bf16.vlgmr.msra.gmra.mxu0 %vm958_vm2, %v3585_v26  ;;  %3378 = vmatmul.mubr.msk.bf16.vlgmr.msra.gmra.mxu1 %vm958_vm2, %v3586_v27  ;;  %v3142_v38 = vld [vmem:[%s4360_s4 + $0x6] sm:$0x3]  ;;  %v568_v39 = vshrl.u32 %v3591_v36, 16  ;;  %v571_v40 = vshll.u32 %v3591_v36, 16  ;;  %v3159_v44 = vld [vmem:[%s4360_s4 + $0x8] sm:$0x3]  ;;  %vm3905_vm8 = vmand %vm780_vm5, %vm781_vm6 }
  0x3f   : > { %3386 = vmatpush3.bf16.msra.mxu1 %v1149_v29  ;;  %3404 = vmatpush3.bf16.msra.mxu0 %v1331_v32  ;;  %v3890_v43 = vsel %vm983_vm1, %v3142_v38, 0  ;;  %v3597_v45 = vld [vmem:[#allocation2 + $0x10] sm:$0xff]   ;;  %v577_v49 = vrot.slane %v575_v41, 7  ;;  %v752_v50 = vrot.slane %v578_v42, 1  ;;  %v3910_v52 = vsel %vm983_vm1, %v3159_v44, 0  ;;  %v3600_v55 = vld [vmem:[#allocation2 + $0x18] sm:$0xff]  }
  0x40   : > { %3373 = vmatprep.mubr.msk.bf16.mxu0 %vm958_vm2, %v3587_v31  ;;  %3381 = vmatprep.mubr.msk.bf16.mxu1 %vm958_vm2, %v3588_v33  ;;  %v570_v46 = vrot.slane %v568_v39, 7  ;;  %v750_v48 = vrot.slane %v571_v40, 1  ;;  %v582_v53 = vshrl.u32 %v3597_v45, 16  ;;  %v585_v54 = vshll.u32 %v3597_v45, 16  ;;  %v3603_v0 = vld [vmem:[#allocation2 + $0x20] sm:$0xff]   ;;  %v3912_v1 = vld [vmem:[#allocation2 + $0x28] sm:$0xff]  }
  0x41   : > { %3535 = vmatprep.subr.msk.bf16.mxu1 %vm983_vm1, %v3142_v38  ;;  %3536 = vmatprep.subr.msk.bf16.mxu0 %vm983_vm1, %v3159_v44  ;;  %v580_v58 = vor.u32 %v578_v42, %v577_v49  ;;  %v753_v59 = vor.u32 %v752_v50, %v575_v41  ;;  %v589_v62 = vshrl.u32 %v3600_v55, 16  ;;  %v592_v63 = vshll.u32 %v3600_v55, 16  ;;  %v3936_v30 = vld [vmem:[#allocation2 + $0x30] sm:$0xff]   ;;  %v3631_v47 = vld [vmem:[#allocation2 + $0x40] sm:$0xff]  }
  0x42   : > { %v573_v56 = vor.u32 %v571_v40, %v570_v46  ;;  %v751_v57 = vor.u32 %v750_v48, %v568_v39  ;;  %v584_v60 = vrot.slane %v582_v53, 7  ;;  %v754_v61 = vrot.slane %v585_v54, 1  ;;  %v3951_v46 = vld [vmem:[#allocation2 + $0x38] sm:$0xff]  }
  0x43   : > { %v651_v4 = vsel %vm3898_vm7, 0, %v580_v58  ;;  %v784_v5 = vsel %vm3905_vm8, %v753_v59, 0  ;;  %v591_v16 = vrot.slane %v589_v62, 7  ;;  %v756_v17 = vrot.slane %v592_v63, 1  ;;  %v3966_v59 = vld [vmem:[%s4360_s4 + $0xc] sm:$0x3] }
  0x44   : > { %v650_v2 = vsel %vm3898_vm7, 0, %v573_v56  ;;  %v783_v3 = vsel %vm3905_vm8, %v751_v57, 0  ;;  %v3054_v10 = vcombine.low %v651_v4, %v651_v4  ;;  %v3055_v11 = vcombine.high %v651_v4, %v651_v4 }
  0x45   : > { %v3052_v6 = vcombine.low %v650_v2, %v650_v2  ;;  %v3053_v7 = vcombine.high %v650_v2, %v650_v2  ;;  %v3072_v8 = vcombine.low %v783_v3, %v783_v3  ;;  %v3073_v9 = vcombine.high %v783_v3, %v783_v3 }
  0x46   : > { %3374 = vmatmul.mubr.msk.bf16.gmra.mxu0 %vm958_vm2, %v3589_v34  ;;  %3382 = vmatmul.mubr.msk.bf16.gmra.mxu1 %vm958_vm2, %v3590_v35  ;;  %v3074_v12 = vcombine.low %v784_v5, %v784_v5  ;;  %v3075_v13 = vcombine.high %v784_v5, %v784_v5  ;;  %v587_v14 = vor.u32 %v585_v54, %v584_v60  ;;  %v596_v18 = vshrl.u32 %v3603_v0, 16  ;;  %v3958_v54 = vld [vmem:[%s4360_s4 + $0xa] sm:$0x3] }
  0x47   : > { %730 = vst.msk [vmem:[#allocation3] sm:$0xf] %vm459_vm0, %v3052_v6  ;;  %731 = vst.msk [vmem:[#allocation3 + $0x4] sm:$0xf] %vm459_vm0, %v3053_v7  ;;  %v755_v15 = vor.u32 %v754_v61, %v582_v53  ;;  %v599_v19 = vshll.u32 %v3603_v0, 16  ;;  %v603_v20 = vshrl.u32 %v3912_v1, 16  ;;  %v594_v24 = vor.u32 %v592_v63, %v591_v16 }
  0x48   : > { %863 = vst.msk [vmem:[#allocation4] sm:$0xf] %vm459_vm0, %v3072_v8  ;;  %864 = vst.msk [vmem:[#allocation4 + $0x4] sm:$0xf] %vm459_vm0, %v3073_v9  ;;  %v606_v21 = vshll.u32 %v3912_v1, 16  ;;  %v652_v22 = vsel %vm3898_vm7, 0, %v587_v14  ;;  %v757_v25 = vor.u32 %v756_v17, %v589_v62 }
  0x49   : > { %732 = vst.msk [vmem:[#allocation3 + $0x8] sm:$0xf] %vm459_vm0, %v3054_v10  ;;  %733 = vst.msk [vmem:[#allocation3 + $0xc] sm:$0xf] %vm459_vm0, %v3055_v11  ;;  %v785_v23 = vsel %vm3905_vm8, %v755_v15, 0  ;;  %v3056_v26 = vcombine.low %v652_v22, %v652_v22  ;;  %v3057_v27 = vcombine.high %v652_v22, %v652_v22  ;;  %v653_v31 = vsel %vm3898_vm7, 0, %v594_v24 }
  0x4a   : > { %865 = vst.msk [vmem:[#allocation4 + $0x8] sm:$0xf] %vm459_vm0, %v3074_v12  ;;  %866 = vst.msk [vmem:[#allocation4 + $0xc] sm:$0xf] %vm459_vm0, %v3075_v13  ;;  %v3076_v28 = vcombine.low %v785_v23, %v785_v23  ;;  %v3077_v29 = vcombine.high %v785_v23, %v785_v23  ;;  %v786_v32 = vsel %vm3905_vm8, %v757_v25, 0  ;;  %v598_v33 = vrot.slane %v596_v18, 7 }
  0x4b   : > { %v758_v34 = vrot.slane %v599_v19, 1  ;;  %734 = vst.msk [vmem:[#allocation3 + $0x10] sm:$0xf] %vm459_vm0, %v3056_v26  ;;  %735 = vst.msk [vmem:[#allocation3 + $0x14] sm:$0xf] %vm459_vm0, %v3057_v27  ;;  %v3058_v35 = vcombine.low %v653_v31, %v653_v31  ;;  %v3059_v36 = vcombine.high %v653_v31, %v653_v31  ;;  %v3078_v37 = vcombine.low %v786_v32, %v786_v32 }
  0x4c   : > { %867 = vst.msk [vmem:[#allocation4 + $0x10] sm:$0xf] %vm459_vm0, %v3076_v28  ;;  %868 = vst.msk [vmem:[#allocation4 + $0x14] sm:$0xf] %vm459_vm0, %v3077_v29  ;;  %v3079_v38 = vcombine.high %v786_v32, %v786_v32  ;;  %v601_v39 = vor.u32 %v599_v19, %v598_v33  ;;  %v605_v41 = vrot.slane %v603_v20, 7  ;;  %v760_v42 = vrot.slane %v606_v21, 1 }
  0x4d   : > { %v759_v40 = vor.u32 %v758_v34, %v596_v18  ;;  %736 = vst.msk [vmem:[#allocation3 + $0x18] sm:$0xf] %vm459_vm0, %v3058_v35  ;;  %737 = vst.msk [vmem:[#allocation3 + $0x1c] sm:$0xf] %vm459_vm0, %v3059_v36  ;;  %v610_v45 = vshrl.u32 %v3936_v30, 16  ;;  %v613_v7 = vshll.u32 %v3936_v30, 16 }
  0x4e   : > { %v3592_v44 = vld [vmem:[#allocation3] sm:$0xff]   ;;  %869 = vst.msk [vmem:[#allocation4 + $0x18] sm:$0xf] %vm459_vm0, %v3078_v37  ;;  %870 = vst.msk [vmem:[#allocation4 + $0x1c] sm:$0xf] %vm459_vm0, %v3079_v38  ;;  %v654_v49 = vsel %vm3898_vm7, 0, %v601_v39  ;;  %v608_v50 = vor.u32 %v606_v21, %v605_v41  ;;  %v761_v53 = vor.u32 %v760_v42, %v603_v20 }
  0x4f   : > { %v3593_v48 = vld [vmem:[#allocation4] sm:$0xff]   ;;  %3387 = vmatprep.mubr.msk.bf16.mxu1 %vm958_vm2, %v3592_v44  ;;  %v3060_v56 = vcombine.low %v654_v49, %v654_v49  ;;  %v3061_v57 = vcombine.high %v654_v49, %v654_v49  ;;  %v787_v58 = vsel %vm3905_vm8, %v759_v40, 0  ;;  %v612_v3 = vrot.slane %v610_v45, 7  ;;  %v3616_v37 = vld [vmem:[#allocation2 + $0x8] sm:$0xff]   ;;  %v3620_v49 = vld [vmem:[#allocation2 + $0x18] sm:$0xff]  }
  0x50   : > { %v3595_v55 = vld [vmem:[#allocation3 + $0x8] sm:$0xff]   ;;  %3405 = vmatprep.mubr.msk.bf16.mxu0 %vm958_vm2, %v3593_v48  ;;  %v3080_v61 = vcombine.low %v787_v58, %v787_v58  ;;  %v3081_v62 = vcombine.high %v787_v58, %v787_v58  ;;  %v655_v63 = vsel %vm3898_vm7, 0, %v608_v50  ;;  %v788_v2 = vsel %vm3905_vm8, %v761_v53, 0  ;;  %v3629_v40 = vld [vmem:[#allocation2 + $0x40] sm:$0xff]  }
  0x51   : > { %v3596_v60 = vld [vmem:[#allocation4 + $0x8] sm:$0xff]   ;;  %3388 = vmatmul.mubr.msk.bf16.vlgmr.msra.gmra.mxu1 %vm958_vm2, %v3595_v55  ;;  %738 = vst.msk [vmem:[#allocation3 + $0x20] sm:$0xf] %vm459_vm0, %v3060_v56  ;;  %739 = vst.msk [vmem:[#allocation3 + $0x24] sm:$0xf] %vm459_vm0, %v3061_v57  ;;  %v3062_v0 = vcombine.low %v655_v63, %v655_v63  ;;  %v3063_v1 = vcombine.high %v655_v63, %v655_v63  ;;  %v3082_v5 = vcombine.low %v788_v2, %v788_v2  ;;  %v3615_v38 = vld [vmem:[#allocation3 + $0x8] sm:$0xff]  }
  0x52   : > { %3406 = vmatmul.mubr.msk.bf16.vlgmr.msra.gmra.mxu0 %vm958_vm2, %v3596_v60  ;;  %3422 = vmatpush3.bf16.msra.mxu1 %v3890_v43  ;;  %v3598_v4 = vld [vmem:[#allocation3 + $0x10] sm:$0xff]   ;;  %871 = vst.msk [vmem:[#allocation4 + $0x20] sm:$0xf] %vm459_vm0, %v3080_v61  ;;  %872 = vst.msk [vmem:[#allocation4 + $0x24] sm:$0xf] %vm459_vm0, %v3081_v62  ;;  %v3083_v6 = vcombine.high %v788_v2, %v788_v2  ;;  %v617_v9 = vshrl.u32 %v3951_v46, 16  ;;  %v615_v43 = vor.u32 %v613_v7, %v612_v3 }
  0x53   : > { %3440 = vmatpush3.bf16.msra.mxu0 %v3910_v52  ;;  %v3599_v8 = vld [vmem:[#allocation4 + $0x10] sm:$0xff]   ;;  %740 = vst.msk [vmem:[#allocation3 + $0x28] sm:$0xf] %vm459_vm0, %v3062_v0  ;;  %741 = vst.msk [vmem:[#allocation3 + $0x2c] sm:$0xf] %vm459_vm0, %v3063_v1  ;;  %3537 = vmatprep.subr.msk.bf16.mxu1 %vm983_vm1, %v3958_v54  ;;  %v762_v10 = vrot.slane %v613_v7, 1 }
  0x54   : > { %3391 = vmatprep.mubr.msk.bf16.mxu1 %vm958_vm2, %v3598_v4  ;;  %873 = vst.msk [vmem:[#allocation4 + $0x28] sm:$0xf] %vm459_vm0, %v3082_v5  ;;  %874 = vst.msk [vmem:[#allocation4 + $0x2c] sm:$0xf] %vm459_vm0, %v3083_v6  ;;  %3538 = vmatprep.subr.msk.bf16.mxu0 %vm983_vm1, %v3966_v59  ;;  %v3601_v52 = vld [vmem:[#allocation3 + $0x18] sm:$0xff]   ;;  %v619_v11 = vrot.slane %v617_v9, 7 }
  0x55   : > { %3409 = vmatprep.mubr.msk.bf16.mxu0 %vm958_vm2, %v3599_v8  ;;  %v3602_v12 = vld [vmem:[#allocation4 + $0x18] sm:$0xff]   ;;  %v656_v13 = vsel %vm3898_vm7, 0, %v615_v43  ;;  %v763_v14 = vor.u32 %v762_v10, %v610_v45  ;;  %v620_v15 = vshll.u32 %v3951_v46, 16  ;;  %v624_v41 = vshrl.u32 %v3629_v40, 16  ;;  %v3617_v45 = vld [vmem:[#allocation3 + $0x10] sm:$0xff]   ;;  %v3618_v46 = vld [vmem:[#allocation2 + $0x10] sm:$0xff]  }
  0x56   : > { %v3064_v16 = vcombine.low %v656_v13, %v656_v13  ;;  %v3065_v17 = vcombine.high %v656_v13, %v656_v13  ;;  %v627_v42 = vshll.u32 %v3629_v40, 16  ;;  %v1927_v48 = vsel %vm983_vm1, %v3958_v54, 0  ;;  %v3619_v53 = vld [vmem:[#allocation3 + $0x18] sm:$0xff]   ;;  %v3227_v54 = vld [vmem:[%s4360_s4 + $0x10] sm:$0x3]  ;;  %v3622_v63 = vld [vmem:[#allocation2 + $0x20] sm:$0xff]  }
  0x57   : > { %v789_v19 = vsel %vm3905_vm8, %v763_v14, 0  ;;  %v622_v20 = vor.u32 %v620_v15, %v619_v11  ;;  %v764_v24 = vrot.slane %v620_v15, 1  ;;  %v626_v44 = vrot.slane %v624_v41, 7  ;;  %v3210_v61 = vld [vmem:[%s4360_s4 + $0xe] sm:$0x3]  ;;  %v3626_v10 = vld [vmem:[#allocation2 + $0x30] sm:$0xff]  }
  0x58   : > { %v3604_v18 = vld [vmem:[#allocation3 + $0x20] sm:$0xff]   ;;  %742 = vst.msk [vmem:[#allocation3 + $0x30] sm:$0xf] %vm459_vm0, %v3064_v16  ;;  %743 = vst.msk [vmem:[#allocation3 + $0x34] sm:$0xf] %vm459_vm0, %v3065_v17  ;;  %v3084_v22 = vcombine.low %v789_v19, %v789_v19  ;;  %v3085_v23 = vcombine.high %v789_v19, %v789_v19  ;;  %v766_v55 = vrot.slane %v627_v42, 1 }
  0x59   : > { %3392 = vmatmul.mubr.msk.bf16.gmra.mxu1 %vm958_vm2, %v3601_v52  ;;  %v3605_v21 = vld [vmem:[#allocation4 + $0x20] sm:$0xff]   ;;  %v657_v25 = vsel %vm3898_vm7, 0, %v622_v20  ;;  %v765_v28 = vor.u32 %v764_v24, %v617_v9  ;;  %v629_v50 = vor.u32 %v627_v42, %v626_v44  ;;  %v2126_v56 = vsel %vm983_vm1, %v3966_v59, 0  ;;  %v3621_v2 = vld [vmem:[#allocation3 + $0x20] sm:$0xff]   ;;  %v3624_v3 = vld [vmem:[#allocation2 + $0x28] sm:$0xff]  }
  0x5a   : > { %3410 = vmatmul.mubr.msk.bf16.gmra.mxu0 %vm958_vm2, %v3602_v12  ;;  %3395 = vmatprep.mubr.msk.bf16.mxu1 %vm958_vm2, %v3604_v18  ;;  %875 = vst.msk [vmem:[#allocation4 + $0x30] sm:$0xf] %vm459_vm0, %v3084_v22  ;;  %876 = vst.msk [vmem:[#allocation4 + $0x34] sm:$0xf] %vm459_vm0, %v3085_v23  ;;  %v3066_v26 = vcombine.low %v657_v25, %v657_v25  ;;  %v3067_v27 = vcombine.high %v657_v25, %v657_v25  ;;  %v3607_v29 = vld [vmem:[#allocation3 + $0x28] sm:$0xff]   ;;  %v3647_v5 = vld [vmem:[#allocation2 + $0x48] sm:$0xff]  }
  0x5b   : > { %3413 = vmatprep.mubr.msk.bf16.mxu0 %vm958_vm2, %v3605_v21  ;;  %v790_v30 = vsel %vm3905_vm8, %v765_v28, 0  ;;  %v3608_v31 = vld [vmem:[#allocation4 + $0x28] sm:$0xff]   ;;  %v658_v57 = vsel %vm3898_vm7, 0, %v629_v50  ;;  %v767_v62 = vor.u32 %v766_v55, %v624_v41  ;;  %v3623_v4 = vld [vmem:[#allocation3 + $0x28] sm:$0xff]   ;;  %v631_v6 = vshrl.u32 %v3647_v5, 16  ;;  %v3633_v21 = vld [vmem:[#allocation3 + $0x10] sm:$0xff]  }
  0x5c   : > { %744 = vst.msk [vmem:[#allocation3 + $0x38] sm:$0xf] %vm459_vm0, %v3066_v26  ;;  %745 = vst.msk [vmem:[#allocation3 + $0x3c] sm:$0xf] %vm459_vm0, %v3067_v27  ;;  %v3086_v32 = vcombine.low %v790_v30, %v790_v30  ;;  %v3087_v33 = vcombine.high %v790_v30, %v790_v30  ;;  %v3068_v58 = vcombine.low %v658_v57, %v658_v57  ;;  %v634_v7 = vshll.u32 %v3647_v5, 16  ;;  %v3628_v13 = vld [vmem:[#allocation2 + $0x38] sm:$0xff]  }
  0x5d   : > { %v3069_v60 = vcombine.high %v658_v57, %v658_v57  ;;  %v791_v59 = vsel %vm3905_vm8, %v767_v62, 0  ;;  %v633_v8 = vrot.slane %v631_v6, 7  ;;  %v3632_v20 = vld [vmem:[#allocation4 + $0x8] sm:$0xff]   ;;  %v3634_v22 = vld [vmem:[#allocation4 + $0x10] sm:$0xff]   ;;  %v2325_v24 = vsel %vm983_vm1, %v3210_v61, 0  ;;  %v3636_v25 = vld [vmem:[#allocation4 + $0x18] sm:$0xff]  }
  0x5e   : > { %877 = vst.msk [vmem:[#allocation4 + $0x38] sm:$0xf] %vm459_vm0, %v3086_v32  ;;  %878 = vst.msk [vmem:[#allocation4 + $0x3c] sm:$0xf] %vm459_vm0, %v3087_v33  ;;  %v3088_v0 = vcombine.low %v791_v59, %v791_v59  ;;  %v3089_v1 = vcombine.high %v791_v59, %v791_v59  ;;  %v768_v43 = vrot.slane %v634_v7, 1  ;;  %v3635_v23 = vld [vmem:[#allocation3 + $0x18] sm:$0xff]  }
  0x5f   : > { %v3610_v34 = vld [vmem:[#allocation3 + $0x30] sm:$0xff]   ;;  %746 = vst.msk [vmem:[#allocation3 + $0x40] sm:$0xf] %vm459_vm0, %v3068_v58  ;;  %747 = vst.msk [vmem:[#allocation3 + $0x44] sm:$0xf] %vm459_vm0, %v3069_v60  ;;  %v636_v52 = vor.u32 %v634_v7, %v633_v8  ;;  %v2524_v26 = vsel %vm983_vm1, %v3227_v54, 0 }
  0x60   : > { %879 = vst.msk [vmem:[#allocation4 + $0x40] sm:$0xf] %vm459_vm0, %v3088_v0  ;;  %880 = vst.msk [vmem:[#allocation4 + $0x44] sm:$0xf] %vm459_vm0, %v3089_v1  ;;  %v3625_v9 = vld [vmem:[#allocation3 + $0x30] sm:$0xff]   ;;  %v769_v12 = vor.u32 %v768_v43, %v631_v6  ;;  %v3637_v27 = vld [vmem:[#allocation3 + $0x20] sm:$0xff]  }
  0x61   : > { %3396 = vmatmul.mubr.msk.bf16.gmra.mxu1 %vm958_vm2, %v3607_v29  ;;  %v3611_v35 = vld [vmem:[#allocation4 + $0x30] sm:$0xff]   ;;  %v659_v14 = vsel %vm3898_vm7, 0, %v636_v52  ;;  %v3638_v28 = vld [vmem:[#allocation4 + $0x20] sm:$0xff]   ;;  %v3639_v29 = vld [vmem:[#allocation3 + $0x28] sm:$0xff]   ;;  %vm2639_vm10 = vcmask 64512   ;;  %vm2677_vm11 = vcmask 57344  }
  0x62   : > { %3414 = vmatmul.mubr.msk.bf16.gmra.mxu0 %vm958_vm2, %v3608_v31  ;;  %3399 = vmatprep.mubr.msk.bf16.mxu1 %vm958_vm2, %v3610_v34  ;;  %v3070_v15 = vcombine.low %v659_v14, %v659_v14  ;;  %v3071_v16 = vcombine.high %v659_v14, %v659_v14  ;;  %v792_v17 = vsel %vm3905_vm8, %v769_v12, 0  ;;  %v3640_v30 = vld [vmem:[#allocation4 + $0x28] sm:$0xff]   ;;  %v3641_v31 = vld [vmem:[#allocation3 + $0x30] sm:$0xff]   ;;  %v3642_v32 = vld [vmem:[#allocation4 + $0x30] sm:$0xff]  }
  0x63   : > { %3417 = vmatprep.mubr.msk.bf16.mxu0 %vm958_vm2, %v3611_v35  ;;  %v3613_v36 = vld [vmem:[#allocation3 + $0x38] sm:$0xff]   ;;  %v3090_v18 = vcombine.low %v792_v17, %v792_v17  ;;  %v3091_v19 = vcombine.high %v792_v17, %v792_v17  ;;  %v3651_v40 = vld [vmem:[#allocation2 + $0x18] sm:$0xff]   ;;  %v3653_v42 = vld [vmem:[#allocation2 + $0x20] sm:$0xff]  }
  0x64   : > { %v3627_v11 = vld [vmem:[#allocation3 + $0x38] sm:$0xff]   ;;  %748 = vst.msk [vmem:[#allocation3 + $0x48] sm:$0xf] %vm459_vm0, %v3070_v15  ;;  %749 = vst.msk [vmem:[#allocation3 + $0x4c] sm:$0xf] %vm459_vm0, %v3071_v16  ;;  %v3652_v41 = vld [vmem:[#allocation4 + $0x18] sm:$0xff]  }
  0x65   : > { %v3614_v39 = vld [vmem:[#allocation4 + $0x38] sm:$0xff]   ;;  %881 = vst.msk [vmem:[#allocation4 + $0x48] sm:$0xf] %vm459_vm0, %v3090_v18  ;;  %882 = vst.msk [vmem:[#allocation4 + $0x4c] sm:$0xf] %vm459_vm0, %v3091_v19  ;;  %v3643_v33 = vld [vmem:[#allocation3 + $0x38] sm:$0xff]  }
  0x66   : > { %v3630_v51 = vld [vmem:[#allocation3 + $0x40] sm:$0xff]   ;;  %v3644_v34 = vld [vmem:[#allocation4 + $0x38] sm:$0xff]   ;;  %v3654_v44 = vld [vmem:[#allocation4 + $0x20] sm:$0xff]  }
  0x67   : > { %v3645_v35 = vld [vmem:[#allocation3 + $0x40] sm:$0xff]   ;;  %v3659_v50 = vld [vmem:[#allocation2 + $0x38] sm:$0xff]   ;;  %v3661_v55 = vld [vmem:[#allocation2 + $0x40] sm:$0xff]  }
  0x68   : > { %v3663_v57 = vld [vmem:[#allocation2 + $0x48] sm:$0xff]  }
  0x69   : > { %3400 = vmatmul.mubr.msk.bf16.gmra.mxu1 %vm958_vm2, %v3613_v36  ;;  %v3646_v36 = vld [vmem:[#allocation4 + $0x40] sm:$0xff]  }
  0x6a   : > { %3418 = vmatmul.mubr.msk.bf16.gmra.mxu0 %vm958_vm2, %v3614_v39  ;;  %3423 = vmatprep.mubr.msk.bf16.mxu1 %vm958_vm2, %v3615_v38  ;;  %v3649_v38 = vld [vmem:[#allocation2 + $0x10] sm:$0xff]  }
  0x6b   : > { %3441 = vmatprep.mubr.msk.bf16.mxu0 %vm958_vm2, %v3616_v37  ;;  %v3648_v37 = vld [vmem:[#allocation3 + $0x48] sm:$0xff]   ;;  %v3650_v39 = vld [vmem:[#allocation4 + $0x10] sm:$0xff]  }
  0x6c   : > { %v3664_v58 = vld [vmem:[#allocation4 + $0x48] sm:$0xff]  }
  0x71   : > { %3424 = vmatmul.mubr.msk.bf16.vlgmr.msra.gmra.mxu1 %vm958_vm2, %v3617_v45  ;;  %v3655_v45 = vld [vmem:[#allocation2 + $0x28] sm:$0xff]  }
  0x72   : > { %3442 = vmatmul.mubr.msk.bf16.vlgmr.msra.gmra.mxu0 %vm958_vm2, %v3618_v46  ;;  %3458 = vmatpush3.bf16.msra.mxu1 %v1927_v48  ;;  %v3656_v46 = vld [vmem:[#allocation4 + $0x28] sm:$0xff]   ;;  %v3657_v48 = vld [vmem:[#allocation2 + $0x30] sm:$0xff]  }
  0x73   : > { %3476 = vmatpush3.bf16.msra.mxu0 %v2126_v56  ;;  %3427 = vmatprep.mubr.msk.bf16.mxu1 %vm958_vm2, %v3619_v53  ;;  %v3660_v53 = vld [vmem:[#allocation4 + $0x38] sm:$0xff]   ;;  %v3662_v56 = vld [vmem:[#allocation4 + $0x40] sm:$0xff]  }
  0x74   : > { %3445 = vmatprep.mubr.msk.bf16.mxu0 %vm958_vm2, %v3620_v49  ;;  %3539 = vmatprep.subr.msk.bf16.mxu1 %vm983_vm1, %v3210_v61  ;;  %v3658_v49 = vld [vmem:[#allocation4 + $0x30] sm:$0xff]  }
  0x75   : > { %3540 = vmatprep.subr.msk.bf16.mxu0 %vm983_vm1, %v3227_v54 }
  0x79   : > { %3428 = vmatmul.mubr.msk.bf16.gmra.mxu1 %vm958_vm2, %v3621_v2 }
  0x7a   : > { %3446 = vmatmul.mubr.msk.bf16.gmra.mxu0 %vm958_vm2, %v3622_v63  ;;  %3431 = vmatprep.mubr.msk.bf16.mxu1 %vm958_vm2, %v3623_v4 }
  0x7b   : > { %3449 = vmatprep.mubr.msk.bf16.mxu0 %vm958_vm2, %v3624_v3 }
  0x81   : > { %3432 = vmatmul.mubr.msk.bf16.gmra.mxu1 %vm958_vm2, %v3625_v9 }
  0x82   : > { %3450 = vmatmul.mubr.msk.bf16.gmra.mxu0 %vm958_vm2, %v3626_v10  ;;  %3435 = vmatprep.mubr.msk.bf16.mxu1 %vm958_vm2, %v3627_v11 }
  0x83   : > { %3453 = vmatprep.mubr.msk.bf16.mxu0 %vm958_vm2, %v3628_v13 }
  0x89   : > { %3436 = vmatmul.mubr.msk.bf16.gmra.mxu1 %vm958_vm2, %v3630_v51 }
  0x8a   : > { %3454 = vmatmul.mubr.msk.bf16.gmra.mxu0 %vm958_vm2, %v3631_v47  ;;  %3459 = vmatprep.mubr.msk.bf16.mxu1 %vm958_vm2, %v3632_v20 }
  0x8b   : > { %3477 = vmatprep.mubr.msk.bf16.mxu0 %vm958_vm2, %v3633_v21 }
  0x91   : > { %3460 = vmatmul.mubr.msk.bf16.vlgmr.msra.gmra.mxu1 %vm958_vm2, %v3634_v22 }
  0x92   : > { %3478 = vmatmul.mubr.msk.bf16.vlgmr.msra.gmra.mxu0 %vm958_vm2, %v3635_v23  ;;  %3494 = vmatpush3.bf16.msra.mxu1 %v2325_v24 }
  0x93   : > { %3512 = vmatpush3.bf16.msra.mxu0 %v2524_v26  ;;  %3463 = vmatprep.mubr.msk.bf16.mxu1 %vm958_vm2, %v3636_v25 }
  0x94   : > { %3481 = vmatprep.mubr.msk.bf16.mxu0 %vm958_vm2, %v3637_v27 }
  0x99   : > { %3464 = vmatmul.mubr.msk.bf16.gmra.mxu1 %vm958_vm2, %v3638_v28 }
  0x9a   : > { %3482 = vmatmul.mubr.msk.bf16.gmra.mxu0 %vm958_vm2, %v3639_v29  ;;  %3467 = vmatprep.mubr.msk.bf16.mxu1 %vm958_vm2, %v3640_v30 }
  0x9b   : > { %3485 = vmatprep.mubr.msk.bf16.mxu0 %vm958_vm2, %v3641_v31 }
  0xa1   : > { %3468 = vmatmul.mubr.msk.bf16.gmra.mxu1 %vm958_vm2, %v3642_v32 }
  0xa2   : > { %3486 = vmatmul.mubr.msk.bf16.gmra.mxu0 %vm958_vm2, %v3643_v33  ;;  %3471 = vmatprep.mubr.msk.bf16.mxu1 %vm958_vm2, %v3644_v34 }
  0xa3   : > { %3489 = vmatprep.mubr.msk.bf16.mxu0 %vm958_vm2, %v3645_v35 }
  0xa9   : > { %3472 = vmatmul.mubr.msk.bf16.gmra.mxu1 %vm958_vm2, %v3646_v36 }
  0xaa   : > { %3490 = vmatmul.mubr.msk.bf16.gmra.mxu0 %vm958_vm2, %v3648_v37  ;;  %3495 = vmatprep.mubr.msk.bf16.mxu1 %vm958_vm2, %v3649_v38 }
  0xab   : > { %3513 = vmatprep.mubr.msk.bf16.mxu0 %vm958_vm2, %v3650_v39 }
  0xb1   : > { %3496 = vmatmul.mubr.msk.bf16.vlgmr.msra.gmra.mxu1 %vm958_vm2, %v3651_v40 }
  0xb2   : > { %3514 = vmatmul.mubr.msk.bf16.vlgmr.msra.gmra.mxu0 %vm958_vm2, %v3652_v41  ;;  %3499 = vmatprep.mubr.msk.bf16.mxu1 %vm958_vm2, %v3653_v42 }
  0xb3   : > { %3517 = vmatprep.mubr.msk.bf16.mxu0 %vm958_vm2, %v3654_v44 }
  0xb9   : > { %3500 = vmatmul.mubr.msk.bf16.gmra.mxu1 %vm958_vm2, %v3655_v45 }
  0xba   : > { %3518 = vmatmul.mubr.msk.bf16.gmra.mxu0 %vm958_vm2, %v3656_v46  ;;  %3503 = vmatprep.mubr.msk.bf16.mxu1 %vm958_vm2, %v3657_v48 }
  0xbb   : > { %3521 = vmatprep.mubr.msk.bf16.mxu0 %vm958_vm2, %v3658_v49 }
  0xc1   : > { %3504 = vmatmul.mubr.msk.bf16.gmra.mxu1 %vm958_vm2, %v3659_v50 }
  0xc2   : > { %3522 = vmatmul.mubr.msk.bf16.gmra.mxu0 %vm958_vm2, %v3660_v53  ;;  %3507 = vmatprep.mubr.msk.bf16.mxu1 %vm958_vm2, %v3661_v55 }
  0xc3   : > { %3525 = vmatprep.mubr.msk.bf16.mxu0 %vm958_vm2, %v3662_v56 }
  0xc9   : > { %3508 = vmatmul.mubr.msk.bf16.gmra.mxu1 %vm958_vm2, %v3663_v57 }
  0xca   : > { %3526 = vmatmul.mubr.msk.bf16.gmra.mxu0 %vm958_vm2, %v3664_v58 }
  0xfe   : > { %v3371_v60 = vpop.f32.mrf.mxu0  ;;  %v3379_v61 = vpop.f32.mrf.mxu1 }
 0x100   : > { %v1021_v62 = vpop.f32.mrf.mxu0  ;;  %v1053_v54 = vpop.f32.mrf.mxu1 }
 0x102   : > { %v3372_v59 = vpop.f32.mrf.mxu0  ;;  %v3380_v63 = vpop.f32.mrf.mxu1 }
 0x104   : > { %v1056_v0 = vpop.f32.mrf.mxu1  ;;  %v1024_v1 = vpop.f32.mrf.mxu0 }
 0x106   : > { %v3383_v2 = vpop.f32.mrf.mxu1  ;;  %v3375_v3 = vpop.f32.mrf.mxu0 }
 0x108   : > { %v1069_v4 = vpop.f32.mrf.mxu1  ;;  %v1037_v5 = vpop.f32.mrf.mxu0 }
 0x10a   : > { %v3384_v6 = vpop.f32.mrf.mxu1  ;;  %v3376_v7 = vpop.f32.mrf.mxu0 }
 0x10c   : > { %v4098_v8 = vpop.f32.mrf.mxu1  ;;  %v1040_v9 = vpop.f32.mrf.mxu0 }
 0x111   : > { %v3389_v43 = vpop.f32.mrf.mxu1 }
 0x112   : > { %v1194_v10 = vadd.f32 %v3389_v43, %v3371_v60  ;;  %v3407_v52 = vpop.f32.mrf.mxu0 }
 0x113   : > { %v1185_v11 = vpop.f32.mrf.mxu1 }
 0x114   : > { %v4100_v12 = vadd.f32 %v3407_v52, %v1194_v10  ;;  %v1186_v13 = vadd.f32 %v1185_v11, %v1021_v62  ;;  %v1367_v14 = vpop.f32.mrf.mxu0 }
 0x115   : > { %v3390_v15 = vpop.f32.mrf.mxu1 }
 0x116   : > { %v4102_v16 = vadd.f32 %v1367_v14, %v1186_v13  ;;  %v1197_v17 = vadd.f32 %v3390_v15, %v3372_v59  ;;  %v3408_v18 = vpop.f32.mrf.mxu0 }
 0x117   : > { %v1188_v19 = vpop.f32.mrf.mxu1 }
 0x118   : > { %v4104_v47 = vadd.f32 %v3408_v18, %v1197_v17  ;;  %v1189_v51 = vadd.f32 %v1188_v19, %v1024_v1  ;;  %v1370_v20 = vpop.f32.mrf.mxu0 }
 0x119   : > { %v3393_v21 = vpop.f32.mrf.mxu1 }
 0x11a   : > { %v4106_v22 = vadd.f32 %v1370_v20, %v1189_v51  ;;  %v1210_v23 = vadd.f32 %v3393_v21, %v3375_v3  ;;  %v3411_v24 = vpop.f32.mrf.mxu0 }
 0x11b   : > { %v1201_v25 = vpop.f32.mrf.mxu1 }
 0x11c   : > { %v4108_v26 = vadd.f32 %v3411_v24, %v1210_v23  ;;  %v1202_v27 = vadd.f32 %v1201_v25, %v1037_v5  ;;  %v1383_v28 = vpop.f32.mrf.mxu0 }
 0x11d   : > { %v3394_v29 = vpop.f32.mrf.mxu1 }
 0x11e   : > { %v4110_v30 = vadd.f32 %v1383_v28, %v1202_v27  ;;  %v1213_v31 = vadd.f32 %v3394_v29, %v3376_v7  ;;  %v3412_v32 = vpop.f32.mrf.mxu0 }
 0x11f   : > { %v1204_v33 = vpop.f32.mrf.mxu1 }
 0x120   : > { %v4112_v34 = vadd.f32 %v3412_v32, %v1213_v31  ;;  %v1205_v35 = vadd.f32 %v1204_v33, %v1040_v9  ;;  %v1386_v36 = vpop.f32.mrf.mxu0 }
 0x121   : > { %v3397_v37 = vpop.f32.mrf.mxu1 }
 0x122   : > { %v4114_v38 = vadd.f32 %v1386_v36, %v1205_v35  ;;  %v1226_v39 = vadd.f32 %v3397_v37, %v3379_v61  ;;  %v3415_v40 = vpop.f32.mrf.mxu0 }
 0x123   : > { %v1217_v41 = vpop.f32.mrf.mxu1 }
 0x124   : > { %v4116_v42 = vadd.f32 %v3415_v40, %v1226_v39  ;;  %v1218_v44 = vadd.f32 %v1217_v41, %v1053_v54  ;;  %v1399_v45 = vpop.f32.mrf.mxu0 }
 0x125   : > { %v3398_v46 = vpop.f32.mrf.mxu1 }
 0x126   : > { %v4118_v48 = vadd.f32 %v1399_v45, %v1218_v44  ;;  %v1229_v49 = vadd.f32 %v3398_v46, %v3380_v63  ;;  %v3416_v50 = vpop.f32.mrf.mxu0 }
 0x127   : > { %v1220_v53 = vpop.f32.mrf.mxu1 }
 0x128   : > { %v4120_v55 = vadd.f32 %v3416_v50, %v1229_v49  ;;  %v1221_v56 = vadd.f32 %v1220_v53, %v1056_v0  ;;  %v1402_v57 = vpop.f32.mrf.mxu0 }
 0x129   : > { %v3401_v58 = vpop.f32.mrf.mxu1 }
 0x12a   : > { %v4122_v60 = vadd.f32 %v1402_v57, %v1221_v56  ;;  %v1242_v61 = vadd.f32 %v3401_v58, %v3383_v2  ;;  %v3419_v62 = vpop.f32.mrf.mxu0 }
 0x12b   : > { %v1233_v59 = vpop.f32.mrf.mxu1 }
 0x12c   : > { %v4124_v1 = vadd.f32 %v3419_v62, %v1242_v61  ;;  %v1234_v54 = vadd.f32 %v1233_v59, %v1069_v4  ;;  %v1415_v3 = vpop.f32.mrf.mxu0 }
 0x12d   : > { %v3402_v5 = vpop.f32.mrf.mxu1 }
 0x12e   : > { %v4126_v7 = vadd.f32 %v1415_v3, %v1234_v54  ;;  %v1245_v63 = vadd.f32 %v3402_v5, %v3384_v6  ;;  %v3420_v9 = vpop.f32.mrf.mxu0 }
 0x12f   : > { %v1236_v43 = vpop.f32.mrf.mxu1 }
 0x130   : > { %v4128_v10 = vadd.f32 %v3420_v9, %v1245_v63  ;;  %v1237_v0 = vadd.f32 %v1236_v43, %v4098_v8  ;;  %v1418_v52 = vpop.f32.mrf.mxu0 }
 0x131   : > { %v3425_v11 = vpop.f32.mrf.mxu1 }
 0x132   : > { %v4131_v13 = vadd.f32 %v1418_v52, %v1237_v0  ;;  %v3443_v2 = vpop.f32.mrf.mxu0 }
 0x133   : > { %v1566_v14 = vpop.f32.mrf.mxu1 }
 0x134   : > { %v1764_v15 = vpop.f32.mrf.mxu0 }
 0x135   : > { %v3426_v17 = vpop.f32.mrf.mxu1 }
 0x136   : > { %v3444_v4 = vpop.f32.mrf.mxu0 }
 0x137   : > { %v1569_v18 = vpop.f32.mrf.mxu1 }
 0x138   : > { %v4133_v19 = vpop.f32.mrf.mxu0 }
 0x139   : > { %v3429_v51 = vpop.f32.mrf.mxu1 }
 0x13a   : > { %v4135_v6 = vpop.f32.mrf.mxu0 }
 0x13b   : > { %v1582_v20 = vpop.f32.mrf.mxu1 }
 0x13c   : > { %v4137_v21 = vpop.f32.mrf.mxu0 }
 0x13d   : > { %v3430_v23 = vpop.f32.mrf.mxu1 }
 0x13e   : > { %v4139_v8 = vpop.f32.mrf.mxu0 }
 0x13f   : > { %v1585_v24 = vpop.f32.mrf.mxu1 }
 0x140   : > { %v4141_v25 = vpop.f32.mrf.mxu0 }
 0x141   : > { %v3433_v27 = vpop.f32.mrf.mxu1 }
 0x142   : > { %v4143_v28 = vpop.f32.mrf.mxu0 }
 0x143   : > { %v1598_v29 = vpop.f32.mrf.mxu1 }
 0x144   : > { %v4145_v31 = vpop.f32.mrf.mxu0 }
 0x145   : > { %v3434_v32 = vpop.f32.mrf.mxu1 }
 0x146   : > { %v4147_v33 = vpop.f32.mrf.mxu0 }
 0x147   : > { %v1601_v35 = vpop.f32.mrf.mxu1 }
 0x148   : > { %v4149_v36 = vpop.f32.mrf.mxu0 }
 0x149   : > { %v3437_v37 = vpop.f32.mrf.mxu1 }
 0x14a   : > { %v4151_v39 = vpop.f32.mrf.mxu0 }
 0x14b   : > { %v1614_v40 = vpop.f32.mrf.mxu1 }
 0x14c   : > { %v4153_v41 = vpop.f32.mrf.mxu0 }
 0x14d   : > { %v3438_v44 = vpop.f32.mrf.mxu1 }
 0x14e   : > { %v4155_v45 = vpop.f32.mrf.mxu0 }
 0x14f   : > { %4367 = vst [vmem:[#allocation5_spill] sm:$0xff] %v4155_v45  ;;  %v1617_v46 = vpop.f32.mrf.mxu1 }
 0x150   : > { %v4157_v49 = vpop.f32.mrf.mxu0 }
 0x151   : > { %4368 = vst [vmem:[#allocation6_spill] sm:$0xff] %v4157_v49  ;;  %v3461_v50 = vpop.f32.mrf.mxu1 }
 0x152   : > { %v3479_v53 = vpop.f32.mrf.mxu0 }
 0x153   : > { %v1963_v56 = vpop.f32.mrf.mxu1 }
 0x154   : > { %v4159_v57 = vpop.f32.mrf.mxu0 }
 0x155   : > { %4369 = vst [vmem:[#allocation7_spill] sm:$0xff] %v4159_v57  ;;  %v3462_v58 = vpop.f32.mrf.mxu1 }
 0x156   : > { %v4161_v61 = vpop.f32.mrf.mxu0 }
 0x157   : > { %4370 = vst [vmem:[#allocation8_spill] sm:$0xff] %v4161_v61  ;;  %v1966_v62 = vpop.f32.mrf.mxu1 }
 0x158   : > { %v4163_v59 = vpop.f32.mrf.mxu0 }
 0x159   : > { %4371 = vst [vmem:[#allocation9_spill] sm:$0xff] %v4163_v59  ;;  %v3465_v54 = vpop.f32.mrf.mxu1 }
 0x15a   : > { %v4165_v3 = vpop.f32.mrf.mxu0 }
 0x15b   : > { %4372 = vst [vmem:[#allocation10_spill] sm:$0xff] %v4165_v3  ;;  %v4167_v5 = vpop.f32.mrf.mxu1 }
 0x15c   : > { %4373 = vst [vmem:[#allocation11_spill] sm:$0xff] %v4167_v5  ;;  %v4169_v63 = vpop.f32.mrf.mxu0 }
 0x15d   : > { %4374 = vst [vmem:[#allocation12_spill] sm:$0xff] %v4169_v63  ;;  %v4171_v9 = vpop.f32.mrf.mxu1  ;;  %v1631_v63 = vadd.f32 %v3425_v11, %v4100_v12  ;;  %v1636_v11 = vadd.f32 %v3430_v23, %v4112_v34  ;;  %v1643_v34 = vadd.f32 %v3437_v37, %v4124_v1  ;;  %v4386_v37 = vld [vmem:[#allocation6_spill] sm:$0xff] }
 0x15e   : > { %4375 = vst [vmem:[#allocation13_spill] sm:$0xff] %v4171_v9  ;;  %v4173_v43 = vpop.f32.mrf.mxu0  ;;  %v1629_v9 = vadd.f32 %v1566_v14, %v4102_v16  ;;  %v1639_v14 = vadd.f32 %v3433_v27, %v4116_v42 }
 0x15f   : > { %4376 = vst [vmem:[#allocation14_spill] sm:$0xff] %v4173_v43  ;;  %v4175_v0 = vpop.f32.mrf.mxu1  ;;  %v1632_v43 = vadd.f32 %v3426_v17, %v4104_v47  ;;  %v1634_v47 = vadd.f32 %v1585_v24, %v4114_v38  ;;  %v1641_v38 = vadd.f32 %v1614_v40, %v4126_v7  ;;  %v1841_v27 = vadd.f32 %v4151_v39, %v1643_v34 }
 0x160   : > { %4377 = vst [vmem:[#allocation15_spill] sm:$0xff] %v4175_v0  ;;  %v4177_v52 = vpop.f32.mrf.mxu0  ;;  %v1827_v45 = vadd.f32 %v1764_v15, %v1629_v9 }
 0x161   : > { %4378 = vst [vmem:[#allocation16_spill] sm:$0xff] %v4177_v52  ;;  %v4179_v57 = vpop.f32.mrf.mxu1  ;;  %v1830_v16 = vadd.f32 %v3444_v4, %v1632_v43  ;;  %v4394_v43 = vld [vmem:[#allocation9_spill] sm:$0xff] }
 0x162   : > { %4379 = vst [vmem:[#allocation17_spill] sm:$0xff] %v4179_v57  ;;  %v4181_v61 = vpop.f32.mrf.mxu0 }
 0x163   : > { %4380 = vst [vmem:[#allocation18_spill] sm:$0xff] %v4181_v61  ;;  %v4183_v59 = vpop.f32.mrf.mxu1  ;;  %v1630_v61 = vadd.f32 %v1569_v18, %v4106_v22  ;;  %v1640_v22 = vadd.f32 %v3434_v32, %v4120_v55  ;;  %v1642_v55 = vadd.f32 %v1617_v46, %v4131_v13  ;;  %v2029_v1 = vadd.f32 %v3462_v58, %v1830_v16  ;;  %v4388_v46 = vld [vmem:[#allocation8_spill] sm:$0xff]  ;;  %v4395_v16 = vld [vmem:[#allocation10_spill] sm:$0xff] }
 0x164   : > { %4381 = vst [vmem:[#allocation19_spill] sm:$0xff] %v4183_v59  ;;  %v4185_v49 = vpop.f32.mrf.mxu0  ;;  %v1635_v59 = vadd.f32 %v3429_v51, %v4108_v26  ;;  %v1638_v26 = vadd.f32 %v1601_v35, %v4122_v60  ;;  %v2026_v60 = vadd.f32 %v1963_v56, %v1827_v45 }
 0x165   : > { %4382 = vst [vmem:[#allocation20_spill] sm:$0xff] %v4185_v49  ;;  %v4187_v3 = vpop.f32.mrf.mxu1  ;;  %v1829_v49 = vadd.f32 %v3443_v2, %v1631_v63  ;;  %v1840_v40 = vadd.f32 %v4386_v37, %v1642_v55 }
 0x166   : > { %4383 = vst [vmem:[#allocation21_spill] sm:$0xff] %v4187_v3  ;;  %v4191_v5 = vpop.f32.mrf.mxu0  ;;  %v1633_v3 = vadd.f32 %v1582_v20, %v4110_v30  ;;  %v1828_v30 = vadd.f32 %v4133_v19, %v1630_v61  ;;  %v1833_v4 = vadd.f32 %v4135_v6, %v1635_v59  ;;  %v1834_v20 = vadd.f32 %v4139_v8, %v1636_v11  ;;  %v4398_v55 = vld [vmem:[#allocation14_spill] sm:$0xff] }
 0x167   : > { %v4194_v0 = vpop.f32.mrf.mxu1  ;;  %v2028_v2 = vadd.f32 %v3461_v50, %v1829_v49  ;;  %v1832_v19 = vadd.f32 %v4141_v25, %v1634_v47  ;;  %v1837_v6 = vadd.f32 %v4143_v28, %v1639_v14  ;;  %v1839_v8 = vadd.f32 %v4153_v41, %v1641_v38  ;;  %v4385_v28 = vld [vmem:[#allocation5_spill] sm:$0xff]  ;;  %v4389_v49 = vld [vmem:[#allocation11_spill] sm:$0xff] }
 0x168   : > { %v4196_v52 = vpop.f32.mrf.mxu0  ;;  %v1831_v42 = vadd.f32 %v4137_v21, %v1633_v3  ;;  %v1838_v21 = vadd.f32 %v4147_v33, %v1640_v22  ;;  %v2032_v25 = vadd.f32 %v3465_v54, %v1833_v4  ;;  %v4391_v39 = vld [vmem:[#allocation15_spill] sm:$0xff] }
 0x169   : > { %4384 = vst [vmem:[#allocation22_spill] sm:$0xff] %v4196_v52  ;;  %v3473_v57 = vpop.f32.mrf.mxu1  ;;  %v1637_v52 = vadd.f32 %v1598_v29, %v4118_v48  ;;  %v1644_v48 = vadd.f32 %v3438_v44, %v4128_v10  ;;  %v1836_v10 = vadd.f32 %v4149_v36, %v1638_v26  ;;  %v2227_v24 = vadd.f32 %v3479_v53, %v2028_v2  ;;  %v4387_v44 = vld [vmem:[#allocation7_spill] sm:$0xff]  ;;  %v4390_v53 = vld [vmem:[#allocation13_spill] sm:$0xff] }
 0x16a   : > { %v4201_v12 = vpop.f32.mrf.mxu0  ;;  %v2027_v29 = vadd.f32 %v1966_v62, %v1828_v30  ;;  %v2228_v36 = vadd.f32 %v4388_v46, %v2029_v1  ;;  %v2030_v50 = vadd.f32 %v4389_v49, %v1831_v42  ;;  %v2033_v56 = vadd.f32 %v4390_v53, %v1834_v20  ;;  %v4392_v61 = vld [vmem:[#allocation17_spill] sm:$0xff]  ;;  %v4397_v42 = vld [vmem:[#allocation12_spill] sm:$0xff] }
 0x16b   : > { %v2011_v17 = vpop.f32.mrf.mxu1  ;;  %v1835_v7 = vadd.f32 %v4145_v31, %v1637_v52  ;;  %v1842_v35 = vadd.f32 %v4385_v28, %v1644_v48  ;;  %v2225_v31 = vadd.f32 %v4387_v44, %v2026_v60  ;;  %v2031_v58 = vadd.f32 %v4391_v39, %v1832_v19  ;;  %v4393_v59 = vld [vmem:[#allocation19_spill] sm:$0xff]  ;;  %v4399_v1 = vld [vmem:[#allocation16_spill] sm:$0xff] }
 0x16c   : > { %v4209_v15 = vpop.f32.mrf.mxu0  ;;  %v2036_v62 = vadd.f32 %v4392_v61, %v1837_v6  ;;  %v2226_v52 = vadd.f32 %v4394_v43, %v2027_v29  ;;  %v2231_v11 = vadd.f32 %v4395_v16, %v2032_v25  ;;  %v2035_v22 = vadd.f32 %v4194_v0, %v1836_v10  ;;  %v4401_v29 = vld [vmem:[#allocation20_spill] sm:$0xff] }
 0x16d   : > { %v3474_v18 = vpop.f32.mrf.mxu1  ;;  %v2034_v54 = vadd.f32 %v4393_v59, %v1835_v7  ;;  %v4396_v47 = vld [vmem:[#allocation21_spill] sm:$0xff]  ;;  %v2040_v2 = vadd.f32 %v3473_v57, %v1841_v27  ;;  %v2038_v30 = vadd.f32 %v2011_v17, %v1839_v8  ;;  %v2229_v48 = vadd.f32 %v4397_v42, %v2030_v50 }
 0x16e   : > { %v4218_v51 = vpop.f32.mrf.mxu0  ;;  %v2037_v14 = vadd.f32 %v4396_v47, %v1838_v21  ;;  %v2232_v60 = vadd.f32 %v4398_v55, %v2033_v56  ;;  %v2041_v20 = vadd.f32 %v3474_v18, %v1842_v35  ;;  %v2230_v7 = vadd.f32 %v4399_v1, %v2031_v58  ;;  %v4400_v21 = vld [vmem:[#allocation18_spill] sm:$0xff] }
 0x16f   : > { %v4223_v23 = vpop.f32.mrf.mxu1  ;;  %v4250_v0 = vadd.f32 %v4401_v29, %v2034_v54  ;;  %v4261_v28 = vadd.f32 %v4201_v12, %v2040_v2  ;;  %v4264_v35 = vadd.f32 %v4209_v15, %v2038_v30 }
 0x170   : > { %v4228_v13 = vpop.f32.mrf.mxu0  ;;  %v4255_v10 = vadd.f32 %v4191_v5, %v2037_v14  ;;  %v4402_v27 = vld [vmem:[#allocation22_spill] sm:$0xff]  ;;  %v4269_v5 = vadd.f32 %v4218_v51, %v2041_v20  ;;  %v2039_v49 = vadd.f32 %v4223_v23, %v1840_v40 }
 0x171   : > { %v3497_v32 = vpop.f32.mrf.mxu1  ;;  %v4258_v8 = vadd.f32 %v4402_v27, %v2035_v22 }
 0x172   : > { %v2426_v45 = vadd.f32 %v3497_v32, %v2227_v24  ;;  %v3515_v33 = vpop.f32.mrf.mxu0  ;;  %v2235_v24 = vadd.f32 %v4400_v21, %v2036_v62 }
 0x173   : > { %v2361_v41 = vpop.f32.mrf.mxu1 }
 0x174   : > { %v2625_v3 = vadd.f32 %v3515_v33, %v2426_v45  ;;  %v2424_v63 = vadd.f32 %v2361_v41, %v2225_v31  ;;  %v2560_v9 = vpop.f32.mrf.mxu0 }
 0x175   : > { %v3498_v26 = vpop.f32.mrf.mxu1 }
 0x176   : > { %v3272_v4 = vpack.c.bf16 %v2625_v3, %v2625_v3  ;;  %v2623_v34 = vadd.f32 %v2560_v9, %v2424_v63  ;;  %v3516_v38 = vpop.f32.mrf.mxu0  ;;  %v2427_v19 = vadd.f32 %v3498_v26, %v2228_v36  ;;  %v2681_v37 = vmul.f32 %v2625_v3, %v2625_v3 }
 0x177   : > { %v2364_v6 = vpop.f32.mrf.mxu1  ;;  %v2643_v61 = vsel %vm2639_vm10, %v2625_v3, 0.0 }
 0x178   : > { %2800 = vst.msk [vmem:[%s3796_s16 + $0x8] sm:$0xf] %vm2797_vm9, %v3272_v4  ;;  %v3270_v57 = vpack.c.bf16 %v2623_v34, %v2623_v34  ;;  %v2563_v17 = vpop.f32.mrf.mxu0  ;;  %v2626_v18 = vadd.f32 %v3516_v38, %v2427_v19  ;;  %v2425_v25 = vadd.f32 %v2364_v6, %v2226_v52  ;;  %v2679_v45 = vmul.f32 %v2623_v34, %v2623_v34 }
 0x179   : > { %v3501_v32 = vpop.f32.mrf.mxu1  ;;  %v2640_v12 = vsel %vm2639_vm10, %v2623_v34, 0.0  ;;  %v2698_v62 = vsel %vm2639_vm10, %v2681_v37, 0.0 }
 0x17a   : > { %2798 = vst.msk [vmem:[%s3796_s16] sm:$0xf] %vm2797_vm9, %v3270_v57  ;;  %v2430_v44 = vadd.f32 %v3501_v32, %v2231_v11  ;;  %v3519_v31 = vpop.f32.mrf.mxu0  ;;  %v3273_v33 = vpack.c.bf16 %v2626_v18, %v2626_v18  ;;  %v2624_v46 = vadd.f32 %v2563_v17, %v2425_v25  ;;  %v2682_v56 = vmul.f32 %v2626_v18, %v2626_v18 }
 0x17b   : > { %v2377_v36 = vpop.f32.mrf.mxu1  ;;  %v2695_v54 = vsel %vm2639_vm10, %v2679_v45, 0.0  ;;  %v2645_v16 = vsel %vm2639_vm10, %v2626_v18, 0.0 }
 0x17c   : > { %v2629_v50 = vadd.f32 %v3519_v31, %v2430_v44  ;;  %v2428_v15 = vadd.f32 %v2377_v36, %v2229_v48  ;;  %v2576_v53 = vpop.f32.mrf.mxu0  ;;  %2801 = vst.msk [vmem:[%s3796_s16 + $0xc] sm:$0xf] %vm2797_vm9, %v3273_v33  ;;  %v2641_v39 = vsel %vm2639_vm10, %v2624_v46, 0.0  ;;  %v2680_v58 = vmul.f32 %v2624_v46, %v2624_v46 }
 0x17d   : > { %v3271_v51 = vpack.c.bf16 %v2624_v46, %v2624_v46  ;;  %v3502_v41 = vpop.f32.mrf.mxu1  ;;  %v2642_v23 = vadd.f32 %v2641_v39, %v2640_v12  ;;  %v2700_v22 = vsel %vm2639_vm10, %v2682_v56, 0.0  ;;  %v2238_v46 = vadd.f32 %v4228_v13, %v2039_v49 }
 0x17e   : > { %v3276_v40 = vpack.c.bf16 %v2629_v50, %v2629_v50  ;;  %v3520_v59 = vpop.f32.mrf.mxu0  ;;  %v2696_v63 = vsel %vm2639_vm10, %v2680_v58, 0.0  ;;  %v2627_v9 = vadd.f32 %v2576_v53, %v2428_v15  ;;  %v2431_v43 = vadd.f32 %v3502_v41, %v2232_v60 }
 0x17f   : > { %2799 = vst.msk [vmem:[%s3796_s16 + $0x4] sm:$0xf] %vm2797_vm9, %v3271_v51  ;;  %v2380_v52 = vpop.f32.mrf.mxu1  ;;  %v2644_v11 = vadd.f32 %v2643_v61, %v2642_v23  ;;  %v2697_v47 = vadd.f32 %v2696_v63, %v2695_v54  ;;  %v2685_v60 = vmul.f32 %v2629_v50, %v2629_v50  ;;  %v2651_v36 = vsel %vm2639_vm10, %v2629_v50, 0.0 }
 0x180   : > { %2804 = vst.msk [vmem:[%s3796_s16 + $0x18] sm:$0xf] %vm2797_vm9, %v3276_v40  ;;  %v2429_v3 = vadd.f32 %v2380_v52, %v2230_v7  ;;  %v2579_v14 = vpop.f32.mrf.mxu0  ;;  %v2683_v26 = vmul.f32 %v2627_v9, %v2627_v9  ;;  %v3274_v2 = vpack.c.bf16 %v2627_v9, %v2627_v9  ;;  %v2630_v30 = vadd.f32 %v3520_v59, %v2431_v43 }
 0x181   : > { %v3505_v4 = vpop.f32.mrf.mxu1  ;;  %v2699_v34 = vadd.f32 %v2698_v62, %v2697_v47  ;;  %v2646_v38 = vadd.f32 %v2645_v16, %v2644_v11  ;;  %v2647_v20 = vsel %vm2639_vm10, %v2627_v9, 0.0  ;;  %v2706_v41 = vsel %vm2639_vm10, %v2685_v60, 0.0 }
 0x182   : > { %v2628_v42 = vadd.f32 %v2579_v14, %v2429_v3  ;;  %v2434_v48 = vadd.f32 %v3505_v4, %v2235_v24  ;;  %v3523_v55 = vpop.f32.mrf.mxu0  ;;  %v2702_v19 = vsel %vm2639_vm10, %v2683_v26, 0.0  ;;  %2802 = vst.msk [vmem:[%s3796_s16 + $0x10] sm:$0xf] %vm2797_vm9, %v3274_v2  ;;  %v3277_v6 = vpack.c.bf16 %v2630_v30, %v2630_v30 }
 0x183   : > { %v2393_v1 = vpop.f32.mrf.mxu1  ;;  %v2648_v7 = vadd.f32 %v2647_v20, %v2646_v38  ;;  %v2701_v21 = vadd.f32 %v2700_v22, %v2699_v34  ;;  %v2686_v27 = vmul.f32 %v2630_v30, %v2630_v30 }
 0x184   : > { %v2649_v29 = vsel %vm2639_vm10, %v2628_v42, 0.0  ;;  %v2684_v57 = vmul.f32 %v2628_v42, %v2628_v42  ;;  %v2592_v17 = vpop.f32.mrf.mxu0  ;;  %2805 = vst.msk [vmem:[%s3796_s16 + $0x1c] sm:$0xf] %vm2797_vm9, %v3277_v6  ;;  %v3275_v24 = vpack.c.bf16 %v2628_v42, %v2628_v42  ;;  %v2633_v18 = vadd.f32 %v3523_v55, %v2434_v48 }
 0x185   : > { %v2432_v25 = vadd.f32 %v2393_v1, %v4250_v0  ;;  %v3506_v32 = vpop.f32.mrf.mxu1  ;;  %v2703_v37 = vadd.f32 %v2702_v19, %v2701_v21  ;;  %v2650_v44 = vadd.f32 %v2649_v29, %v2648_v7  ;;  %v2708_v61 = vsel %vm2639_vm10, %v2686_v27, 0.0 }
 0x186   : > { %v2704_v31 = vsel %vm2639_vm10, %v2684_v57, 0.0  ;;  %v2435_v45 = vadd.f32 %v3506_v32, %v4255_v10  ;;  %v3524_v33 = vpop.f32.mrf.mxu0  ;;  %2803 = vst.msk [vmem:[%s3796_s16 + $0x14] sm:$0xf] %vm2797_vm9, %v3275_v24  ;;  %v3280_v12 = vpack.c.bf16 %v2633_v18, %v2633_v18  ;;  %v2653_v10 = vsel %vm2639_vm10, %v2630_v30, 0.0 }
 0x187   : > { %v2631_v15 = vadd.f32 %v2592_v17, %v2432_v25  ;;  %v2396_v53 = vpop.f32.mrf.mxu1  ;;  %v2652_v56 = vadd.f32 %v2651_v36, %v2650_v44  ;;  %v2705_v0 = vadd.f32 %v2704_v31, %v2703_v37  ;;  %v2689_v23 = vmul.f32 %v2633_v18, %v2633_v18 }
 0x188   : > { %v2634_v39 = vadd.f32 %v3524_v33, %v2435_v45  ;;  %v2433_v58 = vadd.f32 %v2396_v53, %v4258_v8  ;;  %v2595_v51 = vpop.f32.mrf.mxu0  ;;  %2808 = vst.msk [vmem:[%s3796_s16 + $0x28] sm:$0xf] %vm2797_vm9, %v3280_v12  ;;  %v2659_v48 = vsel %vm2639_vm10, %v2633_v18, 0.0 }
 0x189   : > { %v2687_v13 = vmul.f32 %v2631_v15, %v2631_v15  ;;  %v3278_v49 = vpack.c.bf16 %v2631_v15, %v2631_v15  ;;  %v3509_v50 = vpop.f32.mrf.mxu1  ;;  %v2707_v62 = vadd.f32 %v2706_v41, %v2705_v0  ;;  %v2654_v40 = vadd.f32 %v2653_v10, %v2652_v56 }
 0x18a   : > { %v3527_v59 = vpop.f32.mrf.mxu0  ;;  %v2655_v54 = vsel %vm2639_vm10, %v2631_v15, 0.0  ;;  %v3281_v8 = vpack.c.bf16 %v2634_v39, %v2634_v39  ;;  %v2632_v63 = vadd.f32 %v2595_v51, %v2433_v58  ;;  %v2438_v9 = vadd.f32 %v3509_v50, %v4261_v28 }
 0x18b   : > { %2806 = vst.msk [vmem:[%s3796_s16 + $0x20] sm:$0xf] %vm2797_vm9, %v3278_v49  ;;  %v2409_v43 = vpop.f32.mrf.mxu1  ;;  %v2656_v52 = vadd.f32 %v2655_v54, %v2654_v40  ;;  %v2709_v16 = vadd.f32 %v2708_v61, %v2707_v62  ;;  %v2710_v11 = vsel %vm2639_vm10, %v2687_v13, 0.0  ;;  %v2714_v19 = vsel %vm2639_vm10, %v2689_v23, 0.0 }
 0x18c   : > { %v2436_v47 = vadd.f32 %v2409_v43, %v4264_v35  ;;  %v2608_v3 = vpop.f32.mrf.mxu0  ;;  %2809 = vst.msk [vmem:[%s3796_s16 + $0x2c] sm:$0xf] %vm2797_vm9, %v3281_v8  ;;  %v2657_v14 = vsel %vm2639_vm10, %v2632_v63, 0.0  ;;  %v2688_v22 = vmul.f32 %v2632_v63, %v2632_v63  ;;  %v3279_v26 = vpack.c.bf16 %v2632_v63, %v2632_v63 }
 0x18d   : > { %v2637_v2 = vadd.f32 %v3527_v59, %v2438_v9  ;;  %v3510_v30 = vpop.f32.mrf.mxu1  ;;  %v2711_v4 = vadd.f32 %v2710_v11, %v2709_v16  ;;  %v2658_v28 = vadd.f32 %v2657_v14, %v2656_v52  ;;  %v2690_v35 = vmul.f32 %v2634_v39, %v2634_v39 }
 0x18e   : > { %v2635_v34 = vadd.f32 %v2608_v3, %v2436_v47  ;;  %v2439_v38 = vadd.f32 %v3510_v30, %v4269_v5  ;;  %v3528_v42 = vpop.f32.mrf.mxu0  ;;  %v2712_v55 = vsel %vm2639_vm10, %v2688_v22, 0.0  ;;  %2807 = vst.msk [vmem:[%s3796_s16 + $0x24] sm:$0xf] %vm2797_vm9, %v3279_v26  ;;  %v2661_v6 = vsel %vm2639_vm10, %v2634_v39, 0.0 }
 0x18f   : > { %v3284_v60 = vpack.c.bf16 %v2637_v2, %v2637_v2  ;;  %v2412_v20 = vpop.f32.mrf.mxu1  ;;  %v2660_v1 = vadd.f32 %v2659_v48, %v2658_v28  ;;  %v2713_v7 = vadd.f32 %v2712_v55, %v2711_v4  ;;  %v2716_v18 = vsel %vm2639_vm10, %v2690_v35, 0.0 }
 0x190   : > { %v2691_v5 = vmul.f32 %v2635_v34, %v2635_v34  ;;  %v3282_v21 = vpack.c.bf16 %v2635_v34, %v2635_v34  ;;  %v2638_v29 = vadd.f32 %v3528_v42, %v2439_v38  ;;  %v2437_v57 = vadd.f32 %v2412_v20, %v2238_v46  ;;  %v2611_v24 = vpop.f32.mrf.mxu0 }
 0x191   : > { %2812 = vst.msk [vmem:[%s3796_s16 + $0x38] sm:$0xf] %vm2797_vm9, %v3284_v60  ;;  %v2715_v17 = vadd.f32 %v2714_v19, %v2713_v7  ;;  %v2662_v27 = vadd.f32 %v2661_v6, %v2660_v1  ;;  %v2663_v25 = vsel %vm2639_vm10, %v2635_v34, 0.0  ;;  %v2693_v44 = vmul.f32 %v2637_v2, %v2637_v2 }
 0x192   : > { %2810 = vst.msk [vmem:[%s3796_s16 + $0x30] sm:$0xf] %vm2797_vm9, %v3282_v21  ;;  %v3285_v32 = vpack.c.bf16 %v2638_v29, %v2638_v29  ;;  %v2636_v37 = vadd.f32 %v2611_v24, %v2437_v57  ;;  %v2718_v33 = vsel %vm2639_vm10, %v2691_v5, 0.0  ;;  %v2667_v56 = vsel %vm2639_vm10, %v2637_v2, 0.0 }
 0x193   : > { %v2664_v31 = vadd.f32 %v2663_v25, %v2662_v27  ;;  %v2717_v45 = vadd.f32 %v2716_v18, %v2715_v17  ;;  %v2694_v0 = vmul.f32 %v2638_v29, %v2638_v29  ;;  %v2722_v41 = vsel %vm2639_vm10, %v2693_v44, 0.0 }
 0x194   : > { %2813 = vst.msk [vmem:[%s3796_s16 + $0x3c] sm:$0xf] %vm2797_vm9, %v3285_v32  ;;  %v2665_v46 = vsel %vm2639_vm10, %v2636_v37, 0.0  ;;  %v2692_v36 = vmul.f32 %v2636_v37, %v2636_v37  ;;  %v3283_v12 = vpack.c.bf16 %v2636_v37, %v2636_v37  ;;  %v2669_v10 = vsel %vm2639_vm10, %v2638_v29, 0.0 }
 0x195   : > { %v2719_v15 = vadd.f32 %v2718_v33, %v2717_v45  ;;  %v2666_v53 = vadd.f32 %v2665_v46, %v2664_v31  ;;  %v2724_v50 = vsel %vm2639_vm10, %v2694_v0, 0.0 }
 0x196   : > { %v2720_v39 = vsel %vm2639_vm10, %v2692_v36, 0.0  ;;  %2811 = vst.msk [vmem:[%s3796_s16 + $0x34] sm:$0xf] %vm2797_vm9, %v3283_v12 }
 0x197   : > { %v2668_v58 = vadd.f32 %v2667_v56, %v2666_v53  ;;  %v2721_v51 = vadd.f32 %v2720_v39, %v2719_v15 }
 0x199   : > { %v2670_v13 = vadd.f32 %v2669_v10, %v2668_v58  ;;  %v2723_v49 = vadd.f32 %v2722_v41, %v2721_v51 }
 0x19b   : > { %v2671_v61 = vrot.slane %v2670_v13, 4  ;;  %v2725_v62 = vadd.f32 %v2724_v50, %v2723_v49 }
 0x19d   : > { %v2672_v23 = vadd.f32 %v2671_v61, %v2670_v13  ;;  %v2726_v40 = vrot.slane %v2725_v62, 4 }
 0x19f   : > { %v2673_v59 = vrot.slane %v2672_v23, 2  ;;  %v2727_v54 = vadd.f32 %v2726_v40, %v2725_v62 }
 0x1a1   : > { %v2674_v8 = vadd.f32 %v2673_v59, %v2672_v23  ;;  %v2728_v63 = vrot.slane %v2727_v54, 2 }
 0x1a3   : > { %v2675_v9 = vrot.slane %v2674_v8, 1  ;;  %v2729_v43 = vadd.f32 %v2728_v63, %v2727_v54 }
 0x1a5   : > { %v2676_v52 = vadd.f32 %v2675_v9, %v2674_v8  ;;  %v2730_v16 = vrot.slane %v2729_v43, 1 }
 0x1a7   : > { %2678 = vst.msk [vmem:[%s3823_s30] sm:$0x1] %vm2677_vm11, %v2676_v52  ;;  %v2731_v11 = vadd.f32 %v2730_v16, %v2729_v43 }
 0x1a9   : > { %2732 = vst.msk [vmem:[%s3823_s30 + $0x1] sm:$0x1] %vm2677_vm11, %v2731_v11 }
 0x1aa PF: > { %s17_s25 = sadd.s32 1, %s3703_s25   ;;  %s4403_s21 = smov %s3695_s23 }
 0x1ab   : > { %p14_p13 = scmp.ge.s32.totalorder %s17_s25, 6   ;;  %s4404_s22 = smov %s3699_s24 }
 0x1ac   : > { %s4405_s23 = smov %s4408_s3  ;;  %s4406_s24 = smov %s4412_s26 }
 0x1ad   :  { %16 = sbr.rel (!%p14_p13) target bundleno = 3 (0x3), region = 111 }

// kernel: conv_block.4
= control target key start
LH: loop header
LB: loop body
LE: loop exit
PB: predicated region body
PF: predicated region fallthrough
CT: control target
= control target key end

     0   :  { %s4063_s21 = smov 0   ;;  %s4065_s22 = smov 0   ;;  %s4734_s0 = inlined_call_operand.vmem [shape: bf16[2,16,16,8], index: 0, kind: input, shape index: {}, may-alias: {0,1,2}]   ;;  %s4735_s1 = inlined_call_operand.vmem [shape: bf16[2,16,16,8], index: 1, kind: input, shape index: {}, may-alias: {0,1,2}]   ;;  %s4736_s2 = inlined_call_operand.vmem [shape: bf16[2,16,16,8], index: 2, kind: input, shape index: {}, may-alias: {0,1,2}]   ;;  %s4737_s3 = inlined_call_operand.vmem [shape: f32[2,8], index: 3, kind: input, shape index: {}]   ;;  %s4738_s4 = inlined_call_operand.vmem [shape: bf16[9,8,8], index: 4, kind: input, shape index: {}]   ;;  %s4739_s5 = inlined_call_operand.vmem [shape: bf16[2,16,16,8], index: 5, kind: output, shape index: {0}]   ;;  %s4740_s6 = inlined_call_operand.vmem [shape: f32[2,2,2,8], index: 6, kind: output, shape index: {1}]  }
   0x1   :  { %s4067_s23 = smov 0   ;;  %s4069_s24 = smov 0  }
   0x2   :  { %s4071_s25 = smov 0  }
   0x3 LB: > { %s26_s26 = sadd.s32 1, %s4016_s23  ;;  %s29_s27 = sadd.s32 1, %s4020_s24  ;;  %s4024_s25 = sphi %s4071_s25, %s17_s25   ;;  %s4020_s24 = sphi %s4069_s24, %s4785_s24   ;;  %s4016_s23 = sphi %s4067_s23, %s4784_s23   ;;  %s4012_s22 = sphi %s4065_s22, %s4783_s22   ;;  %s4008_s21 = sphi %s4063_s21, %s4782_s21  }
   0x4   : > { %p27_p0 = scmp.ge.s32.totalorder %s26_s26, 2  ;;  %p3240_p1 = scmp.ge.s32.totalorder %s4024_s25, 1 }
   0x5   : > { %p303_p2 = scmp.lt.s32.totalorder %s4024_s25, 5 }
   0x6   : > { %s4787_s26 = smov (%p27_p0, %s26_s26), 0  ;;  %s4789_s27 = smov (!%p27_p0, %s29_s27), %s4020_s24 }
   0x7   : > { %p304_p3 = pnand %p3240_p1, %p303_p2  ;;  %p31_p4 = scmp.ge.s32.totalorder %s4789_s27, 2 }
   0x9   : > { %s4791_s27 = smov (%p31_p4, %s4789_s27), 0  ;;  %307 = sbr.rel (%p304_p3) target bundleno = 443 (0x1bb), region = 40 }
   0xe   : > { %s4096_s28 = sshll.u32 %s4008_s21, 3  ;;  %p378_p5 = scmp.lt.s32.totalorder %s4012_s22, 1  ;;  %v4122_v0 = vld [vmem:[%s4737_s3] ss:$0 sm:$0xff]  ;;  %vm629_vm0 = vcmask 60416  }
   0xf   : > { %p380_p6 = scmp.lt.s32.totalorder %s4096_s28, 15  ;;  %p435_p7 = scmp.lt.s32.totalorder %s4008_s21, 1  ;;  %v4137_v9 = vld [vmem:[%s4737_s3 + $0x1] ss:$0 sm:$0xff] }
  0x10   : > { %s4793_s22 = smov (!%p378_p5, %s4012_s22), 1  ;;  %s4104_s9 = sadd.s32 4294967295, %s4096_s28 }
  0x11   : > { %s381_s29 = scalar_select %p380_p6, %s4096_s28, 15 }
  0x12   : > { %s4101_s30 = sshll.u32 %s4793_s22, 5  ;;  %s3266_s7 = sshll.u32 %s4793_s22, 1 }
  0x13   : > { %s3242_s8 = sshll.u32 %s381_s29, 1  ;;  %p390_p8 = scmp.gt.s32.totalorder %s4104_s9, 0 }
  0x14   : > { %s384_s10 = sadd.s32 %s4101_s30, %s3242_s8  ;;  %p3247_p9 = scmp.lt.s32.totalorder %s4104_s9, 15 }
  0x15   : > { %s3244_s11 = sshll.u32 %s384_s10, 2  ;;  %p3294_p11 = scmp.ne.s32.totalorder %s4008_s21, 0 }
  0x16   : > { %s4112_s14 = scalar_lea.vmem %s4734_s0, %s3244_s11  ;;  %s4117_s17 = scalar_lea.vmem %s4739_s5, %s3244_s11 }
  0x17   : > { %s436_s20 = scalar_select %p435_p7, %s4008_s21, 1  ;;  %v3561_v1 = vld [vmem:[%s4112_s14] sm:$0xff]   ;;  %v3600_v2 = vld [vmem:[%s4112_s14 + $0x8] sm:$0xff]   ;;  %v3601_v3 = vld [vmem:[%s4112_s14 + $0x10] sm:$0xff]  }
  0x18   : > { %v3562_v4 = vunpack.c.l.bf16 %v3561_v1  ;;  %v3563_v5 = vunpack.c.h.bf16 %v3561_v1  ;;  %v3566_v6 = vunpack.c.l.bf16 %v3600_v2  ;;  %v3567_v7 = vunpack.c.h.bf16 %v3600_v2  ;;  %v3602_v8 = vld [vmem:[%s4112_s14 + $0x18] sm:$0xff]   ;;  %s391_s22 = scalar_select %p390_p8, %s4104_s9, 0  ;;  %v3603_v41 = vld [vmem:[%s4112_s14 + $0x20] sm:$0xff]   ;;  %v3604_v45 = vld [vmem:[%s4112_s14 + $0x28] sm:$0xff]  }
  0x19   : > { %s438_s29 = sadd.s32 %s3266_s7, %s436_s20  ;;  %v3570_v10 = vunpack.c.l.bf16 %v3601_v3  ;;  %v3571_v11 = vunpack.c.h.bf16 %v3601_v3  ;;  %v3574_v12 = vunpack.c.l.bf16 %v3602_v8  ;;  %v3575_v13 = vunpack.c.h.bf16 %v3602_v8  ;;  %s3523_s11 = sadd.s32 8, %s4096_s28  ;;  %v3605_v56 = vld [vmem:[%s4112_s14 + $0x30] sm:$0xff]   ;;  %v3606_v57 = vld [vmem:[%s4112_s14 + $0x38] sm:$0xff]  }
  0x1a   : > { %s3267_s12 = sshll.u32 %s438_s29, 1  ;;  %v479_v14 = vmul.f32 %v3562_v4, %v4122_v0  ;;  %v480_v15 = vmul.f32 %v3563_v5, %v4122_v0  ;;  %v481_v16 = vmul.f32 %v3566_v6, %v4122_v0  ;;  %v482_v17 = vmul.f32 %v3567_v7, %v4122_v0  ;;  %p4144_p10 = scmp.lt.s32.totalorder %s3523_s11, 15 }
  0x1b   : > { %s4151_s16 = scalar_lea.vmem %s4740_s6, %s3267_s12  ;;  %v483_v18 = vmul.f32 %v3570_v10, %v4122_v0  ;;  %v484_v19 = vmul.f32 %v3571_v11, %v4122_v0  ;;  %v485_v20 = vmul.f32 %v3574_v12, %v4122_v0  ;;  %v486_v21 = vmul.f32 %v3575_v13, %v4122_v0  ;;  %s4795_s22 = smov (!%p3247_p9, %s391_s22), 15 }
  0x1c   : > { %v500_v22 = vadd.f32 %v4137_v9, %v479_v14  ;;  %v501_v23 = vadd.f32 %v4137_v9, %v480_v15  ;;  %v502_v24 = vadd.f32 %v4137_v9, %v481_v16  ;;  %v503_v25 = vadd.f32 %v4137_v9, %v482_v17  ;;  %s4797_s11 = smov (!%p4144_p10, %s3523_s11), 15  ;;  %s3252_s28 = sshll.u32 %s4795_s22, 1 }
  0x1d   : > { %v504_v26 = vadd.f32 %v4137_v9, %v483_v18  ;;  %v505_v27 = vadd.f32 %v4137_v9, %v484_v19  ;;  %v506_v28 = vadd.f32 %v4137_v9, %v485_v20  ;;  %v507_v29 = vadd.f32 %v4137_v9, %v486_v21  ;;  %s4179_s9 = sadd.s32 %s3252_s28, %s4101_s30  ;;  %s4799_s11 = smov (!%p4144_p10, %s4797_s11), 15 }
  0x1e   : > { %vm516_vm1 = vcmp.gt.f32.partialorder %v500_v22, 0.0  ;;  %v532_v30 = vmul.f32 0.01, %v500_v22  ;;  %vm517_vm2 = vcmp.gt.f32.partialorder %v501_v23, 0.0  ;;  %v533_v31 = vmul.f32 0.01, %v501_v23 }
  0x1f   : > { %vm518_vm3 = vcmp.gt.f32.partialorder %v502_v24, 0.0  ;;  %v534_v32 = vmul.f32 0.01, %v502_v24  ;;  %vm519_vm4 = vcmp.gt.f32.partialorder %v503_v25, 0.0  ;;  %v535_v33 = vmul.f32 0.01, %v503_v25 }
  0x20   : > { %v548_v34 = vsel %vm516_vm1, %v500_v22, %v532_v30  ;;  %v549_v35 = vsel %vm517_vm2, %v501_v23, %v533_v31  ;;  %vm520_vm5 = vcmp.gt.f32.partialorder %v504_v26, 0.0  ;;  %v536_v36 = vmul.f32 0.01, %v504_v26  ;;  %s3259_s18 = sshll.u32 %s4799_s11, 1  ;;  %s3254_s19 = sshll.u32 %s4179_s9, 2 }
  0x21   : > { %v3524_v37 = vpack.c.bf16 %v548_v34, %v548_v34  ;;  %v3525_v38 = vpack.c.bf16 %v549_v35, %v549_v35  ;;  %v550_v39 = vsel %vm518_vm3, %v502_v24, %v534_v32  ;;  %v551_v40 = vsel %vm519_vm4, %v503_v25, %v535_v33  ;;  %s415_s20 = sadd.s32 %s3259_s18, %s4101_s30  ;;  %s400_s29 = scalar_lea.vmem %s4735_s1, %s3254_s19 }
  0x22   : > { %v3526_v42 = vpack.c.bf16 %v550_v39, %v550_v39  ;;  %v3527_v43 = vpack.c.bf16 %v551_v40, %v551_v40  ;;  %v552_v44 = vsel %vm520_vm5, %v504_v26, %v536_v36  ;;  %vm521_vm6 = vcmp.gt.f32.partialorder %v505_v27, 0.0  ;;  %s4199_s14 = sshll.u32 %s415_s20, 2  ;;  %v3593_v24 = vld [vmem:[%s400_s29] sm:$0xff]  }
  0x23   : > { %630 = vst.msk [vmem:[#allocation2 + $0x8] sm:$0xf] %vm629_vm0, %v3524_v37  ;;  %631 = vst.msk [vmem:[#allocation2 + $0xc] sm:$0xf] %vm629_vm0, %v3525_v38  ;;  %v3528_v46 = vpack.c.bf16 %v552_v44, %v552_v44  ;;  %v537_v47 = vmul.f32 0.01, %v505_v27  ;;  %v3578_v50 = vunpack.c.l.bf16 %v3603_v41  ;;  %v3579_v51 = vunpack.c.h.bf16 %v3603_v41  ;;  %s417_s11 = scalar_lea.vmem %s4736_s2, %s4199_s14 }
  0x24   : > { %vm522_vm7 = vcmp.gt.f32.partialorder %v506_v28, 0.0  ;;  %v538_v48 = vmul.f32 0.01, %v506_v28  ;;  %632 = vst.msk [vmem:[#allocation2 + $0x10] sm:$0xf] %vm629_vm0, %v3526_v42  ;;  %vm523_vm8 = vcmp.gt.f32.partialorder %v507_v29, 0.0  ;;  %v3582_v54 = vunpack.c.l.bf16 %v3604_v45 }
  0x25   : > { %633 = vst.msk [vmem:[#allocation2 + $0x14] sm:$0xf] %vm629_vm0, %v3527_v43  ;;  %v539_v49 = vmul.f32 0.01, %v507_v29  ;;  %634 = vst.msk [vmem:[#allocation2 + $0x18] sm:$0xf] %vm629_vm0, %v3528_v46  ;;  %v553_v52 = vsel %vm521_vm6, %v505_v27, %v537_v47  ;;  %v3583_v55 = vunpack.c.h.bf16 %v3604_v45  ;;  %v487_v61 = vmul.f32 %v3578_v50, %v4122_v0 }
  0x26   : > { %v554_v53 = vsel %vm522_vm7, %v506_v28, %v538_v48  ;;  %v3529_v58 = vpack.c.bf16 %v553_v52, %v553_v52  ;;  %v488_v63 = vmul.f32 %v3579_v51, %v4122_v0  ;;  %v489_v1 = vmul.f32 %v3582_v54, %v4122_v0  ;;  %v3597_v28 = vld [vmem:[%s417_s11] sm:$0xff]  }
  0x27   : > { %v3530_v59 = vpack.c.bf16 %v554_v53, %v554_v53  ;;  %v555_v60 = vsel %vm523_vm8, %v507_v29, %v539_v49  ;;  %v490_v2 = vmul.f32 %v3583_v55, %v4122_v0  ;;  %v508_v3 = vadd.f32 %v4137_v9, %v487_v61 }
  0x28   : > { %v3531_v62 = vpack.c.bf16 %v555_v60, %v555_v60  ;;  %635 = vst.msk [vmem:[#allocation2 + $0x1c] sm:$0xf] %vm629_vm0, %v3529_v58  ;;  %v3586_v4 = vunpack.c.l.bf16 %v3605_v56  ;;  %v3587_v5 = vunpack.c.h.bf16 %v3605_v56  ;;  %v3590_v6 = vunpack.c.l.bf16 %v3606_v57 }
  0x29   : > { %636 = vst.msk [vmem:[#allocation2 + $0x20] sm:$0xf] %vm629_vm0, %v3530_v59  ;;  %v509_v7 = vadd.f32 %v4137_v9, %v488_v63  ;;  %v510_v8 = vadd.f32 %v4137_v9, %v489_v1  ;;  %v511_v10 = vadd.f32 %v4137_v9, %v490_v2  ;;  %v3591_v11 = vunpack.c.h.bf16 %v3606_v57 }
  0x2a   : > { %637 = vst.msk [vmem:[#allocation2 + $0x24] sm:$0xf] %vm629_vm0, %v3531_v62  ;;  %vm524_vm9 = vcmp.gt.f32.partialorder %v508_v3, 0.0  ;;  %v540_v12 = vmul.f32 0.01, %v508_v3  ;;  %v491_v13 = vmul.f32 %v3586_v4, %v4122_v0  ;;  %v492_v14 = vmul.f32 %v3587_v5, %v4122_v0 }
  0x2b   : > { %vm525_vm10 = vcmp.gt.f32.partialorder %v509_v7, 0.0  ;;  %v541_v15 = vmul.f32 0.01, %v509_v7  ;;  %vm526_vm11 = vcmp.gt.f32.partialorder %v510_v8, 0.0  ;;  %v542_v16 = vmul.f32 0.01, %v510_v8 }
  0x2c   : > { %v556_v17 = vsel %vm524_vm9, %v508_v3, %v540_v12  ;;  %vm527_vm12 = vcmp.gt.f32.partialorder %v511_v10, 0.0  ;;  %v543_v18 = vmul.f32 0.01, %v511_v10  ;;  %v512_v19 = vadd.f32 %v4137_v9, %v491_v13 }
  0x2d   : > { %v3532_v20 = vpack.c.bf16 %v556_v17, %v556_v17  ;;  %v557_v21 = vsel %vm525_vm10, %v509_v7, %v541_v15  ;;  %v558_v22 = vsel %vm526_vm11, %v510_v8, %v542_v16  ;;  %v513_v23 = vadd.f32 %v4137_v9, %v492_v14 }
  0x2e   : > { %v3533_v25 = vpack.c.bf16 %v557_v21, %v557_v21  ;;  %v3534_v26 = vpack.c.bf16 %v558_v22, %v558_v22  ;;  %v559_v27 = vsel %vm527_vm12, %v511_v10, %v543_v18  ;;  %vm528_vm13 = vcmp.gt.f32.partialorder %v512_v19, 0.0 }
  0x2f   : > { %638 = vst.msk [vmem:[#allocation2 + $0x28] sm:$0xf] %vm629_vm0, %v3532_v20  ;;  %v3535_v29 = vpack.c.bf16 %v559_v27, %v559_v27  ;;  %v544_v30 = vmul.f32 0.01, %v512_v19  ;;  %vm529_vm14 = vcmp.gt.f32.partialorder %v513_v23, 0.0  ;;  %v493_v32 = vmul.f32 %v3590_v6, %v4122_v0 }
  0x30   : > { %v545_v31 = vmul.f32 0.01, %v513_v23  ;;  %639 = vst.msk [vmem:[#allocation2 + $0x2c] sm:$0xf] %vm629_vm0, %v3533_v25  ;;  %640 = vst.msk [vmem:[#allocation2 + $0x30] sm:$0xf] %vm629_vm0, %v3534_v26  ;;  %v494_v33 = vmul.f32 %v3591_v11, %v4122_v0  ;;  %v3594_v34 = vunpack.c.l.bf16 %v3593_v24  ;;  %v3595_v35 = vunpack.c.h.bf16 %v3593_v24 }
  0x31   : > { %641 = vst.msk [vmem:[#allocation2 + $0x34] sm:$0xf] %vm629_vm0, %v3535_v29  ;;  %v560_v36 = vsel %vm528_vm13, %v512_v19, %v544_v30  ;;  %v3598_v38 = vunpack.c.l.bf16 %v3597_v28  ;;  %v3599_v39 = vunpack.c.h.bf16 %v3597_v28  ;;  %v514_v42 = vadd.f32 %v4137_v9, %v493_v32 }
  0x32   : > { %v561_v37 = vsel %vm529_vm14, %v513_v23, %v545_v31  ;;  %v3536_v40 = vpack.c.bf16 %v560_v36, %v560_v36  ;;  %v515_v43 = vadd.f32 %v4137_v9, %v494_v33  ;;  %v655_v44 = vmul.f32 %v3594_v34, %v4122_v0 }
  0x33   : > { %v3537_v41 = vpack.c.bf16 %v561_v37, %v561_v37  ;;  %v656_v45 = vmul.f32 %v3595_v35, %v4122_v0  ;;  %v689_v46 = vmul.f32 %v3598_v38, %v4122_v0  ;;  %v690_v47 = vmul.f32 %v3599_v39, %v4122_v0 }
  0x34   : > { %642 = vst.msk [vmem:[#allocation2 + $0x38] sm:$0xf] %vm629_vm0, %v3536_v40  ;;  %vm530_vm15 = vcmp.gt.f32.partialorder %v514_v42, 0.0  ;;  %v546_v48 = vmul.f32 0.01, %v514_v42  ;;  %vm531_vm1 = vcmp.gt.f32.partialorder %v515_v43, 0.0  ;;  %v662_v50 = vadd.f32 %v4137_v9, %v655_v44 }
  0x35   : > { %643 = vst.msk [vmem:[#allocation2 + $0x3c] sm:$0xf] %vm629_vm0, %v3537_v41  ;;  %v547_v49 = vmul.f32 0.01, %v515_v43  ;;  %v663_v51 = vadd.f32 %v4137_v9, %v656_v45  ;;  %v696_v52 = vadd.f32 %v4137_v9, %v689_v46  ;;  %v697_v53 = vadd.f32 %v4137_v9, %v690_v47 }
  0x36   : > { %v562_v54 = vsel %vm530_vm15, %v514_v42, %v546_v48  ;;  %vm664_vm2 = vcmp.gt.f32.partialorder %v662_v50, 0.0  ;;  %v666_v57 = vmul.f32 0.01, %v662_v50 }
  0x37   : > { %v563_v55 = vsel %vm531_vm1, %v515_v43, %v547_v49  ;;  %v3538_v56 = vpack.c.bf16 %v562_v54, %v562_v54  ;;  %vm665_vm3 = vcmp.gt.f32.partialorder %v663_v51, 0.0  ;;  %v667_v58 = vmul.f32 0.01, %v663_v51 }
  0x38   : > { %v3539_v0 = vpack.c.bf16 %v563_v55, %v563_v55  ;;  %vm698_vm4 = vcmp.gt.f32.partialorder %v696_v52, 0.0  ;;  %v700_v59 = vmul.f32 0.01, %v696_v52  ;;  %v668_v60 = vsel %vm664_vm2, %v662_v50, %v666_v57 }
  0x39   : > { %644 = vst.msk [vmem:[#allocation2 + $0x40] sm:$0xf] %vm629_vm0, %v3538_v56  ;;  %vm699_vm5 = vcmp.gt.f32.partialorder %v697_v53, 0.0  ;;  %v701_v61 = vmul.f32 0.01, %v697_v53  ;;  %v3540_v62 = vpack.c.bf16 %v668_v60, %v668_v60  ;;  %v669_v63 = vsel %vm665_vm3, %v663_v51, %v667_v58 }
  0x3a   : > { %645 = vst.msk [vmem:[#allocation2 + $0x44] sm:$0xf] %vm629_vm0, %v3539_v0  ;;  %v702_v9 = vsel %vm698_vm4, %v696_v52, %v700_v59  ;;  %v3541_v1 = vpack.c.bf16 %v669_v63, %v669_v63  ;;  %718 = sbr.rel (%p3294_p11) target bundleno = 65 (0x41), region = 44 }
  0x3b   : > { %v3542_v2 = vpack.c.bf16 %v702_v9, %v702_v9  ;;  %v703_v3 = vsel %vm699_vm5, %v697_v53, %v701_v61  ;;  %678 = vst.msk [vmem:[#allocation2] sm:$0xf] %vm629_vm0, %v3540_v62 }
  0x3c   : > { %v3543_v4 = vpack.c.bf16 %v703_v3, %v703_v3  ;;  %679 = vst.msk [vmem:[#allocation2 + $0x4] sm:$0xf] %vm629_vm0, %v3541_v1 }
  0x3d   : > { %713 = vst.msk [vmem:[#allocation2 + $0x48] sm:$0xf] %vm629_vm0, %v3542_v2 }
  0x3e   : > { %714 = vst.msk [vmem:[#allocation2 + $0x4c] sm:$0xf] %vm629_vm0, %v3543_v4 }
  0x3f   : > { %v4026_v5 = vmov 0  }
  0x40   : > { %719 = vst.msk [vmem:[#allocation2] sm:$0xf] %vm629_vm0, %v4026_v5  ;;  %720 = vst.msk [vmem:[#allocation2 + $0x4] sm:$0xf] %vm629_vm0, %v4026_v5 }
  0x41 PF: > { %p3295_p12 = scmp.ne.s32.totalorder %s4008_s21, 1 }
  0x43   : > { %724 = sbr.rel (%p3295_p12) target bundleno = 74 (0x4a), region = 48 }
  0x48   : > { %v4027_v6 = vmov 0  }
  0x49   : > { %725 = vst.msk [vmem:[#allocation2 + $0x48] sm:$0xf] %vm629_vm0, %v4027_v6  ;;  %726 = vst.msk [vmem:[#allocation2 + $0x4c] sm:$0xf] %vm629_vm0, %v4027_v6 }
  0x4a PF: > { %v3346_v7 = vld [vmem:[%s4738_s4 + $0x4] sm:$0xf]  ;;  %vm1213_vm6 = vcmask 1043456   ;;  %vm1188_vm7 = vcmask 64512   ;;  %v3906_v12 = vld [vmem:[#allocation2 + $0x8] sm:$0xff]   ;;  %v3908_v17 = vld [vmem:[#allocation2 + $0x10] sm:$0xff]  }
  0x4b   : > { %v3904_v8 = vld [vmem:[#allocation2] sm:$0xff]   ;;  %3852 = vmatprep.subr.msk.bf16.mxu0 %vm1213_vm6, %v3346_v7  ;;  %3853 = vmatprep.subr.msk.bf16.mxu1 %vm1213_vm6, %v3346_v7  ;;  %v1215_v10 = vsel %vm1213_vm6, %v3346_v7, 0  ;;  %v3907_v13 = vld [vmem:[#allocation2 + $0x28] sm:$0xff]   ;;  %v3909_v19 = vld [vmem:[#allocation2 + $0x30] sm:$0xff]   ;;  %vm877_vm8 = vcmask 1040384   ;;  %vm1010_vm10 = vcmask 1047552  }
  0x4c   : > { %3689 = vmatpush3.bf16.msra.mxu0 %v1215_v10  ;;  %3851 = vmatpush3.bf16.msra.mxu1 %v1215_v10  ;;  %v3905_v11 = vld [vmem:[#allocation2 + $0x20] sm:$0xff]   ;;  %v3379_v16 = vld [vmem:[%s4738_s4 + $0x8] sm:$0xf]  ;;  %v3910_v20 = vld [vmem:[#allocation2 + $0x18] sm:$0xff]   ;;  %vm878_vm9 = vsmask.f32 256 }
  0x4d   : > { %3690 = vmatprep.mubr.msk.bf16.mxu0 %vm1188_vm7, %v3904_v8  ;;  %3698 = vmatprep.mubr.msk.bf16.mxu1 %vm1188_vm7, %v3905_v11  ;;  %v1129_v14 = vld [vmem:[%s4738_s4] sm:$0xf]  ;;  %v1561_v18 = vsel %vm1213_vm6, %v3379_v16, 0  ;;  %v3911_v21 = vld [vmem:[#allocation2 + $0x38] sm:$0xff]   ;;  %v3915_v23 = vld [vmem:[#allocation2 + $0x8] sm:$0xff]  }
  0x4e   : > { %3854 = vmatprep.subr.msk.bf16.mxu1 %vm1213_vm6, %v1129_v14  ;;  %v1379_v15 = vsel %vm1213_vm6, %v1129_v14, 0  ;;  %3855 = vmatprep.subr.msk.bf16.mxu0 %vm1213_vm6, %v3379_v16  ;;  %v3912_v22 = vld [vmem:[#allocation2] sm:$0xff]   ;;  %vm1011_vm11 = vsmask.f32 7424  ;;  %v3396_v24 = vld [vmem:[%s4738_s4 + $0xc] sm:$0xf]  ;;  %vm4282_vm12 = vmand %vm877_vm8, %vm878_vm9 }
  0x4f   : > { %3691 = vmatmul.mubr.msk.bf16.vlgmr.msra.gmra.mxu0 %vm1188_vm7, %v3906_v12  ;;  %3699 = vmatmul.mubr.msk.bf16.vlgmr.msra.gmra.mxu1 %vm1188_vm7, %v3907_v13  ;;  %v798_v25 = vshrl.u32 %v3912_v22, 16  ;;  %v801_v26 = vshll.u32 %v3912_v22, 16  ;;  %v805_v27 = vshrl.u32 %v3915_v23, 16  ;;  %v808_v28 = vshll.u32 %v3915_v23, 16  ;;  %v3413_v30 = vld [vmem:[%s4738_s4 + $0x10] sm:$0xf]  ;;  %vm4289_vm13 = vmand %vm1010_vm10, %vm1011_vm11 }
  0x50   : > { %3707 = vmatpush3.bf16.msra.mxu1 %v1379_v15  ;;  %3725 = vmatpush3.bf16.msra.mxu0 %v1561_v18  ;;  %v4274_v29 = vsel %vm1213_vm6, %v3396_v24, 0  ;;  %v3918_v31 = vld [vmem:[#allocation2 + $0x10] sm:$0xff]   ;;  %v4294_v38 = vsel %vm1213_vm6, %v3413_v30, 0  ;;  %v3921_v41 = vld [vmem:[#allocation2 + $0x18] sm:$0xff]   ;;  %v3924_v50 = vld [vmem:[#allocation2 + $0x20] sm:$0xff]  }
  0x51   : > { %3694 = vmatprep.mubr.msk.bf16.mxu0 %vm1188_vm7, %v3908_v17  ;;  %3702 = vmatprep.mubr.msk.bf16.mxu1 %vm1188_vm7, %v3909_v19  ;;  %v800_v32 = vrot.slane %v798_v25, 7  ;;  %v980_v34 = vrot.slane %v801_v26, 1  ;;  %v807_v35 = vrot.slane %v805_v27, 7  ;;  %v982_v36 = vrot.slane %v808_v28, 1  ;;  %v4296_v51 = vld [vmem:[#allocation2 + $0x28] sm:$0xff]   ;;  %v4320_v16 = vld [vmem:[#allocation2 + $0x30] sm:$0xff]  }
  0x52   : > { %3856 = vmatprep.subr.msk.bf16.mxu1 %vm1213_vm6, %v3396_v24  ;;  %3857 = vmatprep.subr.msk.bf16.mxu0 %vm1213_vm6, %v3413_v30  ;;  %v812_v39 = vshrl.u32 %v3918_v31, 16  ;;  %v815_v40 = vshll.u32 %v3918_v31, 16  ;;  %v819_v48 = vshrl.u32 %v3921_v41, 16  ;;  %v822_v49 = vshll.u32 %v3921_v41, 16  ;;  %v3952_v33 = vld [vmem:[#allocation2 + $0x40] sm:$0xff]  }
  0x53   : > { %v803_v42 = vor.u32 %v801_v26, %v800_v32  ;;  %v981_v43 = vor.u32 %v980_v34, %v798_v25  ;;  %v810_v44 = vor.u32 %v808_v28, %v807_v35  ;;  %v983_v45 = vor.u32 %v982_v36, %v805_v27  ;;  %v4335_v32 = vld [vmem:[#allocation2 + $0x38] sm:$0xff]  }
  0x54   : > { %v814_v46 = vrot.slane %v812_v39, 7  ;;  %v984_v47 = vrot.slane %v815_v40, 1  ;;  %v821_v1 = vrot.slane %v819_v48, 7  ;;  %v986_v2 = vrot.slane %v822_v49, 1 }
  0x55   : > { %v880_v52 = vsel %vm4282_vm12, 0, %v803_v42  ;;  %v1013_v53 = vsel %vm4289_vm13, %v981_v43, 0  ;;  %v881_v54 = vsel %vm4282_vm12, 0, %v810_v44  ;;  %v1014_v55 = vsel %vm4289_vm13, %v983_v45, 0  ;;  %v4350_v45 = vld [vmem:[%s4738_s4 + $0x18] sm:$0xf] }
  0x56   : > { %v3306_v56 = vcombine.low %v880_v52, %v880_v52  ;;  %v3307_v0 = vcombine.high %v880_v52, %v880_v52  ;;  %v3326_v57 = vcombine.low %v1013_v53, %v1013_v53  ;;  %v3327_v58 = vcombine.high %v1013_v53, %v1013_v53 }
  0x57   : > { %3695 = vmatmul.mubr.msk.bf16.gmra.mxu0 %vm1188_vm7, %v3910_v20  ;;  %3703 = vmatmul.mubr.msk.bf16.gmra.mxu1 %vm1188_vm7, %v3911_v21  ;;  %v3308_v59 = vcombine.low %v881_v54, %v881_v54  ;;  %v3309_v60 = vcombine.high %v881_v54, %v881_v54  ;;  %v3328_v61 = vcombine.low %v1014_v55, %v1014_v55  ;;  %v826_v3 = vshrl.u32 %v3924_v50, 16 }
  0x58   : > { %v3329_v62 = vcombine.high %v1014_v55, %v1014_v55  ;;  %960 = vst.msk [vmem:[#allocation3] sm:$0xf] %vm629_vm0, %v3306_v56  ;;  %961 = vst.msk [vmem:[#allocation3 + $0x4] sm:$0xf] %vm629_vm0, %v3307_v0  ;;  %v817_v63 = vor.u32 %v815_v40, %v814_v46  ;;  %v985_v9 = vor.u32 %v984_v47, %v812_v39  ;;  %v829_v4 = vshll.u32 %v3924_v50, 16 }
  0x59   : > { %1093 = vst.msk [vmem:[#allocation4] sm:$0xf] %vm629_vm0, %v3326_v57  ;;  %1094 = vst.msk [vmem:[#allocation4 + $0x4] sm:$0xf] %vm629_vm0, %v3327_v58  ;;  %v833_v5 = vshrl.u32 %v4296_v51, 16  ;;  %v836_v6 = vshll.u32 %v4296_v51, 16  ;;  %v824_v10 = vor.u32 %v822_v49, %v821_v1  ;;  %v987_v11 = vor.u32 %v986_v2, %v819_v48 }
  0x5a   : > { %962 = vst.msk [vmem:[#allocation3 + $0x8] sm:$0xf] %vm629_vm0, %v3308_v59  ;;  %963 = vst.msk [vmem:[#allocation3 + $0xc] sm:$0xf] %vm629_vm0, %v3309_v60  ;;  %v882_v7 = vsel %vm4282_vm12, 0, %v817_v63  ;;  %v1015_v8 = vsel %vm4289_vm13, %v985_v9, 0 }
  0x5b   : > { %1095 = vst.msk [vmem:[#allocation4 + $0x8] sm:$0xf] %vm629_vm0, %v3328_v61  ;;  %1096 = vst.msk [vmem:[#allocation4 + $0xc] sm:$0xf] %vm629_vm0, %v3329_v62  ;;  %v3310_v12 = vcombine.low %v882_v7, %v882_v7  ;;  %v3311_v13 = vcombine.high %v882_v7, %v882_v7  ;;  %v3330_v14 = vcombine.low %v1015_v8, %v1015_v8  ;;  %v883_v17 = vsel %vm4282_vm12, 0, %v824_v10 }
  0x5c   : > { %v3331_v15 = vcombine.high %v1015_v8, %v1015_v8  ;;  %v1016_v18 = vsel %vm4289_vm13, %v987_v11, 0  ;;  %v828_v19 = vrot.slane %v826_v3, 7  ;;  %v988_v20 = vrot.slane %v829_v4, 1  ;;  %v4342_v40 = vld [vmem:[%s4738_s4 + $0x14] sm:$0xf] }
  0x5d   : > { %964 = vst.msk [vmem:[#allocation3 + $0x10] sm:$0xf] %vm629_vm0, %v3310_v12  ;;  %965 = vst.msk [vmem:[#allocation3 + $0x14] sm:$0xf] %vm629_vm0, %v3311_v13  ;;  %v3312_v21 = vcombine.low %v883_v17, %v883_v17  ;;  %v3313_v22 = vcombine.high %v883_v17, %v883_v17  ;;  %v3332_v23 = vcombine.low %v1016_v18, %v1016_v18  ;;  %v835_v27 = vrot.slane %v833_v5, 7 }
  0x5e   : > { %1097 = vst.msk [vmem:[#allocation4 + $0x10] sm:$0xf] %vm629_vm0, %v3330_v14  ;;  %1098 = vst.msk [vmem:[#allocation4 + $0x14] sm:$0xf] %vm629_vm0, %v3331_v15  ;;  %v3333_v24 = vcombine.high %v1016_v18, %v1016_v18  ;;  %v831_v25 = vor.u32 %v829_v4, %v828_v19  ;;  %v989_v26 = vor.u32 %v988_v20, %v826_v3  ;;  %v990_v28 = vrot.slane %v836_v6, 1 }
  0x5f   : > { %v3913_v30 = vld [vmem:[#allocation3] sm:$0xff]   ;;  %966 = vst.msk [vmem:[#allocation3 + $0x18] sm:$0xf] %vm629_vm0, %v3312_v21  ;;  %967 = vst.msk [vmem:[#allocation3 + $0x1c] sm:$0xf] %vm629_vm0, %v3313_v22  ;;  %v840_v31 = vshrl.u32 %v4320_v16, 16  ;;  %v838_v36 = vor.u32 %v836_v6, %v835_v27 }
  0x60   : > { %1099 = vst.msk [vmem:[#allocation4 + $0x18] sm:$0xf] %vm629_vm0, %v3332_v23  ;;  %1100 = vst.msk [vmem:[#allocation4 + $0x1c] sm:$0xf] %vm629_vm0, %v3333_v24  ;;  %v3914_v34 = vld [vmem:[#allocation4] sm:$0xff]   ;;  %v884_v35 = vsel %vm4282_vm12, 0, %v831_v25  ;;  %v991_v39 = vor.u32 %v990_v28, %v833_v5  ;;  %3708 = vmatprep.mubr.msk.bf16.mxu1 %vm1188_vm7, %v3913_v30 }
  0x61   : > { %v3916_v41 = vld [vmem:[#allocation3 + $0x8] sm:$0xff]   ;;  %v3314_v42 = vcombine.low %v884_v35, %v884_v35  ;;  %v3315_v43 = vcombine.high %v884_v35, %v884_v35  ;;  %v1017_v44 = vsel %vm4289_vm13, %v989_v26, 0  ;;  %3726 = vmatprep.mubr.msk.bf16.mxu0 %vm1188_vm7, %v3914_v34  ;;  %v885_v49 = vsel %vm4282_vm12, 0, %v838_v36  ;;  %v3937_v23 = vld [vmem:[#allocation2 + $0x8] sm:$0xff]   ;;  %v3950_v26 = vld [vmem:[#allocation2 + $0x40] sm:$0xff]  }
  0x62   : > { %v3917_v46 = vld [vmem:[#allocation4 + $0x8] sm:$0xff]   ;;  %v3334_v47 = vcombine.low %v1017_v44, %v1017_v44  ;;  %v3335_v48 = vcombine.high %v1017_v44, %v1017_v44  ;;  %3709 = vmatmul.mubr.msk.bf16.vlgmr.msra.gmra.mxu1 %vm1188_vm7, %v3916_v41  ;;  %v3316_v50 = vcombine.low %v885_v49, %v885_v49  ;;  %v3317_v51 = vcombine.high %v885_v49, %v885_v49  ;;  %v3936_v24 = vld [vmem:[#allocation3 + $0x8] sm:$0xff]   ;;  %v3943_v49 = vld [vmem:[#allocation2 + $0x20] sm:$0xff]  }
  0x63   : > { %968 = vst.msk [vmem:[#allocation3 + $0x20] sm:$0xf] %vm629_vm0, %v3314_v42  ;;  %969 = vst.msk [vmem:[#allocation3 + $0x24] sm:$0xf] %vm629_vm0, %v3315_v43  ;;  %v1018_v52 = vsel %vm4289_vm13, %v991_v39, 0  ;;  %v842_v53 = vrot.slane %v840_v31, 7  ;;  %3727 = vmatmul.mubr.msk.bf16.vlgmr.msra.gmra.mxu0 %vm1188_vm7, %v3917_v46  ;;  %3743 = vmatpush3.bf16.msra.mxu1 %v4274_v29 }
  0x64   : > { %v3919_v54 = vld [vmem:[#allocation3 + $0x10] sm:$0xff]   ;;  %1101 = vst.msk [vmem:[#allocation4 + $0x20] sm:$0xf] %vm629_vm0, %v3334_v47  ;;  %1102 = vst.msk [vmem:[#allocation4 + $0x24] sm:$0xf] %vm629_vm0, %v3335_v48  ;;  %v3336_v55 = vcombine.low %v1018_v52, %v1018_v52  ;;  %v3337_v56 = vcombine.high %v1018_v52, %v1018_v52  ;;  %v843_v0 = vshll.u32 %v4320_v16, 16  ;;  %3761 = vmatpush3.bf16.msra.mxu0 %v4294_v38  ;;  %3858 = vmatprep.subr.msk.bf16.mxu1 %vm1213_vm6, %v4342_v40 }
  0x65   : > { %v3920_v57 = vld [vmem:[#allocation4 + $0x10] sm:$0xff]   ;;  %970 = vst.msk [vmem:[#allocation3 + $0x28] sm:$0xf] %vm629_vm0, %v3316_v50  ;;  %971 = vst.msk [vmem:[#allocation3 + $0x2c] sm:$0xf] %vm629_vm0, %v3317_v51  ;;  %v847_v58 = vshrl.u32 %v4335_v32, 16  ;;  %3712 = vmatprep.mubr.msk.bf16.mxu1 %vm1188_vm7, %v3919_v54  ;;  %3859 = vmatprep.subr.msk.bf16.mxu0 %vm1213_vm6, %v4350_v45 }
  0x66   : > { %1103 = vst.msk [vmem:[#allocation4 + $0x28] sm:$0xf] %vm629_vm0, %v3336_v55  ;;  %1104 = vst.msk [vmem:[#allocation4 + $0x2c] sm:$0xf] %vm629_vm0, %v3337_v56  ;;  %v845_v29 = vor.u32 %v843_v0, %v842_v53  ;;  %v992_v59 = vrot.slane %v843_v0, 1  ;;  %3730 = vmatprep.mubr.msk.bf16.mxu0 %vm1188_vm7, %v3920_v57  ;;  %v3922_v38 = vld [vmem:[#allocation3 + $0x18] sm:$0xff]  }
  0x67   : > { %v849_v60 = vrot.slane %v847_v58, 7  ;;  %v3923_v61 = vld [vmem:[#allocation4 + $0x18] sm:$0xff]   ;;  %v850_v9 = vshll.u32 %v4335_v32, 16  ;;  %v854_v27 = vshrl.u32 %v3950_v26, 16  ;;  %v857_v28 = vshll.u32 %v3950_v26, 16  ;;  %v3939_v32 = vld [vmem:[#allocation2 + $0x10] sm:$0xff]  }
  0x68   : > { %v886_v62 = vsel %vm4282_vm12, 0, %v845_v29  ;;  %v993_v63 = vor.u32 %v992_v59, %v840_v31  ;;  %v3938_v31 = vld [vmem:[#allocation3 + $0x10] sm:$0xff]   ;;  %v2157_v34 = vsel %vm1213_vm6, %v4342_v40, 0  ;;  %v3941_v35 = vld [vmem:[#allocation2 + $0x18] sm:$0xff]   ;;  %v3940_v39 = vld [vmem:[#allocation3 + $0x18] sm:$0xff]   ;;  %v2356_v42 = vsel %vm1213_vm6, %v4350_v45, 0 }
  0x69   : > { %v3318_v1 = vcombine.low %v886_v62, %v886_v62  ;;  %v3319_v2 = vcombine.high %v886_v62, %v886_v62  ;;  %v852_v5 = vor.u32 %v850_v9, %v849_v60  ;;  %v994_v10 = vrot.slane %v850_v9, 1  ;;  %v3464_v47 = vld [vmem:[%s4738_s4 + $0x1c] sm:$0xf]  ;;  %v3481_v40 = vld [vmem:[%s4738_s4 + $0x20] sm:$0xf]  ;;  %v3945_v53 = vld [vmem:[#allocation2 + $0x28] sm:$0xff]  }
  0x6a   : > { %v3925_v3 = vld [vmem:[#allocation3 + $0x20] sm:$0xff]   ;;  %v1019_v4 = vsel %vm4289_vm13, %v993_v63, 0  ;;  %3713 = vmatmul.mubr.msk.bf16.gmra.mxu1 %vm1188_vm7, %v3922_v38  ;;  %v856_v30 = vrot.slane %v854_v27, 7  ;;  %v996_v41 = vrot.slane %v857_v28, 1  ;;  %v3968_v55 = vld [vmem:[#allocation2 + $0x48] sm:$0xff]   ;;  %v3949_v62 = vld [vmem:[#allocation2 + $0x38] sm:$0xff]  }
  0x6b   : > { %v3926_v6 = vld [vmem:[#allocation4 + $0x20] sm:$0xff]   ;;  %972 = vst.msk [vmem:[#allocation3 + $0x30] sm:$0xf] %vm629_vm0, %v3318_v1  ;;  %973 = vst.msk [vmem:[#allocation3 + $0x34] sm:$0xf] %vm629_vm0, %v3319_v2  ;;  %v3338_v7 = vcombine.low %v1019_v4, %v1019_v4  ;;  %v3339_v8 = vcombine.high %v1019_v4, %v1019_v4  ;;  %3731 = vmatmul.mubr.msk.bf16.gmra.mxu0 %vm1188_vm7, %v3923_v61  ;;  %3716 = vmatprep.mubr.msk.bf16.mxu1 %vm1188_vm7, %v3925_v3  ;;  %v887_v11 = vsel %vm4282_vm12, 0, %v852_v5 }
  0x6c   : > { %3734 = vmatprep.mubr.msk.bf16.mxu0 %vm1188_vm7, %v3926_v6  ;;  %v3320_v12 = vcombine.low %v887_v11, %v887_v11  ;;  %v3321_v13 = vcombine.high %v887_v11, %v887_v11  ;;  %v995_v14 = vor.u32 %v994_v10, %v847_v58  ;;  %v3928_v15 = vld [vmem:[#allocation3 + $0x28] sm:$0xff]   ;;  %v859_v36 = vor.u32 %v857_v28, %v856_v30  ;;  %v3942_v52 = vld [vmem:[#allocation3 + $0x20] sm:$0xff]   ;;  %v3953_v5 = vld [vmem:[#allocation4 + $0x8] sm:$0xff]  }
  0x6d   : > { %1105 = vst.msk [vmem:[#allocation4 + $0x30] sm:$0xf] %vm629_vm0, %v3338_v7  ;;  %1106 = vst.msk [vmem:[#allocation4 + $0x34] sm:$0xf] %vm629_vm0, %v3339_v8  ;;  %v3929_v17 = vld [vmem:[#allocation4 + $0x28] sm:$0xff]   ;;  %v997_v48 = vor.u32 %v996_v41, %v854_v27  ;;  %v3944_v54 = vld [vmem:[#allocation3 + $0x28] sm:$0xff]  }
  0x6e   : > { %974 = vst.msk [vmem:[#allocation3 + $0x38] sm:$0xf] %vm629_vm0, %v3320_v12  ;;  %975 = vst.msk [vmem:[#allocation3 + $0x3c] sm:$0xf] %vm629_vm0, %v3321_v13  ;;  %v1020_v16 = vsel %vm4289_vm13, %v995_v14, 0  ;;  %v888_v43 = vsel %vm4282_vm12, 0, %v859_v36 }
  0x6f   : > { %v3340_v18 = vcombine.low %v1020_v16, %v1020_v16  ;;  %v3341_v19 = vcombine.high %v1020_v16, %v1020_v16  ;;  %v3322_v44 = vcombine.low %v888_v43, %v888_v43  ;;  %v3323_v46 = vcombine.high %v888_v43, %v888_v43  ;;  %v3947_v59 = vld [vmem:[#allocation2 + $0x30] sm:$0xff]   ;;  %v3954_v6 = vld [vmem:[#allocation3 + $0x10] sm:$0xff]   ;;  %v3956_v8 = vld [vmem:[#allocation3 + $0x18] sm:$0xff]  }
  0x70   : > { %v1021_v45 = vsel %vm4289_vm13, %v997_v48, 0  ;;  %v861_v56 = vshrl.u32 %v3968_v55, 16  ;;  %v864_v0 = vshll.u32 %v3968_v55, 16  ;;  %v3955_v7 = vld [vmem:[#allocation4 + $0x10] sm:$0xff]   ;;  %v2555_v10 = vsel %vm1213_vm6, %v3464_v47, 0  ;;  %v3957_v11 = vld [vmem:[#allocation4 + $0x18] sm:$0xff]  }
  0x71   : > { %1107 = vst.msk [vmem:[#allocation4 + $0x38] sm:$0xf] %vm629_vm0, %v3340_v18  ;;  %1108 = vst.msk [vmem:[#allocation4 + $0x3c] sm:$0xf] %vm629_vm0, %v3341_v19  ;;  %v3342_v50 = vcombine.low %v1021_v45, %v1021_v45  ;;  %v3343_v51 = vcombine.high %v1021_v45, %v1021_v45  ;;  %v2754_v12 = vsel %vm1213_vm6, %v3481_v40, 0  ;;  %v3958_v13 = vld [vmem:[#allocation3 + $0x20] sm:$0xff]  }
  0x72   : > { %v3931_v20 = vld [vmem:[#allocation3 + $0x30] sm:$0xff]   ;;  %3717 = vmatmul.mubr.msk.bf16.gmra.mxu1 %vm1188_vm7, %v3928_v15  ;;  %976 = vst.msk [vmem:[#allocation3 + $0x40] sm:$0xf] %vm629_vm0, %v3322_v44  ;;  %977 = vst.msk [vmem:[#allocation3 + $0x44] sm:$0xf] %vm629_vm0, %v3323_v46  ;;  %v863_v57 = vrot.slane %v861_v56, 7 }
  0x73   : > { %3735 = vmatmul.mubr.msk.bf16.gmra.mxu0 %vm1188_vm7, %v3929_v17  ;;  %3720 = vmatprep.mubr.msk.bf16.mxu1 %vm1188_vm7, %v3931_v20  ;;  %1109 = vst.msk [vmem:[#allocation4 + $0x40] sm:$0xf] %vm629_vm0, %v3342_v50  ;;  %1110 = vst.msk [vmem:[#allocation4 + $0x44] sm:$0xf] %vm629_vm0, %v3343_v51  ;;  %v3946_v58 = vld [vmem:[#allocation3 + $0x30] sm:$0xff]   ;;  %v998_v29 = vrot.slane %v864_v0, 1 }
  0x74   : > { %v3932_v21 = vld [vmem:[#allocation4 + $0x30] sm:$0xff]   ;;  %v866_v38 = vor.u32 %v864_v0, %v863_v57  ;;  %v3959_v14 = vld [vmem:[#allocation4 + $0x20] sm:$0xff]   ;;  %v3960_v15 = vld [vmem:[#allocation3 + $0x28] sm:$0xff]  }
  0x75   : > { %3738 = vmatprep.mubr.msk.bf16.mxu0 %vm1188_vm7, %v3932_v21  ;;  %v3934_v22 = vld [vmem:[#allocation3 + $0x38] sm:$0xff]   ;;  %v999_v61 = vor.u32 %v998_v29, %v861_v56  ;;  %v3962_v17 = vld [vmem:[#allocation3 + $0x30] sm:$0xff]   ;;  %v3963_v18 = vld [vmem:[#allocation4 + $0x30] sm:$0xff]  }
  0x76   : > { %v3948_v60 = vld [vmem:[#allocation3 + $0x38] sm:$0xff]   ;;  %v889_v63 = vsel %vm4282_vm12, 0, %v866_v38  ;;  %v3972_v26 = vld [vmem:[#allocation2 + $0x18] sm:$0xff]   ;;  %v3974_v28 = vld [vmem:[#allocation2 + $0x20] sm:$0xff]  }
  0x77   : > { %v3324_v9 = vcombine.low %v889_v63, %v889_v63  ;;  %v3325_v1 = vcombine.high %v889_v63, %v889_v63  ;;  %v1022_v2 = vsel %vm4289_vm13, %v999_v61, 0  ;;  %v3961_v16 = vld [vmem:[#allocation4 + $0x28] sm:$0xff]   ;;  %v3973_v27 = vld [vmem:[#allocation4 + $0x18] sm:$0xff]   ;;  %v3975_v30 = vld [vmem:[#allocation4 + $0x20] sm:$0xff]  }
  0x78   : > { %v3935_v25 = vld [vmem:[#allocation4 + $0x38] sm:$0xff]   ;;  %v3344_v3 = vcombine.low %v1022_v2, %v1022_v2  ;;  %v3345_v4 = vcombine.high %v1022_v2, %v1022_v2  ;;  %v3964_v19 = vld [vmem:[#allocation3 + $0x38] sm:$0xff]   ;;  %v3982_v41 = vld [vmem:[#allocation2 + $0x40] sm:$0xff]  }
  0x79   : > { %978 = vst.msk [vmem:[#allocation3 + $0x48] sm:$0xf] %vm629_vm0, %v3324_v9  ;;  %979 = vst.msk [vmem:[#allocation3 + $0x4c] sm:$0xf] %vm629_vm0, %v3325_v1  ;;  %v3951_v37 = vld [vmem:[#allocation3 + $0x40] sm:$0xff]   ;;  %v3965_v20 = vld [vmem:[#allocation4 + $0x38] sm:$0xff]  }
  0x7a   : > { %3721 = vmatmul.mubr.msk.bf16.gmra.mxu1 %vm1188_vm7, %v3934_v22  ;;  %1111 = vst.msk [vmem:[#allocation4 + $0x48] sm:$0xf] %vm629_vm0, %v3344_v3  ;;  %1112 = vst.msk [vmem:[#allocation4 + $0x4c] sm:$0xf] %vm629_vm0, %v3345_v4  ;;  %v3966_v21 = vld [vmem:[#allocation3 + $0x40] sm:$0xff]   ;;  %v3967_v22 = vld [vmem:[#allocation4 + $0x40] sm:$0xff]  }
  0x7b   : > { %3739 = vmatmul.mubr.msk.bf16.gmra.mxu0 %vm1188_vm7, %v3935_v25  ;;  %3744 = vmatprep.mubr.msk.bf16.mxu1 %vm1188_vm7, %v3936_v24  ;;  %v3970_v24 = vld [vmem:[#allocation2 + $0x10] sm:$0xff]   ;;  %v3980_v36 = vld [vmem:[#allocation2 + $0x38] sm:$0xff]   ;;  %v3984_v43 = vld [vmem:[#allocation2 + $0x48] sm:$0xff]  }
  0x7c   : > { %3762 = vmatprep.mubr.msk.bf16.mxu0 %vm1188_vm7, %v3937_v23  ;;  %v3971_v25 = vld [vmem:[#allocation4 + $0x10] sm:$0xff]  }
  0x80   : > { %v3969_v23 = vld [vmem:[#allocation3 + $0x48] sm:$0xff]  }
  0x81   : > { %v3985_v44 = vld [vmem:[#allocation4 + $0x48] sm:$0xff]  }
  0x82   : > { %3745 = vmatmul.mubr.msk.bf16.vlgmr.msra.gmra.mxu1 %vm1188_vm7, %v3938_v31  ;;  %v3976_v31 = vld [vmem:[#allocation2 + $0x28] sm:$0xff]  }
  0x83   : > { %3763 = vmatmul.mubr.msk.bf16.vlgmr.msra.gmra.mxu0 %vm1188_vm7, %v3939_v32  ;;  %3779 = vmatpush3.bf16.msra.mxu1 %v2157_v34  ;;  %v3977_v32 = vld [vmem:[#allocation4 + $0x28] sm:$0xff]   ;;  %v3978_v34 = vld [vmem:[#allocation2 + $0x30] sm:$0xff]  }
  0x84   : > { %3797 = vmatpush3.bf16.msra.mxu0 %v2356_v42  ;;  %3748 = vmatprep.mubr.msk.bf16.mxu1 %vm1188_vm7, %v3940_v39  ;;  %v3981_v39 = vld [vmem:[#allocation4 + $0x38] sm:$0xff]   ;;  %v3983_v42 = vld [vmem:[#allocation4 + $0x40] sm:$0xff]  }
  0x85   : > { %3766 = vmatprep.mubr.msk.bf16.mxu0 %vm1188_vm7, %v3941_v35  ;;  %3860 = vmatprep.subr.msk.bf16.mxu1 %vm1213_vm6, %v3464_v47  ;;  %v3979_v35 = vld [vmem:[#allocation4 + $0x30] sm:$0xff]  }
  0x86   : > { %3861 = vmatprep.subr.msk.bf16.mxu0 %vm1213_vm6, %v3481_v40 }
  0x8a   : > { %3749 = vmatmul.mubr.msk.bf16.gmra.mxu1 %vm1188_vm7, %v3942_v52 }
  0x8b   : > { %3767 = vmatmul.mubr.msk.bf16.gmra.mxu0 %vm1188_vm7, %v3943_v49  ;;  %3752 = vmatprep.mubr.msk.bf16.mxu1 %vm1188_vm7, %v3944_v54 }
  0x8c   : > { %3770 = vmatprep.mubr.msk.bf16.mxu0 %vm1188_vm7, %v3945_v53 }
  0x92   : > { %3753 = vmatmul.mubr.msk.bf16.gmra.mxu1 %vm1188_vm7, %v3946_v58 }
  0x93   : > { %3771 = vmatmul.mubr.msk.bf16.gmra.mxu0 %vm1188_vm7, %v3947_v59  ;;  %3756 = vmatprep.mubr.msk.bf16.mxu1 %vm1188_vm7, %v3948_v60 }
  0x94   : > { %3774 = vmatprep.mubr.msk.bf16.mxu0 %vm1188_vm7, %v3949_v62 }
  0x9a   : > { %3757 = vmatmul.mubr.msk.bf16.gmra.mxu1 %vm1188_vm7, %v3951_v37 }
  0x9b   : > { %3775 = vmatmul.mubr.msk.bf16.gmra.mxu0 %vm1188_vm7, %v3952_v33  ;;  %3780 = vmatprep.mubr.msk.bf16.mxu1 %vm1188_vm7, %v3953_v5 }
  0x9c   : > { %3798 = vmatprep.mubr.msk.bf16.mxu0 %vm1188_vm7, %v3954_v6 }
  0xa2   : > { %3781 = vmatmul.mubr.msk.bf16.vlgmr.msra.gmra.mxu1 %vm1188_vm7, %v3955_v7 }
  0xa3   : > { %3799 = vmatmul.mubr.msk.bf16.vlgmr.msra.gmra.mxu0 %vm1188_vm7, %v3956_v8  ;;  %3815 = vmatpush3.bf16.msra.mxu1 %v2555_v10 }
  0xa4   : > { %3833 = vmatpush3.bf16.msra.mxu0 %v2754_v12  ;;  %3784 = vmatprep.mubr.msk.bf16.mxu1 %vm1188_vm7, %v3957_v11 }
  0xa5   : > { %3802 = vmatprep.mubr.msk.bf16.mxu0 %vm1188_vm7, %v3958_v13 }
  0xaa   : > { %3785 = vmatmul.mubr.msk.bf16.gmra.mxu1 %vm1188_vm7, %v3959_v14 }
  0xab   : > { %3803 = vmatmul.mubr.msk.bf16.gmra.mxu0 %vm1188_vm7, %v3960_v15  ;;  %3788 = vmatprep.mubr.msk.bf16.mxu1 %vm1188_vm7, %v3961_v16 }
  0xac   : > { %3806 = vmatprep.mubr.msk.bf16.mxu0 %vm1188_vm7, %v3962_v17 }
  0xb2   : > { %3789 = vmatmul.mubr.msk.bf16.gmra.mxu1 %vm1188_vm7, %v3963_v18 }
  0xb3   : > { %3807 = vmatmul.mubr.msk.bf16.gmra.mxu0 %vm1188_vm7, %v3964_v19  ;;  %3792 = vmatprep.mubr.msk.bf16.mxu1 %vm1188_vm7, %v3965_v20 }
  0xb4   : > { %3810 = vmatprep.mubr.msk.bf16.mxu0 %vm1188_vm7, %v3966_v21 }
  0xba   : > { %3793 = vmatmul.mubr.msk.bf16.gmra.mxu1 %vm1188_vm7, %v3967_v22 }
  0xbb   : > { %3811 = vmatmul.mubr.msk.bf16.gmra.mxu0 %vm1188_vm7, %v3969_v23  ;;  %3816 = vmatprep.mubr.msk.bf16.mxu1 %vm1188_vm7, %v3970_v24 }
  0xbc   : > { %3834 = vmatprep.mubr.msk.bf16.mxu0 %vm1188_vm7, %v3971_v25 }
  0xc2   : > { %3817 = vmatmul.mubr.msk.bf16.vlgmr.msra.gmra.mxu1 %vm1188_vm7, %v3972_v26 }
  0xc3   : > { %3835 = vmatmul.mubr.msk.bf16.vlgmr.msra.gmra.mxu0 %vm1188_vm7, %v3973_v27  ;;  %3820 = vmatprep.mubr.msk.bf16.mxu1 %vm1188_vm7, %v3974_v28 }
  0xc4   : > { %3838 = vmatprep.mubr.msk.bf16.mxu0 %vm1188_vm7, %v3975_v30 }
  0xca   : > { %3821 = vmatmul.mubr.msk.bf16.gmra.mxu1 %vm1188_vm7, %v3976_v31 }
  0xcb   : > { %3839 = vmatmul.mubr.msk.bf16.gmra.mxu0 %vm1188_vm7, %v3977_v32  ;;  %3824 = vmatprep.mubr.msk.bf16.mxu1 %vm1188_vm7, %v3978_v34 }
  0xcc   : > { %3842 = vmatprep.mubr.msk.bf16.mxu0 %vm1188_vm7, %v3979_v35 }
  0xd2   : > { %3825 = vmatmul.mubr.msk.bf16.gmra.mxu1 %vm1188_vm7, %v3980_v36 }
  0xd3   : > { %3843 = vmatmul.mubr.msk.bf16.gmra.mxu0 %vm1188_vm7, %v3981_v39  ;;  %3828 = vmatprep.mubr.msk.bf16.mxu1 %vm1188_vm7, %v3982_v41 }
  0xd4   : > { %3846 = vmatprep.mubr.msk.bf16.mxu0 %vm1188_vm7, %v3983_v42 }
  0xda   : > { %3829 = vmatmul.mubr.msk.bf16.gmra.mxu1 %vm1188_vm7, %v3984_v43 }
  0xdb   : > { %3847 = vmatmul.mubr.msk.bf16.gmra.mxu0 %vm1188_vm7, %v3985_v44 }
 0x10f   : > { %v3692_v46 = vpop.f32.mrf.mxu0  ;;  %v3700_v47 = vpop.f32.mrf.mxu1 }
 0x111   : > { %v1251_v48 = vpop.f32.mrf.mxu0  ;;  %v1283_v40 = vpop.f32.mrf.mxu1 }
 0x113   : > { %v3693_v45 = vpop.f32.mrf.mxu0  ;;  %v3701_v49 = vpop.f32.mrf.mxu1 }
 0x115   : > { %v1286_v50 = vpop.f32.mrf.mxu1  ;;  %v1254_v51 = vpop.f32.mrf.mxu0 }
 0x117   : > { %v3704_v52 = vpop.f32.mrf.mxu1  ;;  %v3696_v53 = vpop.f32.mrf.mxu0 }
 0x119   : > { %v1299_v54 = vpop.f32.mrf.mxu1  ;;  %v1267_v55 = vpop.f32.mrf.mxu0 }
 0x11b   : > { %v3705_v56 = vpop.f32.mrf.mxu1  ;;  %v3697_v0 = vpop.f32.mrf.mxu0 }
 0x11d   : > { %v4482_v57 = vpop.f32.mrf.mxu1  ;;  %v1270_v58 = vpop.f32.mrf.mxu0 }
 0x122   : > { %v3710_v29 = vpop.f32.mrf.mxu1 }
 0x123   : > { %v1424_v59 = vadd.f32 %v3710_v29, %v3692_v46  ;;  %v3728_v38 = vpop.f32.mrf.mxu0 }
 0x124   : > { %v1415_v60 = vpop.f32.mrf.mxu1 }
 0x125   : > { %v4484_v61 = vadd.f32 %v3728_v38, %v1424_v59  ;;  %v1416_v62 = vadd.f32 %v1415_v60, %v1251_v48  ;;  %v1597_v63 = vpop.f32.mrf.mxu0 }
 0x126   : > { %v3711_v9 = vpop.f32.mrf.mxu1 }
 0x127   : > { %v4486_v1 = vadd.f32 %v1597_v63, %v1416_v62  ;;  %v1427_v2 = vadd.f32 %v3711_v9, %v3693_v45  ;;  %v3729_v3 = vpop.f32.mrf.mxu0 }
 0x128   : > { %v1418_v4 = vpop.f32.mrf.mxu1 }
 0x129   : > { %v4488_v33 = vadd.f32 %v3729_v3, %v1427_v2  ;;  %v1419_v37 = vadd.f32 %v1418_v4, %v1254_v51  ;;  %v1600_v5 = vpop.f32.mrf.mxu0 }
 0x12a   : > { %v3714_v6 = vpop.f32.mrf.mxu1 }
 0x12b   : > { %v4490_v7 = vadd.f32 %v1600_v5, %v1419_v37  ;;  %v1440_v8 = vadd.f32 %v3714_v6, %v3696_v53  ;;  %v3732_v10 = vpop.f32.mrf.mxu0 }
 0x12c   : > { %v1431_v11 = vpop.f32.mrf.mxu1 }
 0x12d   : > { %v4492_v12 = vadd.f32 %v3732_v10, %v1440_v8  ;;  %v1432_v13 = vadd.f32 %v1431_v11, %v1267_v55  ;;  %v1613_v14 = vpop.f32.mrf.mxu0 }
 0x12e   : > { %v3715_v15 = vpop.f32.mrf.mxu1 }
 0x12f   : > { %v4494_v16 = vadd.f32 %v1613_v14, %v1432_v13  ;;  %v1443_v17 = vadd.f32 %v3715_v15, %v3697_v0  ;;  %v3733_v18 = vpop.f32.mrf.mxu0 }
 0x130   : > { %v1434_v19 = vpop.f32.mrf.mxu1 }
 0x131   : > { %v4496_v20 = vadd.f32 %v3733_v18, %v1443_v17  ;;  %v1435_v21 = vadd.f32 %v1434_v19, %v1270_v58  ;;  %v1616_v22 = vpop.f32.mrf.mxu0 }
 0x132   : > { %v3718_v23 = vpop.f32.mrf.mxu1 }
 0x133   : > { %v4498_v24 = vadd.f32 %v1616_v22, %v1435_v21  ;;  %v1456_v25 = vadd.f32 %v3718_v23, %v3700_v47  ;;  %v3736_v26 = vpop.f32.mrf.mxu0 }
 0x134   : > { %v1447_v27 = vpop.f32.mrf.mxu1 }
 0x135   : > { %v4500_v28 = vadd.f32 %v3736_v26, %v1456_v25  ;;  %v1448_v30 = vadd.f32 %v1447_v27, %v1283_v40  ;;  %v1629_v31 = vpop.f32.mrf.mxu0 }
 0x136   : > { %v3719_v32 = vpop.f32.mrf.mxu1 }
 0x137   : > { %v4502_v34 = vadd.f32 %v1629_v31, %v1448_v30  ;;  %v1459_v35 = vadd.f32 %v3719_v32, %v3701_v49  ;;  %v3737_v36 = vpop.f32.mrf.mxu0 }
 0x138   : > { %v1450_v39 = vpop.f32.mrf.mxu1 }
 0x139   : > { %v4504_v41 = vadd.f32 %v3737_v36, %v1459_v35  ;;  %v1451_v42 = vadd.f32 %v1450_v39, %v1286_v50  ;;  %v1632_v43 = vpop.f32.mrf.mxu0 }
 0x13a   : > { %v3722_v44 = vpop.f32.mrf.mxu1 }
 0x13b   : > { %v4506_v46 = vadd.f32 %v1632_v43, %v1451_v42  ;;  %v1472_v47 = vadd.f32 %v3722_v44, %v3704_v52  ;;  %v3740_v48 = vpop.f32.mrf.mxu0 }
 0x13c   : > { %v1463_v45 = vpop.f32.mrf.mxu1 }
 0x13d   : > { %v4508_v51 = vadd.f32 %v3740_v48, %v1472_v47  ;;  %v1464_v40 = vadd.f32 %v1463_v45, %v1299_v54  ;;  %v1645_v53 = vpop.f32.mrf.mxu0 }
 0x13e   : > { %v3723_v55 = vpop.f32.mrf.mxu1 }
 0x13f   : > { %v4510_v0 = vadd.f32 %v1645_v53, %v1464_v40  ;;  %v1475_v49 = vadd.f32 %v3723_v55, %v3705_v56  ;;  %v3741_v58 = vpop.f32.mrf.mxu0 }
 0x140   : > { %v1466_v29 = vpop.f32.mrf.mxu1 }
 0x141   : > { %v4512_v59 = vadd.f32 %v3741_v58, %v1475_v49  ;;  %v1467_v50 = vadd.f32 %v1466_v29, %v4482_v57  ;;  %v1648_v38 = vpop.f32.mrf.mxu0 }
 0x142   : > { %v3746_v60 = vpop.f32.mrf.mxu1 }
 0x143   : > { %v4515_v62 = vadd.f32 %v1648_v38, %v1467_v50  ;;  %v3764_v52 = vpop.f32.mrf.mxu0 }
 0x144   : > { %v1796_v63 = vpop.f32.mrf.mxu1 }
 0x145   : > { %v1994_v9 = vpop.f32.mrf.mxu0 }
 0x146   : > { %v3747_v2 = vpop.f32.mrf.mxu1 }
 0x147   : > { %v3765_v54 = vpop.f32.mrf.mxu0 }
 0x148   : > { %v1799_v3 = vpop.f32.mrf.mxu1 }
 0x149   : > { %v4517_v4 = vpop.f32.mrf.mxu0 }
 0x14a   : > { %v3750_v37 = vpop.f32.mrf.mxu1 }
 0x14b   : > { %v4519_v56 = vpop.f32.mrf.mxu0 }
 0x14c   : > { %v1812_v5 = vpop.f32.mrf.mxu1 }
 0x14d   : > { %v4521_v6 = vpop.f32.mrf.mxu0 }
 0x14e   : > { %v3751_v8 = vpop.f32.mrf.mxu1 }
 0x14f   : > { %v4523_v57 = vpop.f32.mrf.mxu0 }
 0x150   : > { %v1815_v10 = vpop.f32.mrf.mxu1 }
 0x151   : > { %v4525_v11 = vpop.f32.mrf.mxu0 }
 0x152   : > { %v3754_v13 = vpop.f32.mrf.mxu1 }
 0x153   : > { %v4527_v14 = vpop.f32.mrf.mxu0 }
 0x154   : > { %v1828_v15 = vpop.f32.mrf.mxu1 }
 0x155   : > { %v4529_v17 = vpop.f32.mrf.mxu0 }
 0x156   : > { %v3755_v18 = vpop.f32.mrf.mxu1 }
 0x157   : > { %v4531_v19 = vpop.f32.mrf.mxu0 }
 0x158   : > { %v1831_v21 = vpop.f32.mrf.mxu1 }
 0x159   : > { %v4533_v22 = vpop.f32.mrf.mxu0 }
 0x15a   : > { %v3758_v23 = vpop.f32.mrf.mxu1 }
 0x15b   : > { %v4535_v25 = vpop.f32.mrf.mxu0 }
 0x15c   : > { %4746 = vst [vmem:[#allocation5_spill] sm:$0xff] %v4535_v25  ;;  %v1844_v26 = vpop.f32.mrf.mxu1 }
 0x15d   : > { %v4537_v27 = vpop.f32.mrf.mxu0 }
 0x15e   : > { %4747 = vst [vmem:[#allocation6_spill] sm:$0xff] %v4537_v27  ;;  %v3759_v30 = vpop.f32.mrf.mxu1 }
 0x15f   : > { %v4539_v31 = vpop.f32.mrf.mxu0 }
 0x160   : > { %4748 = vst [vmem:[#allocation7_spill] sm:$0xff] %v4539_v31  ;;  %v1847_v32 = vpop.f32.mrf.mxu1 }
 0x161   : > { %v4541_v35 = vpop.f32.mrf.mxu0 }
 0x162   : > { %4749 = vst [vmem:[#allocation8_spill] sm:$0xff] %v4541_v35  ;;  %v3782_v36 = vpop.f32.mrf.mxu1 }
 0x163   : > { %v3800_v39 = vpop.f32.mrf.mxu0 }
 0x164   : > { %v2193_v42 = vpop.f32.mrf.mxu1 }
 0x165   : > { %v4543_v43 = vpop.f32.mrf.mxu0 }
 0x166   : > { %4750 = vst [vmem:[#allocation9_spill] sm:$0xff] %v4543_v43  ;;  %v3783_v44 = vpop.f32.mrf.mxu1 }
 0x167   : > { %v4545_v47 = vpop.f32.mrf.mxu0 }
 0x168   : > { %4751 = vst [vmem:[#allocation10_spill] sm:$0xff] %v4545_v47  ;;  %v2196_v48 = vpop.f32.mrf.mxu1 }
 0x169   : > { %v4547_v45 = vpop.f32.mrf.mxu0 }
 0x16a   : > { %4752 = vst [vmem:[#allocation11_spill] sm:$0xff] %v4547_v45  ;;  %v3786_v40 = vpop.f32.mrf.mxu1 }
 0x16b   : > { %v4549_v53 = vpop.f32.mrf.mxu0 }
 0x16c   : > { %4753 = vst [vmem:[#allocation12_spill] sm:$0xff] %v4549_v53  ;;  %v4551_v55 = vpop.f32.mrf.mxu1 }
 0x16d   : > { %4754 = vst [vmem:[#allocation13_spill] sm:$0xff] %v4551_v55  ;;  %v4553_v49 = vpop.f32.mrf.mxu0  ;;  %v1861_v55 = vadd.f32 %v3746_v60, %v4484_v61  ;;  %v1864_v60 = vadd.f32 %v1815_v10, %v4498_v24  ;;  %v1871_v24 = vadd.f32 %v1844_v26, %v4510_v0 }
 0x16e   : > { %4755 = vst [vmem:[#allocation14_spill] sm:$0xff] %v4553_v49  ;;  %v4555_v58 = vpop.f32.mrf.mxu1  ;;  %v1859_v49 = vadd.f32 %v1796_v63, %v4486_v1  ;;  %v1866_v1 = vadd.f32 %v3751_v8, %v4496_v20  ;;  %v1873_v20 = vadd.f32 %v3758_v23, %v4508_v51 }
 0x16f   : > { %4756 = vst [vmem:[#allocation15_spill] sm:$0xff] %v4555_v58  ;;  %v4557_v29 = vpop.f32.mrf.mxu0  ;;  %v2059_v27 = vadd.f32 %v3764_v52, %v1861_v55 }
 0x170   : > { %4757 = vst [vmem:[#allocation16_spill] sm:$0xff] %v4557_v29  ;;  %v4559_v50 = vpop.f32.mrf.mxu1  ;;  %v1862_v29 = vadd.f32 %v3747_v2, %v4488_v33  ;;  %v1869_v33 = vadd.f32 %v3754_v13, %v4500_v28  ;;  %v1867_v2 = vadd.f32 %v1828_v15, %v4502_v34  ;;  %v1874_v34 = vadd.f32 %v3759_v30, %v4512_v59  ;;  %v4764_v13 = vld [vmem:[#allocation5_spill] sm:$0xff] }
 0x171   : > { %4758 = vst [vmem:[#allocation17_spill] sm:$0xff] %v4559_v50  ;;  %v4561_v38 = vpop.f32.mrf.mxu0  ;;  %v2258_v52 = vadd.f32 %v3782_v36, %v2059_v27  ;;  %v2071_v15 = vadd.f32 %v4764_v13, %v1873_v20  ;;  %v4767_v27 = vld [vmem:[#allocation8_spill] sm:$0xff]  ;;  %v4769_v36 = vld [vmem:[#allocation10_spill] sm:$0xff] }
 0x172   : > { %4759 = vst [vmem:[#allocation18_spill] sm:$0xff] %v4561_v38  ;;  %v4563_v43 = vpop.f32.mrf.mxu1  ;;  %v1860_v38 = vadd.f32 %v1799_v3, %v4490_v7  ;;  %v2060_v61 = vadd.f32 %v3765_v54, %v1862_v29  ;;  %v1870_v7 = vadd.f32 %v3755_v18, %v4504_v41  ;;  %v1872_v41 = vadd.f32 %v1847_v32, %v4515_v62  ;;  %v4765_v18 = vld [vmem:[#allocation6_spill] sm:$0xff]  ;;  %v4768_v32 = vld [vmem:[#allocation9_spill] sm:$0xff] }
 0x173   : > { %4760 = vst [vmem:[#allocation19_spill] sm:$0xff] %v4563_v43  ;;  %v4565_v47 = vpop.f32.mrf.mxu0  ;;  %v2065_v0 = vadd.f32 %v4529_v17, %v1867_v2  ;;  %v2457_v10 = vadd.f32 %v3800_v39, %v2258_v52  ;;  %v4775_v2 = vld [vmem:[#allocation12_spill] sm:$0xff] }
 0x174   : > { %4761 = vst [vmem:[#allocation20_spill] sm:$0xff] %v4565_v47  ;;  %v2225_v45 = vpop.f32.mrf.mxu1  ;;  %v1865_v47 = vadd.f32 %v3750_v37, %v4492_v12  ;;  %v1868_v12 = vadd.f32 %v1831_v21, %v4506_v46  ;;  %v2259_v8 = vadd.f32 %v3783_v44, %v2060_v61  ;;  %v2070_v30 = vadd.f32 %v4767_v27, %v1872_v41  ;;  %v4770_v39 = vld [vmem:[#allocation13_spill] sm:$0xff] }
 0x175   : > { %v4567_v35 = vpop.f32.mrf.mxu0  ;;  %v2264_v29 = vadd.f32 %v2225_v45, %v2065_v0 }
 0x176   : > { %4762 = vst [vmem:[#allocation21_spill] sm:$0xff] %v4567_v35  ;;  %v4569_v53 = vpop.f32.mrf.mxu1  ;;  %v2057_v35 = vadd.f32 %v1994_v9, %v1859_v49  ;;  %v2063_v54 = vadd.f32 %v4519_v56, %v1865_v47  ;;  %v2067_v56 = vadd.f32 %v4527_v14, %v1869_v33  ;;  %v2066_v59 = vadd.f32 %v4533_v22, %v1868_v12  ;;  %v4766_v14 = vld [vmem:[#allocation7_spill] sm:$0xff] }
 0x177   : > { %4763 = vst [vmem:[#allocation22_spill] sm:$0xff] %v4569_v53  ;;  %v4573_v58 = vpop.f32.mrf.mxu0  ;;  %v1863_v53 = vadd.f32 %v1812_v5, %v4494_v16  ;;  %v2058_v16 = vadd.f32 %v4517_v4, %v1860_v38  ;;  %v2064_v5 = vadd.f32 %v4523_v57, %v1866_v1  ;;  %v2062_v4 = vadd.f32 %v4525_v11, %v1864_v60  ;;  %v4771_v44 = vld [vmem:[#allocation15_spill] sm:$0xff]  ;;  %v4778_v45 = vld [vmem:[#allocation16_spill] sm:$0xff] }
 0x178   : > { %v2228_v50 = vpop.f32.mrf.mxu1  ;;  %v2256_v37 = vadd.f32 %v2193_v42, %v2057_v35  ;;  %v2069_v57 = vadd.f32 %v4765_v18, %v1871_v24  ;;  %v2262_v11 = vadd.f32 %v3786_v40, %v2063_v54  ;;  %v2072_v26 = vadd.f32 %v4766_v14, %v1874_v34  ;;  %v4774_v60 = vld [vmem:[#allocation11_spill] sm:$0xff] }
 0x179   : > { %v4576_v31 = vpop.f32.mrf.mxu0  ;;  %v2061_v28 = vadd.f32 %v4521_v6, %v1863_v53  ;;  %v2068_v6 = vadd.f32 %v4531_v19, %v1870_v7  ;;  %v2257_v21 = vadd.f32 %v2196_v48, %v2058_v16  ;;  %v2458_v22 = vadd.f32 %v4769_v36, %v2259_v8  ;;  %v4772_v53 = vld [vmem:[#allocation17_spill] sm:$0xff] }
 0x17a   : > { %v3794_v43 = vpop.f32.mrf.mxu1  ;;  %v2455_v17 = vadd.f32 %v4768_v32, %v2256_v37  ;;  %v2263_v47 = vadd.f32 %v4771_v44, %v2064_v5  ;;  %v2261_v55 = vadd.f32 %v4772_v53, %v2062_v4  ;;  %v4773_v48 = vld [vmem:[#allocation19_spill] sm:$0xff]  ;;  %v2461_v7 = vadd.f32 %v4775_v2, %v2262_v11  ;;  %v4777_v37 = vld [vmem:[#allocation14_spill] sm:$0xff] }
 0x17b   : > { %v4581_v25 = vpop.f32.mrf.mxu0  ;;  %v2260_v42 = vadd.f32 %v4770_v39, %v2061_v28  ;;  %v2266_v40 = vadd.f32 %v4773_v48, %v2067_v56  ;;  %v2456_v33 = vadd.f32 %v4774_v60, %v2257_v21  ;;  %v2265_v16 = vadd.f32 %v2228_v50, %v2066_v59  ;;  %v4780_v18 = vld [vmem:[#allocation20_spill] sm:$0xff] }
 0x17c   : > { %v2241_v63 = vpop.f32.mrf.mxu1  ;;  %v2270_v20 = vadd.f32 %v3794_v43, %v2071_v15  ;;  %v2462_v4 = vadd.f32 %v4778_v45, %v2263_v47 }
 0x17d   : > { %v4589_v9 = vpop.f32.mrf.mxu0  ;;  %v2268_v24 = vadd.f32 %v2241_v63, %v2069_v57  ;;  %v2459_v5 = vadd.f32 %v4777_v37, %v2260_v42  ;;  %v4781_v21 = vld [vmem:[#allocation21_spill] sm:$0xff]  ;;  %v4636_v15 = vadd.f32 %v4576_v31, %v2265_v16 }
 0x17e   : > { %v3795_v3 = vpop.f32.mrf.mxu1  ;;  %v4776_v12 = vld [vmem:[#allocation22_spill] sm:$0xff]  ;;  %v4628_v50 = vadd.f32 %v4781_v21, %v2264_v29 }
 0x17f   : > { %v4598_v46 = vpop.f32.mrf.mxu0  ;;  %v2267_v52 = vadd.f32 %v4776_v12, %v2068_v6  ;;  %v2271_v56 = vadd.f32 %v3795_v3, %v2072_v26  ;;  %v2465_v6 = vadd.f32 %v4780_v18, %v2266_v40  ;;  %v4642_v14 = vadd.f32 %v4589_v9, %v2268_v24 }
 0x180   : > { %v4603_v51 = vpop.f32.mrf.mxu1 }
 0x181   : > { %v4608_v62 = vpop.f32.mrf.mxu0  ;;  %v4633_v59 = vadd.f32 %v4573_v58, %v2267_v52  ;;  %v4647_v58 = vadd.f32 %v4598_v46, %v2271_v56  ;;  %v2269_v36 = vadd.f32 %v4603_v51, %v2070_v30 }
 0x182   : > { %v3818_v23 = vpop.f32.mrf.mxu1 }
 0x183   : > { %v2656_v35 = vadd.f32 %v3818_v23, %v2457_v10  ;;  %v3836_v19 = vpop.f32.mrf.mxu0  ;;  %v4779_v10 = vld [vmem:[#allocation18_spill] sm:$0xff]  ;;  %v4639_v23 = vadd.f32 %v4581_v25, %v2270_v20 }
 0x184   : > { %v2591_v49 = vpop.f32.mrf.mxu1  ;;  %v2460_v13 = vadd.f32 %v4779_v10, %v2261_v55 }
 0x185   : > { %v2855_v38 = vadd.f32 %v3836_v19, %v2656_v35  ;;  %v2654_v61 = vadd.f32 %v2591_v49, %v2455_v17  ;;  %v2790_v1 = vpop.f32.mrf.mxu0 }
 0x186   : > { %v3819_v54 = vpop.f32.mrf.mxu1 }
 0x187   : > { %v3546_v28 = vpack.c.bf16 %v2855_v38, %v2855_v38  ;;  %v2853_v34 = vadd.f32 %v2790_v1, %v2654_v61  ;;  %v3837_v41 = vpop.f32.mrf.mxu0  ;;  %v2657_v8 = vadd.f32 %v3819_v54, %v2458_v22  ;;  %v2910_v26 = vmul.f32 %v2855_v38, %v2855_v38 }
 0x188   : > { %v2594_v0 = vpop.f32.mrf.mxu1  ;;  %v2872_v55 = vsel %vm1188_vm7, %v2855_v38, 0.0 }
 0x189   : > { %3028 = vst.msk [vmem:[%s4117_s17 + $0x8] sm:$0xf] %vm629_vm0, %v3546_v28  ;;  %v3544_v43 = vpack.c.bf16 %v2853_v34, %v2853_v34  ;;  %v2793_v63 = vpop.f32.mrf.mxu0  ;;  %v2856_v3 = vadd.f32 %v3837_v41, %v2657_v8  ;;  %v2655_v57 = vadd.f32 %v2594_v0, %v2456_v33  ;;  %v2908_v31 = vmul.f32 %v2853_v34, %v2853_v34 }
 0x18a   : > { %v3822_v11 = vpop.f32.mrf.mxu1  ;;  %v2869_v25 = vsel %vm1188_vm7, %v2853_v34, 0.0  ;;  %v2927_v49 = vsel %vm1188_vm7, %v2910_v26, 0.0 }
 0x18b   : > { %3026 = vst.msk [vmem:[%s4117_s17] sm:$0xf] %vm629_vm0, %v3544_v43  ;;  %v2660_v27 = vadd.f32 %v3822_v11, %v2461_v7  ;;  %v3840_v32 = vpop.f32.mrf.mxu0  ;;  %v3547_v17 = vpack.c.bf16 %v2856_v3, %v2856_v3  ;;  %v2854_v35 = vadd.f32 %v2793_v63, %v2655_v57  ;;  %v2911_v42 = vmul.f32 %v2856_v3, %v2856_v3 }
 0x18c   : > { %v2607_v19 = vpop.f32.mrf.mxu1  ;;  %v2924_v40 = vsel %vm1188_vm7, %v2908_v31, 0.0  ;;  %v2874_v33 = vsel %vm1188_vm7, %v2856_v3, 0.0 }
 0x18d   : > { %v2859_v22 = vadd.f32 %v3840_v32, %v2660_v27  ;;  %v2658_v9 = vadd.f32 %v2607_v19, %v2459_v5  ;;  %v2806_v39 = vpop.f32.mrf.mxu0  ;;  %3029 = vst.msk [vmem:[%s4117_s17 + $0xc] sm:$0xf] %vm629_vm0, %v3547_v17  ;;  %v2870_v44 = vsel %vm1188_vm7, %v2854_v35, 0.0  ;;  %v2909_v47 = vmul.f32 %v2854_v35, %v2854_v35 }
 0x18e   : > { %v3545_v46 = vpack.c.bf16 %v2854_v35, %v2854_v35  ;;  %v3823_v53 = vpop.f32.mrf.mxu1  ;;  %v2871_v51 = vadd.f32 %v2870_v44, %v2869_v25  ;;  %v2929_v52 = vsel %vm1188_vm7, %v2911_v42, 0.0  ;;  %v2468_v35 = vadd.f32 %v4608_v62, %v2269_v36 }
 0x18f   : > { %v3550_v30 = vpack.c.bf16 %v2859_v22, %v2859_v22  ;;  %v3841_v48 = vpop.f32.mrf.mxu0  ;;  %v2925_v29 = vsel %vm1188_vm7, %v2909_v47, 0.0  ;;  %v2857_v61 = vadd.f32 %v2806_v39, %v2658_v9  ;;  %v2661_v1 = vadd.f32 %v3823_v53, %v2462_v4 }
 0x190   : > { %3027 = vst.msk [vmem:[%s4117_s17 + $0x4] sm:$0xf] %vm629_vm0, %v3545_v46  ;;  %v2610_v60 = vpop.f32.mrf.mxu1  ;;  %v2873_v2 = vadd.f32 %v2872_v55, %v2871_v51  ;;  %v2926_v7 = vadd.f32 %v2925_v29, %v2924_v40  ;;  %v2914_v45 = vmul.f32 %v2859_v22, %v2859_v22  ;;  %v2880_v19 = vsel %vm1188_vm7, %v2859_v22, 0.0 }
 0x191   : > { %3032 = vst.msk [vmem:[%s4117_s17 + $0x18] sm:$0xf] %vm629_vm0, %v3550_v30  ;;  %v2659_v38 = vadd.f32 %v2610_v60, %v2460_v13  ;;  %v2809_v12 = vpop.f32.mrf.mxu0  ;;  %v2912_v16 = vmul.f32 %v2857_v61, %v2857_v61  ;;  %v3548_v54 = vpack.c.bf16 %v2857_v61, %v2857_v61  ;;  %v2860_v20 = vadd.f32 %v3841_v48, %v2661_v1 }
 0x192   : > { %v3826_v24 = vpop.f32.mrf.mxu1  ;;  %v2928_v28 = vadd.f32 %v2927_v49, %v2926_v7  ;;  %v2875_v34 = vadd.f32 %v2874_v33, %v2873_v2  ;;  %v2876_v4 = vsel %vm1188_vm7, %v2857_v61, 0.0  ;;  %v2935_v53 = vsel %vm1188_vm7, %v2914_v45, 0.0 }
 0x193   : > { %v2858_v41 = vadd.f32 %v2809_v12, %v2659_v38  ;;  %v2664_v37 = vadd.f32 %v3826_v24, %v2465_v6  ;;  %v3844_v5 = vpop.f32.mrf.mxu0  ;;  %v2931_v56 = vsel %vm1188_vm7, %v2912_v16, 0.0  ;;  %3030 = vst.msk [vmem:[%s4117_s17 + $0x10] sm:$0xf] %vm629_vm0, %v3548_v54  ;;  %v3551_v8 = vpack.c.bf16 %v2860_v20, %v2860_v20 }
 0x194   : > { %v2623_v0 = vpop.f32.mrf.mxu1  ;;  %v2877_v10 = vadd.f32 %v2876_v4, %v2875_v34  ;;  %v2930_v13 = vadd.f32 %v2929_v52, %v2928_v28  ;;  %v2915_v63 = vmul.f32 %v2860_v20, %v2860_v20 }
 0x195   : > { %v2878_v18 = vsel %vm1188_vm7, %v2858_v41, 0.0  ;;  %v2913_v21 = vmul.f32 %v2858_v41, %v2858_v41  ;;  %v2822_v43 = vpop.f32.mrf.mxu0  ;;  %3033 = vst.msk [vmem:[%s4117_s17 + $0x1c] sm:$0xf] %vm629_vm0, %v3551_v8  ;;  %v3549_v6 = vpack.c.bf16 %v2858_v41, %v2858_v41  ;;  %v2863_v3 = vadd.f32 %v3844_v5, %v2664_v37 }
 0x196   : > { %v2662_v57 = vadd.f32 %v2623_v0, %v4628_v50  ;;  %v3827_v11 = vpop.f32.mrf.mxu1  ;;  %v2932_v26 = vadd.f32 %v2931_v56, %v2930_v13  ;;  %v2879_v27 = vadd.f32 %v2878_v18, %v2877_v10  ;;  %v2937_v55 = vsel %vm1188_vm7, %v2915_v63, 0.0 }
 0x197   : > { %v2933_v32 = vsel %vm1188_vm7, %v2913_v21, 0.0  ;;  %v2665_v31 = vadd.f32 %v3827_v11, %v4633_v59  ;;  %v3845_v17 = vpop.f32.mrf.mxu0  ;;  %3031 = vst.msk [vmem:[%s4117_s17 + $0x14] sm:$0xf] %vm629_vm0, %v3549_v6  ;;  %v3554_v25 = vpack.c.bf16 %v2863_v3, %v2863_v3  ;;  %v2882_v59 = vsel %vm1188_vm7, %v2860_v20, 0.0 }
 0x198   : > { %v2861_v9 = vadd.f32 %v2822_v43, %v2662_v57  ;;  %v2626_v39 = vpop.f32.mrf.mxu1  ;;  %v2881_v42 = vadd.f32 %v2880_v19, %v2879_v27  ;;  %v2934_v50 = vadd.f32 %v2933_v32, %v2932_v26  ;;  %v2918_v51 = vmul.f32 %v2863_v3, %v2863_v3 }
 0x199   : > { %v2864_v44 = vadd.f32 %v3845_v17, %v2665_v31  ;;  %v2663_v47 = vadd.f32 %v2626_v39, %v4636_v15  ;;  %v2825_v46 = vpop.f32.mrf.mxu0  ;;  %3036 = vst.msk [vmem:[%s4117_s17 + $0x28] sm:$0xf] %vm629_vm0, %v3554_v25  ;;  %v2888_v37 = vsel %vm1188_vm7, %v2863_v3, 0.0 }
 0x19a   : > { %v2916_v62 = vmul.f32 %v2861_v9, %v2861_v9  ;;  %v3552_v36 = vpack.c.bf16 %v2861_v9, %v2861_v9  ;;  %v3830_v22 = vpop.f32.mrf.mxu1  ;;  %v2936_v49 = vadd.f32 %v2935_v53, %v2934_v50  ;;  %v2883_v30 = vadd.f32 %v2882_v59, %v2881_v42 }
 0x19b   : > { %v3848_v48 = vpop.f32.mrf.mxu0  ;;  %v2884_v40 = vsel %vm1188_vm7, %v2861_v9, 0.0  ;;  %v3555_v15 = vpack.c.bf16 %v2864_v44, %v2864_v44  ;;  %v2862_v29 = vadd.f32 %v2825_v46, %v2663_v47  ;;  %v2668_v61 = vadd.f32 %v3830_v22, %v4639_v23 }
 0x19c   : > { %3034 = vst.msk [vmem:[%s4117_s17 + $0x20] sm:$0xf] %vm629_vm0, %v3552_v36  ;;  %v2639_v1 = vpop.f32.mrf.mxu1  ;;  %v2885_v60 = vadd.f32 %v2884_v40, %v2883_v30  ;;  %v2938_v33 = vadd.f32 %v2937_v55, %v2936_v49  ;;  %v2939_v2 = vsel %vm1188_vm7, %v2916_v62, 0.0  ;;  %v2943_v56 = vsel %vm1188_vm7, %v2918_v51, 0.0 }
 0x19d   : > { %v2666_v7 = vadd.f32 %v2639_v1, %v4642_v14  ;;  %v2838_v38 = vpop.f32.mrf.mxu0  ;;  %3037 = vst.msk [vmem:[%s4117_s17 + $0x2c] sm:$0xf] %vm629_vm0, %v3555_v15  ;;  %v2886_v12 = vsel %vm1188_vm7, %v2862_v29, 0.0  ;;  %v2917_v52 = vmul.f32 %v2862_v29, %v2862_v29  ;;  %v3553_v16 = vpack.c.bf16 %v2862_v29, %v2862_v29 }
 0x19e   : > { %v2867_v54 = vadd.f32 %v3848_v48, %v2668_v61  ;;  %v3831_v20 = vpop.f32.mrf.mxu1  ;;  %v2940_v24 = vadd.f32 %v2939_v2, %v2938_v33  ;;  %v2887_v23 = vadd.f32 %v2886_v12, %v2885_v60  ;;  %v2919_v14 = vmul.f32 %v2864_v44, %v2864_v44 }
 0x19f   : > { %v2865_v28 = vadd.f32 %v2838_v38, %v2666_v7  ;;  %v2669_v34 = vadd.f32 %v3831_v20, %v4647_v58  ;;  %v3849_v41 = vpop.f32.mrf.mxu0  ;;  %v2941_v5 = vsel %vm1188_vm7, %v2917_v52, 0.0  ;;  %3035 = vst.msk [vmem:[%s4117_s17 + $0x24] sm:$0xf] %vm629_vm0, %v3553_v16  ;;  %v2890_v8 = vsel %vm1188_vm7, %v2864_v44, 0.0 }
 0x1a0   : > { %v3558_v45 = vpack.c.bf16 %v2867_v54, %v2867_v54  ;;  %v2642_v4 = vpop.f32.mrf.mxu1  ;;  %v2889_v0 = vadd.f32 %v2888_v37, %v2887_v23  ;;  %v2942_v10 = vadd.f32 %v2941_v5, %v2940_v24  ;;  %v2945_v3 = vsel %vm1188_vm7, %v2919_v14, 0.0 }
 0x1a1   : > { %v2920_v58 = vmul.f32 %v2865_v28, %v2865_v28  ;;  %v3556_v13 = vpack.c.bf16 %v2865_v28, %v2865_v28  ;;  %v2868_v18 = vadd.f32 %v3849_v41, %v2669_v34  ;;  %v2667_v21 = vadd.f32 %v2642_v4, %v2468_v35  ;;  %v2841_v6 = vpop.f32.mrf.mxu0 }
 0x1a2   : > { %3040 = vst.msk [vmem:[%s4117_s17 + $0x38] sm:$0xf] %vm629_vm0, %v3558_v45  ;;  %v2944_v43 = vadd.f32 %v2943_v56, %v2942_v10  ;;  %v2891_v63 = vadd.f32 %v2890_v8, %v2889_v0  ;;  %v2892_v57 = vsel %vm1188_vm7, %v2865_v28, 0.0  ;;  %v2922_v27 = vmul.f32 %v2867_v54, %v2867_v54 }
 0x1a3   : > { %3038 = vst.msk [vmem:[%s4117_s17 + $0x30] sm:$0xf] %vm629_vm0, %v3556_v13  ;;  %v3559_v11 = vpack.c.bf16 %v2868_v18, %v2868_v18  ;;  %v2866_v26 = vadd.f32 %v2841_v6, %v2667_v21  ;;  %v2947_v17 = vsel %vm1188_vm7, %v2920_v58, 0.0  ;;  %v2896_v42 = vsel %vm1188_vm7, %v2867_v54, 0.0 }
 0x1a4   : > { %v2893_v32 = vadd.f32 %v2892_v57, %v2891_v63  ;;  %v2946_v31 = vadd.f32 %v2945_v3, %v2944_v43  ;;  %v2923_v50 = vmul.f32 %v2868_v18, %v2868_v18  ;;  %v2951_v53 = vsel %vm1188_vm7, %v2922_v27, 0.0 }
 0x1a5   : > { %3041 = vst.msk [vmem:[%s4117_s17 + $0x3c] sm:$0xf] %vm629_vm0, %v3559_v11  ;;  %v2894_v35 = vsel %vm1188_vm7, %v2866_v26, 0.0  ;;  %v2921_v19 = vmul.f32 %v2866_v26, %v2866_v26  ;;  %v3557_v25 = vpack.c.bf16 %v2866_v26, %v2866_v26  ;;  %v2898_v59 = vsel %vm1188_vm7, %v2868_v18, 0.0 }
 0x1a6   : > { %v2948_v9 = vadd.f32 %v2947_v17, %v2946_v31  ;;  %v2895_v39 = vadd.f32 %v2894_v35, %v2893_v32  ;;  %v2953_v22 = vsel %vm1188_vm7, %v2923_v50, 0.0 }
 0x1a7   : > { %v2949_v44 = vsel %vm1188_vm7, %v2921_v19, 0.0  ;;  %3039 = vst.msk [vmem:[%s4117_s17 + $0x34] sm:$0xf] %vm629_vm0, %v3557_v25  ;;  %vm2906_vm0 = vcmask 57344  }
 0x1a8   : > { %v2897_v47 = vadd.f32 %v2896_v42, %v2895_v39  ;;  %v2950_v46 = vadd.f32 %v2949_v44, %v2948_v9 }
 0x1aa   : > { %v2899_v62 = vadd.f32 %v2898_v59, %v2897_v47  ;;  %v2952_v36 = vadd.f32 %v2951_v53, %v2950_v46 }
 0x1ac   : > { %v2900_v55 = vrot.slane %v2899_v62, 4  ;;  %v2954_v49 = vadd.f32 %v2953_v22, %v2952_v36 }
 0x1ae   : > { %v2901_v51 = vadd.f32 %v2900_v55, %v2899_v62  ;;  %v2955_v30 = vrot.slane %v2954_v49, 4 }
 0x1b0   : > { %v2902_v48 = vrot.slane %v2901_v51, 2  ;;  %v2956_v40 = vadd.f32 %v2955_v30, %v2954_v49 }
 0x1b2   : > { %v2903_v15 = vadd.f32 %v2902_v48, %v2901_v51  ;;  %v2957_v29 = vrot.slane %v2956_v40, 2 }
 0x1b4   : > { %v2904_v61 = vrot.slane %v2903_v15, 1  ;;  %v2958_v1 = vadd.f32 %v2957_v29, %v2956_v40 }
 0x1b6   : > { %v2905_v60 = vadd.f32 %v2904_v61, %v2903_v15  ;;  %v2959_v33 = vrot.slane %v2958_v1, 1 }
 0x1b8   : > { %2907 = vst.msk [vmem:[%s4151_s16] sm:$0x1] %vm2906_vm0, %v2905_v60  ;;  %v2960_v2 = vadd.f32 %v2959_v33, %v2958_v1 }
 0x1ba   : > { %2961 = vst.msk [vmem:[%s4151_s16 + $0x1] sm:$0x1] %vm2906_vm0, %v2960_v2 }
 0x1bb PF: > { %s17_s25 = sadd.s32 1, %s4024_s25   ;;  %s4782_s21 = smov %s4016_s23 }
 0x1bc   : > { %p14_p13 = scmp.ge.s32.totalorder %s17_s25, 6   ;;  %s4783_s22 = smov %s4020_s24 }
 0x1bd   : > { %s4784_s23 = smov %s4787_s26  ;;  %s4785_s24 = smov %s4791_s27 }
 0x1be   :  { %16 = sbr.rel (!%p14_p13) target bundleno = 3 (0x3), region = 111 }

</bundles_post_ra>
